<compile_context>
chip_gen: v5e
topology: v5e:2x2
jax: 0.10.0
libtpu: 0.0.40
codegen_flags: <defaults>
</compile_context>

<pallas_src>
import numpy as np
import jax
import jax.numpy as jnp
from jax.experimental import pallas as pl
from jax.experimental.pallas import tpu as pltpu

# ----------------------------- configuration -------------------------------------------------
BATCH = 2
WINDOW = 8        # conv kernel height == input window length
N_MULTIV = 16     # number of univariate series == transformer sequence length
IN_DIM = 1
N_KERNELS = 32
D_MODEL = 64
N_HEAD = 4
D_K = 16
D_V = 16          # == D_K
D_INNER = 128
N_LAYERS = 2
OUT_DIM = 8
LN_EPS = 1e-5

# -------- packed-slab layout constants --------
QKV_COLS = 3 * N_HEAD * D_K               # 192  ([Wq | Wk | Wv], head-major inside each)
COL_W1 = 256                              # w1 starts on a 128-lane boundary
COL_FC = COL_W1 + D_INNER                 # 384
WIN_COLS = COL_FC + D_MODEL               # 448

STEM_ROWS = 48
ROW_CB = WINDOW + N_KERNELS               # 40
ROW_IB = ROW_CB + 1                       # 41
ROW_OB = ROW_IB + 1                       # 42

HEAD_COLS = N_MULTIV * OUT_DIM            # 128
HEAD_MASK0 = D_MODEL                      # 64
HEAD_FOLD0 = HEAD_MASK0 + BATCH * N_MULTIV   # 96
HEAD_SEL0 = HEAD_FOLD0 + HEAD_COLS        # 224
HEAD_ROWS = HEAD_SEL0 + BATCH             # 226


# ----------------------------- in-kernel helpers ---------------------------------------------
def _layernorm(x, gamma, beta, eps=LN_EPS):
    mu = jnp.mean(x, axis=-1, keepdims=True)
    xc = x - mu
    var = jnp.mean(xc * xc, axis=-1, keepdims=True)
    return xc * jax.lax.rsqrt(var + eps) * gamma + beta


# ----------------------------- the single fused kernel ----------------------------------------
def fused_forward_kernel(x_ref, stem_ref, win_ref, w2_ref, vec_ref, head_ref, o_ref):
    f32 = jnp.float32

    # ---- stem: conv(window,1) -> ReLU -> in_linear, batch folded into rows -------------------
    # x_ref: (B, W, N). Concatenate batches along lanes, one tiny in-kernel transpose.
    x_all = jnp.concatenate([x_ref[b] for b in range(BATCH)], axis=1)       # (W, B*N)
    xt = x_all.T                                                            # (B*N, W), b-major rows

    cw = stem_ref[0:WINDOW, 0:N_KERNELS]                                    # (8, 32)
    iw = stem_ref[WINDOW:WINDOW + N_KERNELS, :]                             # (32, 64)
    cb = stem_ref[ROW_CB:ROW_CB + 1, 0:N_KERNELS]                           # (1, 32)
    ib = stem_ref[ROW_IB:ROW_IB + 1, :]                                     # (1, 64)
    ob = stem_ref[ROW_OB:ROW_OB + 1, 0:OUT_DIM]                             # (1, 8)

    h = jnp.maximum(jnp.dot(xt, cw, preferred_element_type=f32) + cb, 0.0)  # (32, 32)
    enc = jnp.dot(h, iw, preferred_element_type=f32) + ib                   # (32, 64)

    # ---- encoder layers (static unroll; per-layer slabs statically sliced) -------------------
    for l in range(N_LAYERS):
        wqkv = win_ref[l, :, 0:QKV_COLS]                                    # (64, 192)
        w1 = win_ref[l, :, COL_W1:COL_W1 + D_INNER]                         # (64, 128)
        fcw = win_ref[l, :, COL_FC:COL_FC + D_MODEL]                        # (64, 64)
        w2 = w2_ref[l]                                                      # (128, 64)
        bqkv = vec_ref[l, 0:1, :]                                           # (1, 192)
        fcb = vec_ref[l, 1:2, 0:D_MODEL]
        g1 = vec_ref[l, 2:3, 0:D_MODEL]
        be1 = vec_ref[l, 3:4, 0:D_MODEL]
        b1 = vec_ref[l, 4:5, 0:D_INNER]
        b2 = vec_ref[l, 5:6, 0:D_MODEL]
        g2 = vec_ref[l, 6:7, 0:D_MODEL]
        be2 = vec_ref[l, 7:8, 0:D_MODEL]

        # fused Q/K/V projection for all heads and both batches: ONE (32,64)x(64,192) matmul.
        # 1/sqrt(d_k) temperature is pre-folded into the Q columns / bias at pack time.
        qkv = jnp.dot(enc, wqkv, preferred_element_type=f32) + bqkv         # (B*N, 192)

        # regroup into per-(batch, head) tiles (B*H, N, d_k); only static slices + a stack.
        def heads(col0):
            tiles = []
            for b in range(BATCH):
                rows = qkv[b * N_MULTIV:(b + 1) * N_MULTIV]                 # (N, 192)
                for hh in range(N_HEAD):
                    tiles.append(rows[:, col0 + hh * D_K:col0 + (hh + 1) * D_K])
            return jnp.stack(tiles)                                         # (B*H, N, d_k)

        q3 = heads(0)
        k3 = heads(N_HEAD * D_K)
        v3 = heads(2 * N_HEAD * D_K)

        # ScaledDotProductAttention: softmax over keys (dim=2); attention dropout = identity.
        s = jnp.einsum('gic,gjc->gij', q3, k3, preferred_element_type=f32)  # (B*H, N, N)
        s = s - jnp.max(s, axis=-1, keepdims=True)
        p = jnp.exp(s)
        denom = jnp.sum(p, axis=-1, keepdims=True)
        r = pl.reciprocal(denom, approx=True)
        r = r * (2.0 - denom * r)                      # one Newton step -> f32 accuracy (EUP+VPU)
        p = p * r
        ctx = jnp.einsum('gij,gjc->gic', p, v3, preferred_element_type=f32)  # (B*H, N, d_v)

        # concat heads back to (B*N, H*d_v), then ONE fc matmul, residual + LN.
        cat = jnp.concatenate(
            [jnp.concatenate([ctx[b * N_HEAD + hh] for hh in range(N_HEAD)], axis=1)
             for b in range(BATCH)], axis=0)                                # (B*N, D)
        attn_out = jnp.dot(cat, fcw, preferred_element_type=f32) + fcb
        y = _layernorm(attn_out + enc, g1, be1)

        # position-wise FFN (Conv1d k=1 == Linear), residual + LN; M = B*N = 32 matmuls.
        hid = jnp.maximum(jnp.dot(y, w1, preferred_element_type=f32) + b1, 0.0)
        z = jnp.dot(hid, w2, preferred_element_type=f32) + b2
        enc = _layernorm(z + y, g2, be2)

    # ---- head: out_linear over the (n d) flatten, as a non-serial wide contraction -----------
    # T[b*N+n', n*OUT+o] = <enc row (b,n'), ow block n>; the constant block-diagonal mask keeps
    # n'==n, `fold` sums the surviving lane groups, `sel` sums rows per batch. 3 MXU pushes, no
    # serial M=1 accumulate chain.
    ow2 = head_ref[0:D_MODEL, :]                                            # (64, 128)
    mask = head_ref[HEAD_MASK0:HEAD_MASK0 + BATCH * N_MULTIV, :]            # (32, 128)
    fold = head_ref[HEAD_FOLD0:HEAD_FOLD0 + HEAD_COLS, 0:OUT_DIM]           # (128, 8)
    sel = head_ref[HEAD_SEL0:HEAD_SEL0 + BATCH, 0:BATCH * N_MULTIV]         # (2, 32)

    T = jnp.dot(enc, ow2, preferred_element_type=f32) * mask                # (32, 128)
    R = jnp.dot(T, fold, preferred_element_type=f32)                        # (32, 8)
    o_ref[...] = jnp.dot(sel, R, preferred_element_type=f32) + ob           # (B, OUT) single store


# ----------------------------- wrapper ---------------------------------------------------------
def timeseries_selfattn_forward(x_blnd, packed):
    """x_blnd: (B, WINDOW, N_MULTIV, IN_DIM) -> (B, OUT_DIM)."""
    assert x_blnd.shape == (BATCH, WINDOW, N_MULTIV, IN_DIM)
    x_bwn = x_blnd[..., 0]                         # (B, W, N); the (0,2,1) transpose is in-kernel
    stem, win, w2s, vecs, head = packed
    vmem = lambda: pl.BlockSpec(memory_space=pltpu.MemorySpace.VMEM)
    return pl.pallas_call(
        fused_forward_kernel,
        out_shape=jax.ShapeDtypeStruct((BATCH, OUT_DIM), jnp.float32),
        in_specs=[vmem() for _ in range(6)],
        out_specs=vmem(),
        cost_estimate=pl.CostEstimate(flops=5_300_000, transcendentals=4_500,
                                      bytes_accessed=440_000),
    )(x_bwn, stem, win, w2s, vecs, head)


# ----------------------------- parameter init (matches the PyTorch module layout) --------------
def init_params(key):
    cnt = [0]

    def nrm(shape, std):
        cnt[0] += 1
        k = jax.random.fold_in(key, cnt[0])
        return (std * jax.random.normal(k, shape)).astype(jnp.float32)

    cw = nrm((WINDOW, N_KERNELS), 1.0 / np.sqrt(WINDOW))
    cb = nrm((1, N_KERNELS), 0.02)
    iw = nrm((N_KERNELS, D_MODEL), 1.0 / np.sqrt(N_KERNELS))
    ib = nrm((1, D_MODEL), 0.02)

    layers = []
    for _ in range(N_LAYERS):
        wq = nrm((D_MODEL, N_HEAD * D_K), np.sqrt(2.0 / (D_MODEL + D_K)))
        bq = nrm((1, N_HEAD * D_K), 0.02)
        wk = nrm((D_MODEL, N_HEAD * D_K), np.sqrt(2.0 / (D_MODEL + D_K)))
        bk = nrm((1, N_HEAD * D_K), 0.02)
        wv = nrm((D_MODEL, N_HEAD * D_V), np.sqrt(2.0 / (D_MODEL + D_V)))
        bv = nrm((1, N_HEAD * D_V), 0.02)
        fcw = nrm((N_HEAD * D_V, D_MODEL), np.sqrt(2.0 / (N_HEAD * D_V + D_MODEL)))
        fcb = nrm((1, D_MODEL), 0.02)
        g1 = jnp.ones((1, D_MODEL), jnp.float32)
        be1 = jnp.zeros((1, D_MODEL), jnp.float32)
        w1 = nrm((D_MODEL, D_INNER), 1.0 / np.sqrt(D_MODEL))
        b1 = nrm((1, D_INNER), 0.02)
        w2 = nrm((D_INNER, D_MODEL), 1.0 / np.sqrt(D_INNER))
        b2 = nrm((1, D_MODEL), 0.02)
        g2 = jnp.ones((1, D_MODEL), jnp.float32)
        be2 = jnp.zeros((1, D_MODEL), jnp.float32)
        layers.append((wq, bq, wk, bk, wv, bv, fcw, fcb, g1, be1,
                       w1, b1, w2, b2, g2, be2))

    ow = nrm((D_MODEL * N_MULTIV, OUT_DIM), 1.0 / np.sqrt(D_MODEL * N_MULTIV))
    ob = nrm((1, OUT_DIM), 0.02)
    return {"stem": (cw, cb, iw, ib), "layers": layers, "head": (ow, ob)}


# ----------------------------- kernel packing (done once, outside the kernel) ------------------
def pack_for_kernel(params):
    assert D_K == D_V
    cw, cb, iw, ib = params["stem"]
    ow, ob = params["head"]
    temp = float(np.power(D_K, 0.5))

    # stem slab (48, 64): cw rows 0:8, iw rows 8:40, cb row 40, ib row 41, out bias row 42.
    stem = jnp.zeros((STEM_ROWS, D_MODEL), jnp.float32)
    stem = stem.at[0:WINDOW, 0:N_KERNELS].set(cw)
    stem = stem.at[WINDOW:WINDOW + N_KERNELS, :].set(iw)
    stem = stem.at[ROW_CB, 0:N_KERNELS].set(cb[0])
    stem = stem.at[ROW_IB, :].set(ib[0])
    stem = stem.at[ROW_OB, 0:OUT_DIM].set(ob[0])

    wins, w2s, vecs = [], [], []
    for lp in params["layers"]:
        wq, bq, wk, bk, wv, bv, fcw, fcb, g1, be1, w1, b1, w2, b2, g2, be2 = lp
        win = jnp.zeros((D_MODEL, WIN_COLS), jnp.float32)
        win = win.at[:, 0:D_MODEL].set(wq / temp)              # temperature folded into Q
        win = win.at[:, D_MODEL:2 * D_MODEL].set(wk)
        win = win.at[:, 2 * D_MODEL:QKV_COLS].set(wv)
        win = win.at[:, COL_W1:COL_W1 + D_INNER].set(w1)
        win = win.at[:, COL_FC:COL_FC + D_MODEL].set(fcw)
        wins.append(win)
        w2s.append(w2)

        vec = jnp.zeros((8, QKV_COLS), jnp.float32)
        vec = vec.at[0, 0:D_MODEL].set(bq[0] / temp)
        vec = vec.at[0, D_MODEL:2 * D_MODEL].set(bk[0])
        vec = vec.at[0, 2 * D_MODEL:QKV_COLS].set(bv[0])
        vec = vec.at[1, 0:D_MODEL].set(fcb[0])
        vec = vec.at[2, 0:D_MODEL].set(g1[0])
        vec = vec.at[3, 0:D_MODEL].set(be1[0])
        vec = vec.at[4, 0:D_INNER].set(b1[0])
        vec = vec.at[5, 0:D_MODEL].set(b2[0])
        vec = vec.at[6, 0:D_MODEL].set(g2[0])
        vec = vec.at[7, 0:D_MODEL].set(be2[0])
        vecs.append(vec)

    # head slab (226, 128): ow repacked as (D, N*OUT), block-diag mask, lane-fold, row-selector.
    ow2 = np.asarray(ow).reshape(N_MULTIV, D_MODEL, OUT_DIM).transpose(1, 0, 2)
    ow2 = ow2.reshape(D_MODEL, N_MULTIV * OUT_DIM)
    mask = np.zeros((BATCH * N_MULTIV, HEAD_COLS), np.float32)
    for r in range(BATCH * N_MULTIV):
        n = r % N_MULTIV
        mask[r, n * OUT_DIM:(n + 1) * OUT_DIM] = 1.0
    fold = np.zeros((HEAD_COLS, OUT_DIM), np.float32)
    for j in range(HEAD_COLS):
        fold[j, j % OUT_DIM] = 1.0
    sel = np.zeros((BATCH, BATCH * N_MULTIV), np.float32)
    for b in range(BATCH):
        sel[b, b * N_MULTIV:(b + 1) * N_MULTIV] = 1.0
    head = np.zeros((HEAD_ROWS, HEAD_COLS), np.float32)
    head[0:D_MODEL, :] = ow2
    head[HEAD_MASK0:HEAD_MASK0 + BATCH * N_MULTIV, :] = mask
    head[HEAD_FOLD0:HEAD_FOLD0 + HEAD_COLS, 0:OUT_DIM] = fold
    head[HEAD_SEL0:HEAD_SEL0 + BATCH, 0:BATCH * N_MULTIV] = sel

    return (stem, jnp.stack(wins), jnp.stack(w2s), jnp.stack(vecs),
            jnp.asarray(head))


# ----------------------------- pure-JAX reference for verification ----------------------------
def _ln_ref(x, g, b, eps=LN_EPS):
    mu = x.mean(-1, keepdims=True)
    var = ((x - mu) ** 2).mean(-1, keepdims=True)
    return (x - mu) / jnp.sqrt(var + eps) * g + b


def reference_forward(x_blnd, params):
    cw, cb, iw, ib = params["stem"]
    x2 = jnp.transpose(x_blnd[..., 0], (0, 2, 1))
    enc = jax.nn.relu(x2 @ cw + cb) @ iw + ib
    for lp in params["layers"]:
        wq, bq, wk, bk, wv, bv, fcw, fcb, g1, be1, w1, b1, w2, b2, g2, be2 = lp
        B, L, D = enc.shape
        q = (enc @ wq + bq).reshape(B, L, N_HEAD, D_K).transpose(0, 2, 1, 3)
        k = (enc @ wk + bk).reshape(B, L, N_HEAD, D_K).transpose(0, 2, 1, 3)
        v = (enc @ wv + bv).reshape(B, L, N_HEAD, D_V).transpose(0, 2, 1, 3)
        attn = jnp.einsum("bhqd,bhkd->bhqk", q, k) / np.power(D_K, 0.5)
        attn = jax.nn.softmax(attn, axis=-1)
        ctx = jnp.einsum("bhqk,bhkd->bhqd", attn, v).transpose(0, 2, 1, 3).reshape(B, L, -1)
        y = _ln_ref(ctx @ fcw + fcb + enc, g1, be1)
        z = jax.nn.relu(y @ w1 + b1) @ w2 + b2
        enc = _ln_ref(z + y, g2, be2)
    ow, ob = params["head"]
    return enc.reshape(enc.shape[0], -1) @ ow + ob


# ----------------------------- main -------------------------------------------------------------
if __name__ == "__main__":
    key = jax.random.PRNGKey(0)
    kx, kparam = jax.random.split(key)
    x = jax.random.normal(kx, (BATCH, WINDOW, N_MULTIV, IN_DIM), dtype=jnp.float32)

    params = init_params(kparam)
    packed = pack_for_kernel(params)

    out = jax.block_until_ready(timeseries_selfattn_forward(x, packed))
    ref = jax.block_until_ready(reference_forward(x, params))
    np.testing.assert_allclose(np.asarray(out), np.asarray(ref), rtol=2e-3, atol=2e-3)

    assert out.shape == (BATCH, OUT_DIM)
    print("KERNEL_OK")
</pallas_src>

<mosaic_0001>
module attributes {stable_mosaic.version = 11 : i64} {
  func.func @fused_forward_kernel(%arg0: memref<2x8x16xf32, #tpu.memory_space<vmem>>, %arg1: memref<48x64xf32, #tpu.memory_space<vmem>>, %arg2: memref<2x64x448xf32, #tpu.memory_space<vmem>>, %arg3: memref<2x128x64xf32, #tpu.memory_space<vmem>>, %arg4: memref<2x8x192xf32, #tpu.memory_space<vmem>>, %arg5: memref<226x128xf32, #tpu.memory_space<vmem>>, %arg6: memref<2x8xf32, #tpu.memory_space<vmem>>) attributes {dimension_semantics = [], scalar_prefetch = 0 : i64, scratch_operands = 0 : i64, tpu.core_type = #tpu.core_type<tc>} {
    %c0 = arith.constant 0 : index
    %c0_0 = arith.constant 0 : index
    %c0_1 = arith.constant 0 : index
    %0 = vector.load %arg0[%c0, %c0_0, %c0_1] : memref<2x8x16xf32, #tpu.memory_space<vmem>>, vector<1x8x16xf32>
    %1 = vector.shape_cast %0 : vector<1x8x16xf32> to vector<8x16xf32>
    %c1 = arith.constant 1 : index
    %c0_2 = arith.constant 0 : index
    %c0_3 = arith.constant 0 : index
    %2 = vector.load %arg0[%c1, %c0_2, %c0_3] : memref<2x8x16xf32, #tpu.memory_space<vmem>>, vector<1x8x16xf32>
    %3 = vector.shape_cast %2 : vector<1x8x16xf32> to vector<8x16xf32>
    %4 = tpu.concatenate %1, %3 in 1 : vector<8x16xf32>, vector<8x16xf32> -> vector<8x32xf32>
    %5 = tpu.transpose %4, [1, 0] : vector<8x32xf32> -> vector<32x8xf32>
    %c0_4 = arith.constant 0 : index
    %c0_5 = arith.constant 0 : index
    %6 = vector.load %arg1[%c0_4, %c0_5] : memref<48x64xf32, #tpu.memory_space<vmem>>, vector<8x32xf32>
    %c8 = arith.constant 8 : index
    %c0_6 = arith.constant 0 : index
    %7 = vector.load %arg1[%c8, %c0_6] : memref<48x64xf32, #tpu.memory_space<vmem>>, vector<32x64xf32>
    %c40 = arith.constant 40 : index
    %c0_7 = arith.constant 0 : index
    %8 = vector.load %arg1[%c40, %c0_7] : memref<48x64xf32, #tpu.memory_space<vmem>>, vector<1x32xf32>
    %c41 = arith.constant 41 : index
    %c0_8 = arith.constant 0 : index
    %9 = vector.load %arg1[%c41, %c0_8] : memref<48x64xf32, #tpu.memory_space<vmem>>, vector<1x64xf32>
    %c42 = arith.constant 42 : index
    %c0_9 = arith.constant 0 : index
    %10 = vector.load %arg1[%c42, %c0_9] : memref<48x64xf32, #tpu.memory_space<vmem>>, vector<1x8xf32>
    %cst = arith.constant dense<0.000000e+00> : vector<32x32xf32>
    %11 = tpu.matmul %5, %6, %cst {dimension_numbers = #tpu.dot_dimension_numbers<[1], [0], [0], [1], [0, 0, 1, 1], [], []>} : vector<32x8xf32>, vector<8x32xf32>, vector<32x32xf32> -> vector<32x32xf32>
    %12 = vector.broadcast %8 : vector<1x32xf32> to vector<32x32xf32>
    %13 = arith.addf %11, %12 : vector<32x32xf32>
    %cst_10 = arith.constant 0.000000e+00 : f32
    %14 = vector.broadcast %cst_10 : f32 to vector<32x32xf32>
    %15 = arith.maximumf %13, %14 : vector<32x32xf32>
    %cst_11 = arith.constant dense<0.000000e+00> : vector<32x64xf32>
    %16 = tpu.matmul %15, %7, %cst_11 {dimension_numbers = #tpu.dot_dimension_numbers<[1], [0], [0], [1], [0, 0, 1, 1], [], []>} : vector<32x32xf32>, vector<32x64xf32>, vector<32x64xf32> -> vector<32x64xf32>
    %17 = vector.broadcast %9 : vector<1x64xf32> to vector<32x64xf32>
    %18 = arith.addf %16, %17 : vector<32x64xf32>
    %c0_12 = arith.constant 0 : index
    %c0_13 = arith.constant 0 : index
    %c0_14 = arith.constant 0 : index
    %19 = vector.load %arg2[%c0_12, %c0_13, %c0_14] : memref<2x64x448xf32, #tpu.memory_space<vmem>>, vector<1x64x192xf32>
    %20 = vector.shape_cast %19 : vector<1x64x192xf32> to vector<64x192xf32>
    %c0_15 = arith.constant 0 : index
    %c0_16 = arith.constant 0 : index
    %c256 = arith.constant 256 : index
    %21 = vector.load %arg2[%c0_15, %c0_16, %c256] : memref<2x64x448xf32, #tpu.memory_space<vmem>>, vector<1x64x128xf32>
    %22 = vector.shape_cast %21 : vector<1x64x128xf32> to vector<64x128xf32>
    %c0_17 = arith.constant 0 : index
    %c0_18 = arith.constant 0 : index
    %c384 = arith.constant 384 : index
    %23 = vector.load %arg2[%c0_17, %c0_18, %c384] : memref<2x64x448xf32, #tpu.memory_space<vmem>>, vector<1x64x64xf32>
    %24 = vector.shape_cast %23 : vector<1x64x64xf32> to vector<64x64xf32>
    %c0_19 = arith.constant 0 : index
    %c0_20 = arith.constant 0 : index
    %c0_21 = arith.constant 0 : index
    %25 = vector.load %arg3[%c0_19, %c0_20, %c0_21] : memref<2x128x64xf32, #tpu.memory_space<vmem>>, vector<1x128x64xf32>
    %26 = vector.shape_cast %25 : vector<1x128x64xf32> to vector<128x64xf32>
    %c0_22 = arith.constant 0 : index
    %c0_23 = arith.constant 0 : index
    %c0_24 = arith.constant 0 : index
    %27 = vector.load %arg4[%c0_22, %c0_23, %c0_24] : memref<2x8x192xf32, #tpu.memory_space<vmem>>, vector<1x1x192xf32>
    %28 = vector.shape_cast %27 : vector<1x1x192xf32> to vector<1x192xf32>
    %c0_25 = arith.constant 0 : index
    %c1_26 = arith.constant 1 : index
    %c0_27 = arith.constant 0 : index
    %29 = vector.load %arg4[%c0_25, %c1_26, %c0_27] : memref<2x8x192xf32, #tpu.memory_space<vmem>>, vector<1x1x64xf32>
    %30 = vector.shape_cast %29 : vector<1x1x64xf32> to vector<1x64xf32>
    %c0_28 = arith.constant 0 : index
    %c2 = arith.constant 2 : index
    %c0_29 = arith.constant 0 : index
    %31 = vector.load %arg4[%c0_28, %c2, %c0_29] : memref<2x8x192xf32, #tpu.memory_space<vmem>>, vector<1x1x64xf32>
    %32 = vector.shape_cast %31 : vector<1x1x64xf32> to vector<1x64xf32>
    %c0_30 = arith.constant 0 : index
    %c3 = arith.constant 3 : index
    %c0_31 = arith.constant 0 : index
    %33 = vector.load %arg4[%c0_30, %c3, %c0_31] : memref<2x8x192xf32, #tpu.memory_space<vmem>>, vector<1x1x64xf32>
    %34 = vector.shape_cast %33 : vector<1x1x64xf32> to vector<1x64xf32>
    %c0_32 = arith.constant 0 : index
    %c4 = arith.constant 4 : index
    %c0_33 = arith.constant 0 : index
    %35 = vector.load %arg4[%c0_32, %c4, %c0_33] : memref<2x8x192xf32, #tpu.memory_space<vmem>>, vector<1x1x128xf32>
    %36 = vector.shape_cast %35 : vector<1x1x128xf32> to vector<1x128xf32>
    %c0_34 = arith.constant 0 : index
    %c5 = arith.constant 5 : index
    %c0_35 = arith.constant 0 : index
    %37 = vector.load %arg4[%c0_34, %c5, %c0_35] : memref<2x8x192xf32, #tpu.memory_space<vmem>>, vector<1x1x64xf32>
    %38 = vector.shape_cast %37 : vector<1x1x64xf32> to vector<1x64xf32>
    %c0_36 = arith.constant 0 : index
    %c6 = arith.constant 6 : index
    %c0_37 = arith.constant 0 : index
    %39 = vector.load %arg4[%c0_36, %c6, %c0_37] : memref<2x8x192xf32, #tpu.memory_space<vmem>>, vector<1x1x64xf32>
    %40 = vector.shape_cast %39 : vector<1x1x64xf32> to vector<1x64xf32>
    %c0_38 = arith.constant 0 : index
    %c7 = arith.constant 7 : index
    %c0_39 = arith.constant 0 : index
    %41 = vector.load %arg4[%c0_38, %c7, %c0_39] : memref<2x8x192xf32, #tpu.memory_space<vmem>>, vector<1x1x64xf32>
    %42 = vector.shape_cast %41 : vector<1x1x64xf32> to vector<1x64xf32>
    %cst_40 = arith.constant dense<0.000000e+00> : vector<32x192xf32>
    %43 = tpu.matmul %18, %20, %cst_40 {dimension_numbers = #tpu.dot_dimension_numbers<[1], [0], [0], [1], [0, 0, 1, 1], [], []>} : vector<32x64xf32>, vector<64x192xf32>, vector<32x192xf32> -> vector<32x192xf32>
    %44 = vector.broadcast %28 : vector<1x192xf32> to vector<32x192xf32>
    %45 = arith.addf %43, %44 : vector<32x192xf32>
    %46 = vector.extract_strided_slice %45 {offsets = [0, 0], sizes = [16, 192], strides = [1, 1]} : vector<32x192xf32> to vector<16x192xf32>
    %47 = vector.extract_strided_slice %46 {offsets = [0, 0], sizes = [16, 16], strides = [1, 1]} : vector<16x192xf32> to vector<16x16xf32>
    %48 = vector.extract_strided_slice %46 {offsets = [0, 16], sizes = [16, 16], strides = [1, 1]} : vector<16x192xf32> to vector<16x16xf32>
    %49 = vector.extract_strided_slice %46 {offsets = [0, 32], sizes = [16, 16], strides = [1, 1]} : vector<16x192xf32> to vector<16x16xf32>
    %50 = vector.extract_strided_slice %46 {offsets = [0, 48], sizes = [16, 16], strides = [1, 1]} : vector<16x192xf32> to vector<16x16xf32>
    %51 = vector.extract_strided_slice %45 {offsets = [16, 0], sizes = [16, 192], strides = [1, 1]} : vector<32x192xf32> to vector<16x192xf32>
    %52 = vector.extract_strided_slice %51 {offsets = [0, 0], sizes = [16, 16], strides = [1, 1]} : vector<16x192xf32> to vector<16x16xf32>
    %53 = vector.extract_strided_slice %51 {offsets = [0, 16], sizes = [16, 16], strides = [1, 1]} : vector<16x192xf32> to vector<16x16xf32>
    %54 = vector.extract_strided_slice %51 {offsets = [0, 32], sizes = [16, 16], strides = [1, 1]} : vector<16x192xf32> to vector<16x16xf32>
    %55 = vector.extract_strided_slice %51 {offsets = [0, 48], sizes = [16, 16], strides = [1, 1]} : vector<16x192xf32> to vector<16x16xf32>
    %56 = vector.shape_cast %47 : vector<16x16xf32> to vector<1x16x16xf32>
    %57 = vector.shape_cast %48 : vector<16x16xf32> to vector<1x16x16xf32>
    %58 = vector.shape_cast %49 : vector<16x16xf32> to vector<1x16x16xf32>
    %59 = vector.shape_cast %50 : vector<16x16xf32> to vector<1x16x16xf32>
    %60 = vector.shape_cast %52 : vector<16x16xf32> to vector<1x16x16xf32>
    %61 = vector.shape_cast %53 : vector<16x16xf32> to vector<1x16x16xf32>
    %62 = vector.shape_cast %54 : vector<16x16xf32> to vector<1x16x16xf32>
    %63 = vector.shape_cast %55 : vector<16x16xf32> to vector<1x16x16xf32>
    %64 = tpu.concatenate %56, %57, %58, %59, %60, %61, %62, %63 in 0 : vector<1x16x16xf32>, vector<1x16x16xf32>, vector<1x16x16xf32>, vector<1x16x16xf32>, vector<1x16x16xf32>, vector<1x16x16xf32>, vector<1x16x16xf32>, vector<1x16x16xf32> -> vector<8x16x16xf32>
    %65 = vector.extract_strided_slice %45 {offsets = [0, 0], sizes = [16, 192], strides = [1, 1]} : vector<32x192xf32> to vector<16x192xf32>
    %66 = vector.extract_strided_slice %65 {offsets = [0, 64], sizes = [16, 16], strides = [1, 1]} : vector<16x192xf32> to vector<16x16xf32>
    %67 = vector.extract_strided_slice %65 {offsets = [0, 80], sizes = [16, 16], strides = [1, 1]} : vector<16x192xf32> to vector<16x16xf32>
    %68 = vector.extract_strided_slice %65 {offsets = [0, 96], sizes = [16, 16], strides = [1, 1]} : vector<16x192xf32> to vector<16x16xf32>
    %69 = vector.extract_strided_slice %65 {offsets = [0, 112], sizes = [16, 16], strides = [1, 1]} : vector<16x192xf32> to vector<16x16xf32>
    %70 = vector.extract_strided_slice %45 {offsets = [16, 0], sizes = [16, 192], strides = [1, 1]} : vector<32x192xf32> to vector<16x192xf32>
    %71 = vector.extract_strided_slice %70 {offsets = [0, 64], sizes = [16, 16], strides = [1, 1]} : vector<16x192xf32> to vector<16x16xf32>
    %72 = vector.extract_strided_slice %70 {offsets = [0, 80], sizes = [16, 16], strides = [1, 1]} : vector<16x192xf32> to vector<16x16xf32>
    %73 = vector.extract_strided_slice %70 {offsets = [0, 96], sizes = [16, 16], strides = [1, 1]} : vector<16x192xf32> to vector<16x16xf32>
    %74 = vector.extract_strided_slice %70 {offsets = [0, 112], sizes = [16, 16], strides = [1, 1]} : vector<16x192xf32> to vector<16x16xf32>
    %75 = vector.shape_cast %66 : vector<16x16xf32> to vector<1x16x16xf32>
    %76 = vector.shape_cast %67 : vector<16x16xf32> to vector<1x16x16xf32>
    %77 = vector.shape_cast %68 : vector<16x16xf32> to vector<1x16x16xf32>
    %78 = vector.shape_cast %69 : vector<16x16xf32> to vector<1x16x16xf32>
    %79 = vector.shape_cast %71 : vector<16x16xf32> to vector<1x16x16xf32>
    %80 = vector.shape_cast %72 : vector<16x16xf32> to vector<1x16x16xf32>
    %81 = vector.shape_cast %73 : vector<16x16xf32> to vector<1x16x16xf32>
    %82 = vector.shape_cast %74 : vector<16x16xf32> to vector<1x16x16xf32>
    %83 = tpu.concatenate %75, %76, %77, %78, %79, %80, %81, %82 in 0 : vector<1x16x16xf32>, vector<1x16x16xf32>, vector<1x16x16xf32>, vector<1x16x16xf32>, vector<1x16x16xf32>, vector<1x16x16xf32>, vector<1x16x16xf32>, vector<1x16x16xf32> -> vector<8x16x16xf32>
    %84 = vector.extract_strided_slice %45 {offsets = [0, 0], sizes = [16, 192], strides = [1, 1]} : vector<32x192xf32> to vector<16x192xf32>
    %85 = vector.extract_strided_slice %84 {offsets = [0, 128], sizes = [16, 16], strides = [1, 1]} : vector<16x192xf32> to vector<16x16xf32>
    %86 = vector.extract_strided_slice %84 {offsets = [0, 144], sizes = [16, 16], strides = [1, 1]} : vector<16x192xf32> to vector<16x16xf32>
    %87 = vector.extract_strided_slice %84 {offsets = [0, 160], sizes = [16, 16], strides = [1, 1]} : vector<16x192xf32> to vector<16x16xf32>
    %88 = vector.extract_strided_slice %84 {offsets = [0, 176], sizes = [16, 16], strides = [1, 1]} : vector<16x192xf32> to vector<16x16xf32>
    %89 = vector.extract_strided_slice %45 {offsets = [16, 0], sizes = [16, 192], strides = [1, 1]} : vector<32x192xf32> to vector<16x192xf32>
    %90 = vector.extract_strided_slice %89 {offsets = [0, 128], sizes = [16, 16], strides = [1, 1]} : vector<16x192xf32> to vector<16x16xf32>
    %91 = vector.extract_strided_slice %89 {offsets = [0, 144], sizes = [16, 16], strides = [1, 1]} : vector<16x192xf32> to vector<16x16xf32>
    %92 = vector.extract_strided_slice %89 {offsets = [0, 160], sizes = [16, 16], strides = [1, 1]} : vector<16x192xf32> to vector<16x16xf32>
    %93 = vector.extract_strided_slice %89 {offsets = [0, 176], sizes = [16, 16], strides = [1, 1]} : vector<16x192xf32> to vector<16x16xf32>
    %94 = vector.shape_cast %85 : vector<16x16xf32> to vector<1x16x16xf32>
    %95 = vector.shape_cast %86 : vector<16x16xf32> to vector<1x16x16xf32>
    %96 = vector.shape_cast %87 : vector<16x16xf32> to vector<1x16x16xf32>
    %97 = vector.shape_cast %88 : vector<16x16xf32> to vector<1x16x16xf32>
    %98 = vector.shape_cast %90 : vector<16x16xf32> to vector<1x16x16xf32>
    %99 = vector.shape_cast %91 : vector<16x16xf32> to vector<1x16x16xf32>
    %100 = vector.shape_cast %92 : vector<16x16xf32> to vector<1x16x16xf32>
    %101 = vector.shape_cast %93 : vector<16x16xf32> to vector<1x16x16xf32>
    %102 = tpu.concatenate %94, %95, %96, %97, %98, %99, %100, %101 in 0 : vector<1x16x16xf32>, vector<1x16x16xf32>, vector<1x16x16xf32>, vector<1x16x16xf32>, vector<1x16x16xf32>, vector<1x16x16xf32>, vector<1x16x16xf32>, vector<1x16x16xf32> -> vector<8x16x16xf32>
    "tpu.trace_start"() <{level = 10 : i32, message = "gic,gjc->gij"}> : () -> ()
    %cst_41 = arith.constant dense<0.000000e+00> : vector<8x16x16xf32>
    %103 = tpu.matmul %64, %83, %cst_41 {dimension_numbers = #tpu.dot_dimension_numbers<[2], [2], [1], [1], [0, 0, 0, 1, 1, 1], [0], [0]>} : vector<8x16x16xf32>, vector<8x16x16xf32>, vector<8x16x16xf32> -> vector<8x16x16xf32>
    "tpu.trace_stop"() : () -> ()
    %cst_42 = arith.constant dense<0xFF800000> : vector<8x16xf32>
    %104 = vector.multi_reduction <maximumf>, %103, %cst_42 [2] : vector<8x16x16xf32> to vector<8x16xf32>
    %105 = vector.shape_cast %104 : vector<8x16xf32> to vector<8x16x1xf32>
    %106 = vector.broadcast %105 : vector<8x16x1xf32> to vector<8x16x16xf32>
    %107 = arith.subf %103, %106 : vector<8x16x16xf32>
    %108 = math.exp %107 : vector<8x16x16xf32>
    %cst_43 = arith.constant dense<0.000000e+00> : vector<8x16xf32>
    %109 = vector.multi_reduction <add>, %108, %cst_43 [2] : vector<8x16x16xf32> to vector<8x16xf32>
    %110 = vector.shape_cast %109 : vector<8x16xf32> to vector<8x16x1xf32>
    %111 = tpu.reciprocal %110 {approx = true} : vector<8x16x1xf32> -> vector<8x16x1xf32>
    %112 = arith.mulf %110, %111 : vector<8x16x1xf32>
    %cst_44 = arith.constant 2.000000e+00 : f32
    %113 = vector.broadcast %cst_44 : f32 to vector<8x16x1xf32>
    %114 = arith.subf %113, %112 : vector<8x16x1xf32>
    %115 = arith.mulf %111, %114 : vector<8x16x1xf32>
    %116 = vector.broadcast %115 : vector<8x16x1xf32> to vector<8x16x16xf32>
    %117 = arith.mulf %108, %116 : vector<8x16x16xf32>
    "tpu.trace_start"() <{level = 10 : i32, message = "gij,gjc->gic"}> : () -> ()
    %cst_45 = arith.constant dense<0.000000e+00> : vector<8x16x16xf32>
    %118 = tpu.matmul %117, %102, %cst_45 {dimension_numbers = #tpu.dot_dimension_numbers<[2], [1], [1], [2], [0, 0, 0, 1, 1, 2], [0], [0]>} : vector<8x16x16xf32>, vector<8x16x16xf32>, vector<8x16x16xf32> -> vector<8x16x16xf32>
    "tpu.trace_stop"() : () -> ()
    %119 = vector.extract_strided_slice %118 {offsets = [0, 0, 0], sizes = [1, 16, 16], strides = [1, 1, 1]} : vector<8x16x16xf32> to vector<1x16x16xf32>
    %120 = vector.shape_cast %119 : vector<1x16x16xf32> to vector<16x16xf32>
    %121 = vector.extract_strided_slice %118 {offsets = [1, 0, 0], sizes = [1, 16, 16], strides = [1, 1, 1]} : vector<8x16x16xf32> to vector<1x16x16xf32>
    %122 = vector.shape_cast %121 : vector<1x16x16xf32> to vector<16x16xf32>
    %123 = vector.extract_strided_slice %118 {offsets = [2, 0, 0], sizes = [1, 16, 16], strides = [1, 1, 1]} : vector<8x16x16xf32> to vector<1x16x16xf32>
    %124 = vector.shape_cast %123 : vector<1x16x16xf32> to vector<16x16xf32>
    %125 = vector.extract_strided_slice %118 {offsets = [3, 0, 0], sizes = [1, 16, 16], strides = [1, 1, 1]} : vector<8x16x16xf32> to vector<1x16x16xf32>
    %126 = vector.shape_cast %125 : vector<1x16x16xf32> to vector<16x16xf32>
    %127 = tpu.concatenate %120, %122, %124, %126 in 1 : vector<16x16xf32>, vector<16x16xf32>, vector<16x16xf32>, vector<16x16xf32> -> vector<16x64xf32>
    %128 = vector.extract_strided_slice %118 {offsets = [4, 0, 0], sizes = [1, 16, 16], strides = [1, 1, 1]} : vector<8x16x16xf32> to vector<1x16x16xf32>
    %129 = vector.shape_cast %128 : vector<1x16x16xf32> to vector<16x16xf32>
    %130 = vector.extract_strided_slice %118 {offsets = [5, 0, 0], sizes = [1, 16, 16], strides = [1, 1, 1]} : vector<8x16x16xf32> to vector<1x16x16xf32>
    %131 = vector.shape_cast %130 : vector<1x16x16xf32> to vector<16x16xf32>
    %132 = vector.extract_strided_slice %118 {offsets = [6, 0, 0], sizes = [1, 16, 16], strides = [1, 1, 1]} : vector<8x16x16xf32> to vector<1x16x16xf32>
    %133 = vector.shape_cast %132 : vector<1x16x16xf32> to vector<16x16xf32>
    %134 = vector.extract_strided_slice %118 {offsets = [7, 0, 0], sizes = [1, 16, 16], strides = [1, 1, 1]} : vector<8x16x16xf32> to vector<1x16x16xf32>
    %135 = vector.shape_cast %134 : vector<1x16x16xf32> to vector<16x16xf32>
    %136 = tpu.concatenate %129, %131, %133, %135 in 1 : vector<16x16xf32>, vector<16x16xf32>, vector<16x16xf32>, vector<16x16xf32> -> vector<16x64xf32>
    %137 = tpu.concatenate %127, %136 in 0 : vector<16x64xf32>, vector<16x64xf32> -> vector<32x64xf32>
    %cst_46 = arith.constant dense<0.000000e+00> : vector<32x64xf32>
    %138 = tpu.matmul %137, %24, %cst_46 {dimension_numbers = #tpu.dot_dimension_numbers<[1], [0], [0], [1], [0, 0, 1, 1], [], []>} : vector<32x64xf32>, vector<64x64xf32>, vector<32x64xf32> -> vector<32x64xf32>
    %139 = vector.broadcast %30 : vector<1x64xf32> to vector<32x64xf32>
    %140 = arith.addf %138, %139 : vector<32x64xf32>
    %141 = arith.addf %140, %18 : vector<32x64xf32>
    %cst_47 = arith.constant dense<0.000000e+00> : vector<32xf32>
    %142 = vector.multi_reduction <add>, %141, %cst_47 [1] : vector<32x64xf32> to vector<32xf32>
    %143 = vector.shape_cast %142 : vector<32xf32> to vector<32x1xf32>
    %cst_48 = arith.constant 6.400000e+01 : f32
    %144 = vector.broadcast %cst_48 : f32 to vector<32x1xf32>
    %145 = arith.divf %143, %144 : vector<32x1xf32>
    %146 = vector.broadcast %145 : vector<32x1xf32> to vector<32x64xf32>
    %147 = arith.subf %141, %146 : vector<32x64xf32>
    %148 = arith.mulf %147, %147 : vector<32x64xf32>
    %cst_49 = arith.constant dense<0.000000e+00> : vector<32xf32>
    %149 = vector.multi_reduction <add>, %148, %cst_49 [1] : vector<32x64xf32> to vector<32xf32>
    %150 = vector.shape_cast %149 : vector<32xf32> to vector<32x1xf32>
    %cst_50 = arith.constant 6.400000e+01 : f32
    %151 = vector.broadcast %cst_50 : f32 to vector<32x1xf32>
    %152 = arith.divf %150, %151 : vector<32x1xf32>
    %cst_51 = arith.constant 9.99999974E-6 : f32
    %153 = vector.broadcast %cst_51 : f32 to vector<32x1xf32>
    %154 = arith.addf %152, %153 : vector<32x1xf32>
    %155 = math.rsqrt %154 : vector<32x1xf32>
    %156 = vector.broadcast %155 : vector<32x1xf32> to vector<32x64xf32>
    %157 = arith.mulf %147, %156 : vector<32x64xf32>
    %158 = vector.broadcast %32 : vector<1x64xf32> to vector<32x64xf32>
    %159 = arith.mulf %157, %158 : vector<32x64xf32>
    %160 = vector.broadcast %34 : vector<1x64xf32> to vector<32x64xf32>
    %161 = arith.addf %159, %160 : vector<32x64xf32>
    %cst_52 = arith.constant dense<0.000000e+00> : vector<32x128xf32>
    %162 = tpu.matmul %161, %22, %cst_52 {dimension_numbers = #tpu.dot_dimension_numbers<[1], [0], [0], [1], [0, 0, 1, 1], [], []>} : vector<32x64xf32>, vector<64x128xf32>, vector<32x128xf32> -> vector<32x128xf32>
    %163 = vector.broadcast %36 : vector<1x128xf32> to vector<32x128xf32>
    %164 = arith.addf %162, %163 : vector<32x128xf32>
    %cst_53 = arith.constant 0.000000e+00 : f32
    %165 = vector.broadcast %cst_53 : f32 to vector<32x128xf32>
    %166 = arith.maximumf %164, %165 : vector<32x128xf32>
    %cst_54 = arith.constant dense<0.000000e+00> : vector<32x64xf32>
    %167 = tpu.matmul %166, %26, %cst_54 {dimension_numbers = #tpu.dot_dimension_numbers<[1], [0], [0], [1], [0, 0, 1, 1], [], []>} : vector<32x128xf32>, vector<128x64xf32>, vector<32x64xf32> -> vector<32x64xf32>
    %168 = vector.broadcast %38 : vector<1x64xf32> to vector<32x64xf32>
    %169 = arith.addf %167, %168 : vector<32x64xf32>
    %170 = arith.addf %169, %161 : vector<32x64xf32>
    %cst_55 = arith.constant dense<0.000000e+00> : vector<32xf32>
    %171 = vector.multi_reduction <add>, %170, %cst_55 [1] : vector<32x64xf32> to vector<32xf32>
    %172 = vector.shape_cast %171 : vector<32xf32> to vector<32x1xf32>
    %cst_56 = arith.constant 6.400000e+01 : f32
    %173 = vector.broadcast %cst_56 : f32 to vector<32x1xf32>
    %174 = arith.divf %172, %173 : vector<32x1xf32>
    %175 = vector.broadcast %174 : vector<32x1xf32> to vector<32x64xf32>
    %176 = arith.subf %170, %175 : vector<32x64xf32>
    %177 = arith.mulf %176, %176 : vector<32x64xf32>
    %cst_57 = arith.constant dense<0.000000e+00> : vector<32xf32>
    %178 = vector.multi_reduction <add>, %177, %cst_57 [1] : vector<32x64xf32> to vector<32xf32>
    %179 = vector.shape_cast %178 : vector<32xf32> to vector<32x1xf32>
    %cst_58 = arith.constant 6.400000e+01 : f32
    %180 = vector.broadcast %cst_58 : f32 to vector<32x1xf32>
    %181 = arith.divf %179, %180 : vector<32x1xf32>
    %cst_59 = arith.constant 9.99999974E-6 : f32
    %182 = vector.broadcast %cst_59 : f32 to vector<32x1xf32>
    %183 = arith.addf %181, %182 : vector<32x1xf32>
    %184 = math.rsqrt %183 : vector<32x1xf32>
    %185 = vector.broadcast %184 : vector<32x1xf32> to vector<32x64xf32>
    %186 = arith.mulf %176, %185 : vector<32x64xf32>
    %187 = vector.broadcast %40 : vector<1x64xf32> to vector<32x64xf32>
    %188 = arith.mulf %186, %187 : vector<32x64xf32>
    %189 = vector.broadcast %42 : vector<1x64xf32> to vector<32x64xf32>
    %190 = arith.addf %188, %189 : vector<32x64xf32>
    %c1_60 = arith.constant 1 : index
    %c0_61 = arith.constant 0 : index
    %c0_62 = arith.constant 0 : index
    %191 = vector.load %arg2[%c1_60, %c0_61, %c0_62] : memref<2x64x448xf32, #tpu.memory_space<vmem>>, vector<1x64x192xf32>
    %192 = vector.shape_cast %191 : vector<1x64x192xf32> to vector<64x192xf32>
    %c1_63 = arith.constant 1 : index
    %c0_64 = arith.constant 0 : index
    %c256_65 = arith.constant 256 : index
    %193 = vector.load %arg2[%c1_63, %c0_64, %c256_65] : memref<2x64x448xf32, #tpu.memory_space<vmem>>, vector<1x64x128xf32>
    %194 = vector.shape_cast %193 : vector<1x64x128xf32> to vector<64x128xf32>
    %c1_66 = arith.constant 1 : index
    %c0_67 = arith.constant 0 : index
    %c384_68 = arith.constant 384 : index
    %195 = vector.load %arg2[%c1_66, %c0_67, %c384_68] : memref<2x64x448xf32, #tpu.memory_space<vmem>>, vector<1x64x64xf32>
    %196 = vector.shape_cast %195 : vector<1x64x64xf32> to vector<64x64xf32>
    %c1_69 = arith.constant 1 : index
    %c0_70 = arith.constant 0 : index
    %c0_71 = arith.constant 0 : index
    %197 = vector.load %arg3[%c1_69, %c0_70, %c0_71] : memref<2x128x64xf32, #tpu.memory_space<vmem>>, vector<1x128x64xf32>
    %198 = vector.shape_cast %197 : vector<1x128x64xf32> to vector<128x64xf32>
    %c1_72 = arith.constant 1 : index
    %c0_73 = arith.constant 0 : index
    %c0_74 = arith.constant 0 : index
    %199 = vector.load %arg4[%c1_72, %c0_73, %c0_74] : memref<2x8x192xf32, #tpu.memory_space<vmem>>, vector<1x1x192xf32>
    %200 = vector.shape_cast %199 : vector<1x1x192xf32> to vector<1x192xf32>
    %c1_75 = arith.constant 1 : index
    %c1_76 = arith.constant 1 : index
    %c0_77 = arith.constant 0 : index
    %201 = vector.load %arg4[%c1_75, %c1_76, %c0_77] : memref<2x8x192xf32, #tpu.memory_space<vmem>>, vector<1x1x64xf32>
    %202 = vector.shape_cast %201 : vector<1x1x64xf32> to vector<1x64xf32>
    %c1_78 = arith.constant 1 : index
    %c2_79 = arith.constant 2 : index
    %c0_80 = arith.constant 0 : index
    %203 = vector.load %arg4[%c1_78, %c2_79, %c0_80] : memref<2x8x192xf32, #tpu.memory_space<vmem>>, vector<1x1x64xf32>
    %204 = vector.shape_cast %203 : vector<1x1x64xf32> to vector<1x64xf32>
    %c1_81 = arith.constant 1 : index
    %c3_82 = arith.constant 3 : index
    %c0_83 = arith.constant 0 : index
    %205 = vector.load %arg4[%c1_81, %c3_82, %c0_83] : memref<2x8x192xf32, #tpu.memory_space<vmem>>, vector<1x1x64xf32>
    %206 = vector.shape_cast %205 : vector<1x1x64xf32> to vector<1x64xf32>
    %c1_84 = arith.constant 1 : index
    %c4_85 = arith.constant 4 : index
    %c0_86 = arith.constant 0 : index
    %207 = vector.load %arg4[%c1_84, %c4_85, %c0_86] : memref<2x8x192xf32, #tpu.memory_space<vmem>>, vector<1x1x128xf32>
    %208 = vector.shape_cast %207 : vector<1x1x128xf32> to vector<1x128xf32>
    %c1_87 = arith.constant 1 : index
    %c5_88 = arith.constant 5 : index
    %c0_89 = arith.constant 0 : index
    %209 = vector.load %arg4[%c1_87, %c5_88, %c0_89] : memref<2x8x192xf32, #tpu.memory_space<vmem>>, vector<1x1x64xf32>
    %210 = vector.shape_cast %209 : vector<1x1x64xf32> to vector<1x64xf32>
    %c1_90 = arith.constant 1 : index
    %c6_91 = arith.constant 6 : index
    %c0_92 = arith.constant 0 : index
    %211 = vector.load %arg4[%c1_90, %c6_91, %c0_92] : memref<2x8x192xf32, #tpu.memory_space<vmem>>, vector<1x1x64xf32>
    %212 = vector.shape_cast %211 : vector<1x1x64xf32> to vector<1x64xf32>
    %c1_93 = arith.constant 1 : index
    %c7_94 = arith.constant 7 : index
    %c0_95 = arith.constant 0 : index
    %213 = vector.load %arg4[%c1_93, %c7_94, %c0_95] : memref<2x8x192xf32, #tpu.memory_space<vmem>>, vector<1x1x64xf32>
    %214 = vector.shape_cast %213 : vector<1x1x64xf32> to vector<1x64xf32>
    %cst_96 = arith.constant dense<0.000000e+00> : vector<32x192xf32>
    %215 = tpu.matmul %190, %192, %cst_96 {dimension_numbers = #tpu.dot_dimension_numbers<[1], [0], [0], [1], [0, 0, 1, 1], [], []>} : vector<32x64xf32>, vector<64x192xf32>, vector<32x192xf32> -> vector<32x192xf32>
    %216 = vector.broadcast %200 : vector<1x192xf32> to vector<32x192xf32>
    %217 = arith.addf %215, %216 : vector<32x192xf32>
    %218 = vector.extract_strided_slice %217 {offsets = [0, 0], sizes = [16, 192], strides = [1, 1]} : vector<32x192xf32> to vector<16x192xf32>
    %219 = vector.extract_strided_slice %218 {offsets = [0, 0], sizes = [16, 16], strides = [1, 1]} : vector<16x192xf32> to vector<16x16xf32>
    %220 = vector.extract_strided_slice %218 {offsets = [0, 16], sizes = [16, 16], strides = [1, 1]} : vector<16x192xf32> to vector<16x16xf32>
    %221 = vector.extract_strided_slice %218 {offsets = [0, 32], sizes = [16, 16], strides = [1, 1]} : vector<16x192xf32> to vector<16x16xf32>
    %222 = vector.extract_strided_slice %218 {offsets = [0, 48], sizes = [16, 16], strides = [1, 1]} : vector<16x192xf32> to vector<16x16xf32>
    %223 = vector.extract_strided_slice %217 {offsets = [16, 0], sizes = [16, 192], strides = [1, 1]} : vector<32x192xf32> to vector<16x192xf32>
    %224 = vector.extract_strided_slice %223 {offsets = [0, 0], sizes = [16, 16], strides = [1, 1]} : vector<16x192xf32> to vector<16x16xf32>
    %225 = vector.extract_strided_slice %223 {offsets = [0, 16], sizes = [16, 16], strides = [1, 1]} : vector<16x192xf32> to vector<16x16xf32>
    %226 = vector.extract_strided_slice %223 {offsets = [0, 32], sizes = [16, 16], strides = [1, 1]} : vector<16x192xf32> to vector<16x16xf32>
    %227 = vector.extract_strided_slice %223 {offsets = [0, 48], sizes = [16, 16], strides = [1, 1]} : vector<16x192xf32> to vector<16x16xf32>
    %228 = vector.shape_cast %219 : vector<16x16xf32> to vector<1x16x16xf32>
    %229 = vector.shape_cast %220 : vector<16x16xf32> to vector<1x16x16xf32>
    %230 = vector.shape_cast %221 : vector<16x16xf32> to vector<1x16x16xf32>
    %231 = vector.shape_cast %222 : vector<16x16xf32> to vector<1x16x16xf32>
    %232 = vector.shape_cast %224 : vector<16x16xf32> to vector<1x16x16xf32>
    %233 = vector.shape_cast %225 : vector<16x16xf32> to vector<1x16x16xf32>
    %234 = vector.shape_cast %226 : vector<16x16xf32> to vector<1x16x16xf32>
    %235 = vector.shape_cast %227 : vector<16x16xf32> to vector<1x16x16xf32>
    %236 = tpu.concatenate %228, %229, %230, %231, %232, %233, %234, %235 in 0 : vector<1x16x16xf32>, vector<1x16x16xf32>, vector<1x16x16xf32>, vector<1x16x16xf32>, vector<1x16x16xf32>, vector<1x16x16xf32>, vector<1x16x16xf32>, vector<1x16x16xf32> -> vector<8x16x16xf32>
    %237 = vector.extract_strided_slice %217 {offsets = [0, 0], sizes = [16, 192], strides = [1, 1]} : vector<32x192xf32> to vector<16x192xf32>
    %238 = vector.extract_strided_slice %237 {offsets = [0, 64], sizes = [16, 16], strides = [1, 1]} : vector<16x192xf32> to vector<16x16xf32>
    %239 = vector.extract_strided_slice %237 {offsets = [0, 80], sizes = [16, 16], strides = [1, 1]} : vector<16x192xf32> to vector<16x16xf32>
    %240 = vector.extract_strided_slice %237 {offsets = [0, 96], sizes = [16, 16], strides = [1, 1]} : vector<16x192xf32> to vector<16x16xf32>
    %241 = vector.extract_strided_slice %237 {offsets = [0, 112], sizes = [16, 16], strides = [1, 1]} : vector<16x192xf32> to vector<16x16xf32>
    %242 = vector.extract_strided_slice %217 {offsets = [16, 0], sizes = [16, 192], strides = [1, 1]} : vector<32x192xf32> to vector<16x192xf32>
    %243 = vector.extract_strided_slice %242 {offsets = [0, 64], sizes = [16, 16], strides = [1, 1]} : vector<16x192xf32> to vector<16x16xf32>
    %244 = vector.extract_strided_slice %242 {offsets = [0, 80], sizes = [16, 16], strides = [1, 1]} : vector<16x192xf32> to vector<16x16xf32>
    %245 = vector.extract_strided_slice %242 {offsets = [0, 96], sizes = [16, 16], strides = [1, 1]} : vector<16x192xf32> to vector<16x16xf32>
    %246 = vector.extract_strided_slice %242 {offsets = [0, 112], sizes = [16, 16], strides = [1, 1]} : vector<16x192xf32> to vector<16x16xf32>
    %247 = vector.shape_cast %238 : vector<16x16xf32> to vector<1x16x16xf32>
    %248 = vector.shape_cast %239 : vector<16x16xf32> to vector<1x16x16xf32>
    %249 = vector.shape_cast %240 : vector<16x16xf32> to vector<1x16x16xf32>
    %250 = vector.shape_cast %241 : vector<16x16xf32> to vector<1x16x16xf32>
    %251 = vector.shape_cast %243 : vector<16x16xf32> to vector<1x16x16xf32>
    %252 = vector.shape_cast %244 : vector<16x16xf32> to vector<1x16x16xf32>
    %253 = vector.shape_cast %245 : vector<16x16xf32> to vector<1x16x16xf32>
    %254 = vector.shape_cast %246 : vector<16x16xf32> to vector<1x16x16xf32>
    %255 = tpu.concatenate %247, %248, %249, %250, %251, %252, %253, %254 in 0 : vector<1x16x16xf32>, vector<1x16x16xf32>, vector<1x16x16xf32>, vector<1x16x16xf32>, vector<1x16x16xf32>, vector<1x16x16xf32>, vector<1x16x16xf32>, vector<1x16x16xf32> -> vector<8x16x16xf32>
    %256 = vector.extract_strided_slice %217 {offsets = [0, 0], sizes = [16, 192], strides = [1, 1]} : vector<32x192xf32> to vector<16x192xf32>
    %257 = vector.extract_strided_slice %256 {offsets = [0, 128], sizes = [16, 16], strides = [1, 1]} : vector<16x192xf32> to vector<16x16xf32>
    %258 = vector.extract_strided_slice %256 {offsets = [0, 144], sizes = [16, 16], strides = [1, 1]} : vector<16x192xf32> to vector<16x16xf32>
    %259 = vector.extract_strided_slice %256 {offsets = [0, 160], sizes = [16, 16], strides = [1, 1]} : vector<16x192xf32> to vector<16x16xf32>
    %260 = vector.extract_strided_slice %256 {offsets = [0, 176], sizes = [16, 16], strides = [1, 1]} : vector<16x192xf32> to vector<16x16xf32>
    %261 = vector.extract_strided_slice %217 {offsets = [16, 0], sizes = [16, 192], strides = [1, 1]} : vector<32x192xf32> to vector<16x192xf32>
    %262 = vector.extract_strided_slice %261 {offsets = [0, 128], sizes = [16, 16], strides = [1, 1]} : vector<16x192xf32> to vector<16x16xf32>
    %263 = vector.extract_strided_slice %261 {offsets = [0, 144], sizes = [16, 16], strides = [1, 1]} : vector<16x192xf32> to vector<16x16xf32>
    %264 = vector.extract_strided_slice %261 {offsets = [0, 160], sizes = [16, 16], strides = [1, 1]} : vector<16x192xf32> to vector<16x16xf32>
    %265 = vector.extract_strided_slice %261 {offsets = [0, 176], sizes = [16, 16], strides = [1, 1]} : vector<16x192xf32> to vector<16x16xf32>
    %266 = vector.shape_cast %257 : vector<16x16xf32> to vector<1x16x16xf32>
    %267 = vector.shape_cast %258 : vector<16x16xf32> to vector<1x16x16xf32>
    %268 = vector.shape_cast %259 : vector<16x16xf32> to vector<1x16x16xf32>
    %269 = vector.shape_cast %260 : vector<16x16xf32> to vector<1x16x16xf32>
    %270 = vector.shape_cast %262 : vector<16x16xf32> to vector<1x16x16xf32>
    %271 = vector.shape_cast %263 : vector<16x16xf32> to vector<1x16x16xf32>
    %272 = vector.shape_cast %264 : vector<16x16xf32> to vector<1x16x16xf32>
    %273 = vector.shape_cast %265 : vector<16x16xf32> to vector<1x16x16xf32>
    %274 = tpu.concatenate %266, %267, %268, %269, %270, %271, %272, %273 in 0 : vector<1x16x16xf32>, vector<1x16x16xf32>, vector<1x16x16xf32>, vector<1x16x16xf32>, vector<1x16x16xf32>, vector<1x16x16xf32>, vector<1x16x16xf32>, vector<1x16x16xf32> -> vector<8x16x16xf32>
    "tpu.trace_start"() <{level = 10 : i32, message = "gic,gjc->gij"}> : () -> ()
    %cst_97 = arith.constant dense<0.000000e+00> : vector<8x16x16xf32>
    %275 = tpu.matmul %236, %255, %cst_97 {dimension_numbers = #tpu.dot_dimension_numbers<[2], [2], [1], [1], [0, 0, 0, 1, 1, 1], [0], [0]>} : vector<8x16x16xf32>, vector<8x16x16xf32>, vector<8x16x16xf32> -> vector<8x16x16xf32>
    "tpu.trace_stop"() : () -> ()
    %cst_98 = arith.constant dense<0xFF800000> : vector<8x16xf32>
    %276 = vector.multi_reduction <maximumf>, %275, %cst_98 [2] : vector<8x16x16xf32> to vector<8x16xf32>
    %277 = vector.shape_cast %276 : vector<8x16xf32> to vector<8x16x1xf32>
    %278 = vector.broadcast %277 : vector<8x16x1xf32> to vector<8x16x16xf32>
    %279 = arith.subf %275, %278 : vector<8x16x16xf32>
    %280 = math.exp %279 : vector<8x16x16xf32>
    %cst_99 = arith.constant dense<0.000000e+00> : vector<8x16xf32>
    %281 = vector.multi_reduction <add>, %280, %cst_99 [2] : vector<8x16x16xf32> to vector<8x16xf32>
    %282 = vector.shape_cast %281 : vector<8x16xf32> to vector<8x16x1xf32>
    %283 = tpu.reciprocal %282 {approx = true} : vector<8x16x1xf32> -> vector<8x16x1xf32>
    %284 = arith.mulf %282, %283 : vector<8x16x1xf32>
    %cst_100 = arith.constant 2.000000e+00 : f32
    %285 = vector.broadcast %cst_100 : f32 to vector<8x16x1xf32>
    %286 = arith.subf %285, %284 : vector<8x16x1xf32>
    %287 = arith.mulf %283, %286 : vector<8x16x1xf32>
    %288 = vector.broadcast %287 : vector<8x16x1xf32> to vector<8x16x16xf32>
    %289 = arith.mulf %280, %288 : vector<8x16x16xf32>
    "tpu.trace_start"() <{level = 10 : i32, message = "gij,gjc->gic"}> : () -> ()
    %cst_101 = arith.constant dense<0.000000e+00> : vector<8x16x16xf32>
    %290 = tpu.matmul %289, %274, %cst_101 {dimension_numbers = #tpu.dot_dimension_numbers<[2], [1], [1], [2], [0, 0, 0, 1, 1, 2], [0], [0]>} : vector<8x16x16xf32>, vector<8x16x16xf32>, vector<8x16x16xf32> -> vector<8x16x16xf32>
    "tpu.trace_stop"() : () -> ()
    %291 = vector.extract_strided_slice %290 {offsets = [0, 0, 0], sizes = [1, 16, 16], strides = [1, 1, 1]} : vector<8x16x16xf32> to vector<1x16x16xf32>
    %292 = vector.shape_cast %291 : vector<1x16x16xf32> to vector<16x16xf32>
    %293 = vector.extract_strided_slice %290 {offsets = [1, 0, 0], sizes = [1, 16, 16], strides = [1, 1, 1]} : vector<8x16x16xf32> to vector<1x16x16xf32>
    %294 = vector.shape_cast %293 : vector<1x16x16xf32> to vector<16x16xf32>
    %295 = vector.extract_strided_slice %290 {offsets = [2, 0, 0], sizes = [1, 16, 16], strides = [1, 1, 1]} : vector<8x16x16xf32> to vector<1x16x16xf32>
    %296 = vector.shape_cast %295 : vector<1x16x16xf32> to vector<16x16xf32>
    %297 = vector.extract_strided_slice %290 {offsets = [3, 0, 0], sizes = [1, 16, 16], strides = [1, 1, 1]} : vector<8x16x16xf32> to vector<1x16x16xf32>
    %298 = vector.shape_cast %297 : vector<1x16x16xf32> to vector<16x16xf32>
    %299 = tpu.concatenate %292, %294, %296, %298 in 1 : vector<16x16xf32>, vector<16x16xf32>, vector<16x16xf32>, vector<16x16xf32> -> vector<16x64xf32>
    %300 = vector.extract_strided_slice %290 {offsets = [4, 0, 0], sizes = [1, 16, 16], strides = [1, 1, 1]} : vector<8x16x16xf32> to vector<1x16x16xf32>
    %301 = vector.shape_cast %300 : vector<1x16x16xf32> to vector<16x16xf32>
    %302 = vector.extract_strided_slice %290 {offsets = [5, 0, 0], sizes = [1, 16, 16], strides = [1, 1, 1]} : vector<8x16x16xf32> to vector<1x16x16xf32>
    %303 = vector.shape_cast %302 : vector<1x16x16xf32> to vector<16x16xf32>
    %304 = vector.extract_strided_slice %290 {offsets = [6, 0, 0], sizes = [1, 16, 16], strides = [1, 1, 1]} : vector<8x16x16xf32> to vector<1x16x16xf32>
    %305 = vector.shape_cast %304 : vector<1x16x16xf32> to vector<16x16xf32>
    %306 = vector.extract_strided_slice %290 {offsets = [7, 0, 0], sizes = [1, 16, 16], strides = [1, 1, 1]} : vector<8x16x16xf32> to vector<1x16x16xf32>
    %307 = vector.shape_cast %306 : vector<1x16x16xf32> to vector<16x16xf32>
    %308 = tpu.concatenate %301, %303, %305, %307 in 1 : vector<16x16xf32>, vector<16x16xf32>, vector<16x16xf32>, vector<16x16xf32> -> vector<16x64xf32>
    %309 = tpu.concatenate %299, %308 in 0 : vector<16x64xf32>, vector<16x64xf32> -> vector<32x64xf32>
    %cst_102 = arith.constant dense<0.000000e+00> : vector<32x64xf32>
    %310 = tpu.matmul %309, %196, %cst_102 {dimension_numbers = #tpu.dot_dimension_numbers<[1], [0], [0], [1], [0, 0, 1, 1], [], []>} : vector<32x64xf32>, vector<64x64xf32>, vector<32x64xf32> -> vector<32x64xf32>
    %311 = vector.broadcast %202 : vector<1x64xf32> to vector<32x64xf32>
    %312 = arith.addf %310, %311 : vector<32x64xf32>
    %313 = arith.addf %312, %190 : vector<32x64xf32>
    %cst_103 = arith.constant dense<0.000000e+00> : vector<32xf32>
    %314 = vector.multi_reduction <add>, %313, %cst_103 [1] : vector<32x64xf32> to vector<32xf32>
    %315 = vector.shape_cast %314 : vector<32xf32> to vector<32x1xf32>
    %cst_104 = arith.constant 6.400000e+01 : f32
    %316 = vector.broadcast %cst_104 : f32 to vector<32x1xf32>
    %317 = arith.divf %315, %316 : vector<32x1xf32>
    %318 = vector.broadcast %317 : vector<32x1xf32> to vector<32x64xf32>
    %319 = arith.subf %313, %318 : vector<32x64xf32>
    %320 = arith.mulf %319, %319 : vector<32x64xf32>
    %cst_105 = arith.constant dense<0.000000e+00> : vector<32xf32>
    %321 = vector.multi_reduction <add>, %320, %cst_105 [1] : vector<32x64xf32> to vector<32xf32>
    %322 = vector.shape_cast %321 : vector<32xf32> to vector<32x1xf32>
    %cst_106 = arith.constant 6.400000e+01 : f32
    %323 = vector.broadcast %cst_106 : f32 to vector<32x1xf32>
    %324 = arith.divf %322, %323 : vector<32x1xf32>
    %cst_107 = arith.constant 9.99999974E-6 : f32
    %325 = vector.broadcast %cst_107 : f32 to vector<32x1xf32>
    %326 = arith.addf %324, %325 : vector<32x1xf32>
    %327 = math.rsqrt %326 : vector<32x1xf32>
    %328 = vector.broadcast %327 : vector<32x1xf32> to vector<32x64xf32>
    %329 = arith.mulf %319, %328 : vector<32x64xf32>
    %330 = vector.broadcast %204 : vector<1x64xf32> to vector<32x64xf32>
    %331 = arith.mulf %329, %330 : vector<32x64xf32>
    %332 = vector.broadcast %206 : vector<1x64xf32> to vector<32x64xf32>
    %333 = arith.addf %331, %332 : vector<32x64xf32>
    %cst_108 = arith.constant dense<0.000000e+00> : vector<32x128xf32>
    %334 = tpu.matmul %333, %194, %cst_108 {dimension_numbers = #tpu.dot_dimension_numbers<[1], [0], [0], [1], [0, 0, 1, 1], [], []>} : vector<32x64xf32>, vector<64x128xf32>, vector<32x128xf32> -> vector<32x128xf32>
    %335 = vector.broadcast %208 : vector<1x128xf32> to vector<32x128xf32>
    %336 = arith.addf %334, %335 : vector<32x128xf32>
    %cst_109 = arith.constant 0.000000e+00 : f32
    %337 = vector.broadcast %cst_109 : f32 to vector<32x128xf32>
    %338 = arith.maximumf %336, %337 : vector<32x128xf32>
    %cst_110 = arith.constant dense<0.000000e+00> : vector<32x64xf32>
    %339 = tpu.matmul %338, %198, %cst_110 {dimension_numbers = #tpu.dot_dimension_numbers<[1], [0], [0], [1], [0, 0, 1, 1], [], []>} : vector<32x128xf32>, vector<128x64xf32>, vector<32x64xf32> -> vector<32x64xf32>
    %340 = vector.broadcast %210 : vector<1x64xf32> to vector<32x64xf32>
    %341 = arith.addf %339, %340 : vector<32x64xf32>
    %342 = arith.addf %341, %333 : vector<32x64xf32>
    %cst_111 = arith.constant dense<0.000000e+00> : vector<32xf32>
    %343 = vector.multi_reduction <add>, %342, %cst_111 [1] : vector<32x64xf32> to vector<32xf32>
    %344 = vector.shape_cast %343 : vector<32xf32> to vector<32x1xf32>
    %cst_112 = arith.constant 6.400000e+01 : f32
    %345 = vector.broadcast %cst_112 : f32 to vector<32x1xf32>
    %346 = arith.divf %344, %345 : vector<32x1xf32>
    %347 = vector.broadcast %346 : vector<32x1xf32> to vector<32x64xf32>
    %348 = arith.subf %342, %347 : vector<32x64xf32>
    %349 = arith.mulf %348, %348 : vector<32x64xf32>
    %cst_113 = arith.constant dense<0.000000e+00> : vector<32xf32>
    %350 = vector.multi_reduction <add>, %349, %cst_113 [1] : vector<32x64xf32> to vector<32xf32>
    %351 = vector.shape_cast %350 : vector<32xf32> to vector<32x1xf32>
    %cst_114 = arith.constant 6.400000e+01 : f32
    %352 = vector.broadcast %cst_114 : f32 to vector<32x1xf32>
    %353 = arith.divf %351, %352 : vector<32x1xf32>
    %cst_115 = arith.constant 9.99999974E-6 : f32
    %354 = vector.broadcast %cst_115 : f32 to vector<32x1xf32>
    %355 = arith.addf %353, %354 : vector<32x1xf32>
    %356 = math.rsqrt %355 : vector<32x1xf32>
    %357 = vector.broadcast %356 : vector<32x1xf32> to vector<32x64xf32>
    %358 = arith.mulf %348, %357 : vector<32x64xf32>
    %359 = vector.broadcast %212 : vector<1x64xf32> to vector<32x64xf32>
    %360 = arith.mulf %358, %359 : vector<32x64xf32>
    %361 = vector.broadcast %214 : vector<1x64xf32> to vector<32x64xf32>
    %362 = arith.addf %360, %361 : vector<32x64xf32>
    %c0_116 = arith.constant 0 : index
    %c0_117 = arith.constant 0 : index
    %363 = vector.load %arg5[%c0_116, %c0_117] : memref<226x128xf32, #tpu.memory_space<vmem>>, vector<64x128xf32>
    %c64 = arith.constant 64 : index
    %c0_118 = arith.constant 0 : index
    %364 = vector.load %arg5[%c64, %c0_118] : memref<226x128xf32, #tpu.memory_space<vmem>>, vector<32x128xf32>
    %c96 = arith.constant 96 : index
    %c0_119 = arith.constant 0 : index
    %365 = vector.load %arg5[%c96, %c0_119] : memref<226x128xf32, #tpu.memory_space<vmem>>, vector<128x8xf32>
    %c224 = arith.constant 224 : index
    %c0_120 = arith.constant 0 : index
    %366 = vector.load %arg5[%c224, %c0_120] : memref<226x128xf32, #tpu.memory_space<vmem>>, vector<2x32xf32>
    %cst_121 = arith.constant dense<0.000000e+00> : vector<32x128xf32>
    %367 = tpu.matmul %362, %363, %cst_121 {dimension_numbers = #tpu.dot_dimension_numbers<[1], [0], [0], [1], [0, 0, 1, 1], [], []>} : vector<32x64xf32>, vector<64x128xf32>, vector<32x128xf32> -> vector<32x128xf32>
    %368 = arith.mulf %367, %364 : vector<32x128xf32>
    %cst_122 = arith.constant dense<0.000000e+00> : vector<32x8xf32>
    %369 = tpu.matmul %368, %365, %cst_122 {dimension_numbers = #tpu.dot_dimension_numbers<[1], [0], [0], [1], [0, 0, 1, 1], [], []>} : vector<32x128xf32>, vector<128x8xf32>, vector<32x8xf32> -> vector<32x8xf32>
    %cst_123 = arith.constant dense<0.000000e+00> : vector<2x8xf32>
    %370 = tpu.matmul %366, %369, %cst_123 {dimension_numbers = #tpu.dot_dimension_numbers<[1], [0], [0], [1], [0, 0, 1, 1], [], []>} : vector<2x32xf32>, vector<32x8xf32>, vector<2x8xf32> -> vector<2x8xf32>
    %371 = vector.broadcast %10 : vector<1x8xf32> to vector<2x8xf32>
    %372 = arith.addf %370, %371 : vector<2x8xf32>
    %c0_124 = arith.constant 0 : index
    %c0_125 = arith.constant 0 : index
    %373 = vector.load %arg6[%c0_124, %c0_125] : memref<2x8xf32, #tpu.memory_space<vmem>>, vector<2x8xf32>
    tpu.vector_store %arg6[%c0_124, %c0_125], %372 {strides = array<i32>} : memref<2x8xf32, #tpu.memory_space<vmem>>, vector<2x8xf32>,
    return
  }
}

</mosaic_0001>

<bundles_post_ra>
// kernel: tpu_custom_call.1
= control target key start
LH: loop header
LB: loop body
LE: loop exit
PB: predicated region body
PF: predicated region fallthrough
CT: control target
= control target key end

     0   :  { %11 = vsyncpa [#allocation3], 0  ;;  %s4593_s0 = inlined_call_operand.vmem [shape: f32[2,8,16], index: 0, kind: input, shape index: {}]   ;;  %s4594_s1 = inlined_call_operand.vmem [shape: f32[48,64], index: 1, kind: input, shape index: {}]   ;;  %s4595_s2 = inlined_call_operand.hbm [shape: f32[2,64,448], index: 2, kind: input, shape index: {}]   ;;  %s4596_s3 = inlined_call_operand.vmem [shape: f32[2,128,64], index: 3, kind: input, shape index: {}]   ;;  %s4597_s4 = inlined_call_operand.vmem [shape: f32[2,8,192], index: 4, kind: input, shape index: {}]   ;;  %s4598_s5 = inlined_call_operand.vmem [shape: f32[226,128], index: 5, kind: input, shape index: {}]   ;;  %s4599_s6 = inlined_call_operand.hbm [shape: f32[2,8], index: 6, kind: output, shape index: {}]  }
   0x1   :  { %12 = vsyncpa [#allocation4], 0  ;;  %s21_s23 = sshll.u32 %s4595_s2, 4  ;;  %s3420_s24 = smov [#allocation2]   ;;  %s22_s23 = int_to_ptr.hbm [resolvable:$true] %s21_s23 }
   0x2   :  { %s23_s25 = sshll.u32 %s3420_s24, 4  ;;  %s3421_s26 = smov 512   ;;  %s24_s25 = int_to_ptr.vmem [resolvable:$true] %s23_s25 }
   0x3   :  { %s3422_s27 = smov 32  }
   0x4   :  { %29 = dma.hbm_to_vmem [thread:$0]  %s22_s23, 8192, %s24_s25, [#allocation3], %s3421_s26, %s3421_s26, %s3422_s27  }
   0x5   :  { %3416 = dma.done.wait [#allocation3], 8192  }
   0x6   :  { %3417 = vsyncadd [#allocation3], 4294959104  ;;  %v2957_v0 = vld [vmem:[%s4593_s0 + $0x8] sm:$0xff]  ;;  %s3423_s30 = smov 16   ;;  %v81_v1 = vld [vmem:[%s4594_s1] sm:$0xff]  ;;  %vm47_vm0 = vcmask 130048  }
   0x7   :  { %44 = vrot.lane.b32.xlu0 %v2957_v0, %s3423_s30  ;;  %118 = vmatpush.msra.mxu0 %v81_v1  ;;  %v40_v2 = vld [vmem:[%s4593_s0] sm:$0xff]  ;;  %vm90_vm1 = vcmask 64512   ;;  %v84_v10 = vld [vmem:[%s4594_s1 + $0x18] sm:$0xff]  ;;  %v83_v11 = vld [vmem:[%s4594_s1 + $0x10] sm:$0xff]  ;;  %vm137_vm2 = vcmask 261120   ;;  %vm240_vm3 = vcmask 523264  }
   0x8   :  { %v85_v5 = vld [vmem:[%s4594_s1 + $0x20] sm:$0xff]  ;;  %v82_v12 = vld [vmem:[%s4594_s1 + $0x8] sm:$0xff]  ;;  %s3424_s23 = smov 96   ;;  %s3425_s24 = smov 80   ;;  %vm1143_vm4 = vcmask 392192  }
   0x9   :  { %162 = vmatpush.msra.mxu1 %v85_v5  ;;  %v3203_v13 = vld [vmem:[%s4594_s1 + $0x28] ss:$0 sm:$0xff]  ;;  %v193_v14 = vld [vmem:[#allocation2 + $0xe0] sm:$0xff]  ;;  %v3204_v42 = vld [vmem:[%s4594_s1 + $0x29] ss:$0 sm:$0xff]  ;;  %s3426_s25 = smov 112  }
   0xa   :  { %v194_v15 = vld [vmem:[#allocation2 + $0xe8] sm:$0xff]  ;;  %v191_v16 = vld [vmem:[#allocation2 + $0xc0] sm:$0xff]  ;;  %261 = vmatpush.msra.mxu2 %v193_v14  ;;  %s3427_s26 = smov 64   ;;  %s3428_s28 = smov 48  }
   0xb   :  { %163 = vmatpush.msra.mxu1 %v84_v10  ;;  %290 = vmatpush.msrb.mxu0 %v194_v15  ;;  %v192_v17 = vld [vmem:[#allocation2 + $0xc8] sm:$0xff]  ;;  %v189_v18 = vld [vmem:[#allocation2 + $0xa0] sm:$0xff]  ;;  %s3430_s0 = smov [#allocation5]  }
   0xc   :  { %v190_v19 = vld [vmem:[#allocation2 + $0xa8] sm:$0xff]  ;;  %3123 = vmatpush.msra.mxu3 %v194_v15  ;;  %262 = vmatpush.msra.mxu2 %v191_v16  ;;  %v187_v22 = vld [vmem:[#allocation2 + $0x80] sm:$0xff]  ;;  %s2945_s12 = sshll.u32 %s3430_s0, 4  ;;  %s2946_s12 = int_to_ptr.vmem [resolvable:$true] %s2945_s12 }
   0xd   :  { %164 = vmatpush.msra.mxu1 %v83_v11  ;;  %291 = vmatpush.msrb.mxu0 %v192_v17  ;;  %v188_v23 = vld [vmem:[#allocation2 + $0x88] sm:$0xff]  ;;  %v185_v25 = vld [vmem:[#allocation2 + $0x60] sm:$0xff] }
   0xe   :  { %3124 = vmatpush.msra.mxu3 %v192_v17  ;;  %263 = vmatpush.msra.mxu2 %v189_v18  ;;  %v186_v26 = vld [vmem:[#allocation2 + $0x68] sm:$0xff]  ;;  %v183_v27 = vld [vmem:[#allocation2 + $0x40] sm:$0xff] }
   0xf   :  { %165 = vmatpush.msra.mxu1 %v82_v12  ;;  %292 = vmatpush.msrb.mxu0 %v190_v19  ;;  %v184_v28 = vld [vmem:[#allocation2 + $0x48] sm:$0xff]  ;;  %v181_v38 = vld [vmem:[#allocation2 + $0x20] sm:$0xff] }
  0x10   :  { %3125 = vmatpush.msra.mxu3 %v190_v19  ;;  %264 = vmatpush.msra.mxu2 %v187_v22  ;;  %v182_v39 = vld [vmem:[#allocation2 + $0x28] sm:$0xff]  ;;  %v179_v40 = vld [vmem:[#allocation2] sm:$0xff] }
  0x11   :  { %293 = vmatpush.msrb.mxu0 %v188_v23  ;;  %v180_v41 = vld [vmem:[#allocation2 + $0x8] sm:$0xff] }
  0x12   :  { %3126 = vmatpush.msra.mxu3 %v188_v23  ;;  %265 = vmatpush.msra.mxu2 %v185_v25  ;;  %v227_v51 = vld [vmem:[%s4597_s4] ss:$8 sm:$0x3] }
  0x13   :  { %294 = vmatpush.msrb.mxu0 %v186_v26  ;;  %v236_v52 = vperm.slane %v227_v51, 0  ;;  %v3564_v1 = vperm.slane %v227_v51, 1 }
  0x14   :  { %3127 = vmatpush.msra.mxu3 %v186_v26  ;;  %266 = vmatpush.msra.mxu2 %v183_v27 }
  0x15   :  { %295 = vmatpush.msrb.mxu0 %v184_v28 }
  0x16   :  { %3128 = vmatpush.msra.mxu3 %v184_v28  ;;  %267 = vmatpush.msra.mxu2 %v181_v38 }
  0x17   :  { %296 = vmatpush.msrb.mxu0 %v182_v39 }
  0x18   :  { %3129 = vmatpush.msra.mxu3 %v182_v39  ;;  %268 = vmatpush.msra.mxu2 %v179_v40 }
  0x19   :  { %297 = vmatpush.msrb.mxu0 %v180_v41 }
  0x1a   :  { %3130 = vmatpush.msra.mxu3 %v180_v41 }
  0x79   :  { %v45_v3 = vpop.permute.xlu0 %44 }
  0x7a   :  { %v48_v4 = vsel %vm47_vm0, %v40_v2, %v45_v3 }
  0x7b   :  { %49 = vxpose.xlu0.b32.start.end [1/1] (short) (narrow) %v48_v4, 32 }
 0x11f   :  { %v65_v6 = vpop.trf.xlu0 }
 0x120   :  { %2958 = vmatmul.msk.f32.vlgmr.msra.gmra.mxu0 %vm90_vm1, %v65_v6 }
 0x127   :  { %v66_v7 = vpop.trf.xlu0 }
 0x128   :  { %2959 = vmatmul.msk.f32.gmra.mxu0 %vm90_vm1, %v66_v7 }
 0x12f   :  { %v67_v8 = vpop.trf.xlu0 }
 0x130   :  { %2960 = vmatmul.msk.f32.gmra.mxu0 %vm90_vm1, %v67_v8 }
 0x137   :  { %v68_v9 = vpop.trf.xlu0 }
 0x138   :  { %2961 = vmatmul.msk.f32.gmra.mxu0 %vm90_vm1, %v68_v9 }
 0x19d   :  { %v120_v20 = vpop.f32.mrf.mxu0 }
 0x19e   :  { %v121_v21 = vadd.f32 %v3203_v13, %v120_v20 }
 0x1a0   :  { %v132_v24 = vmax.f32 %v121_v21, 0.0 }
 0x1a2   :  { %2962 = vmatmul.msk.f32.vlgmr.msra.gmra.mxu1 %vm137_vm2, %v132_v24 }
 0x1a5   :  { %v123_v29 = vpop.f32.mrf.mxu0 }
 0x1a6   :  { %v124_v30 = vadd.f32 %v3203_v13, %v123_v29 }
 0x1a8   :  { %v133_v31 = vmax.f32 %v124_v30, 0.0 }
 0x1aa   :  { %2963 = vmatmul.msk.f32.gmra.mxu1 %vm137_vm2, %v133_v31 }
 0x1ad   :  { %v126_v32 = vpop.f32.mrf.mxu0 }
 0x1ae   :  { %v127_v33 = vadd.f32 %v3203_v13, %v126_v32 }
 0x1b0   :  { %v134_v34 = vmax.f32 %v127_v33, 0.0 }
 0x1b2   :  { %2964 = vmatmul.msk.f32.gmra.mxu1 %vm137_vm2, %v134_v34 }
 0x1b5   :  { %v129_v35 = vpop.f32.mrf.mxu0 }
 0x1b6   :  { %v130_v36 = vadd.f32 %v3203_v13, %v129_v35 }
 0x1b8   :  { %v135_v37 = vmax.f32 %v130_v36, 0.0 }
 0x1ba   :  { %2965 = vmatmul.msk.f32.gmra.mxu1 %vm137_vm2, %v135_v37 }
 0x21f   :  { %v167_v43 = vpop.f32.mrf.mxu1 }
 0x220   :  { %v3503_v44 = vadd.f32 %v3204_v42, %v167_v43 }
 0x222   :  { %2966 = vmatmul.msk.f32.vlgmr.msra.gmra.mxu2 %vm240_vm3, %v3503_v44  ;;  %2970 = vmatmul.msk.f32.vlgmr.msrb.gmra.mxu0 %vm240_vm3, %v3503_v44 }
 0x227   :  { %v170_v45 = vpop.f32.mrf.mxu1 }
 0x228   :  { %v3509_v46 = vadd.f32 %v3204_v42, %v170_v45 }
 0x22a   :  { %2967 = vmatmul.msk.f32.gmra.mxu2 %vm240_vm3, %v3509_v46  ;;  %2971 = vmatmul.msk.f32.vlgmr.msra.gmra.mxu3 %vm240_vm3, %v3509_v46 }
 0x22f   :  { %v173_v47 = vpop.f32.mrf.mxu1 }
 0x230   :  { %v3515_v48 = vadd.f32 %v3204_v42, %v173_v47 }
 0x232   :  { %2968 = vmatmul.msk.f32.gmra.mxu2 %vm240_vm3, %v3515_v48  ;;  %2972 = vmatmul.msk.f32.gmra.mxu3 %vm240_vm3, %v3515_v48 }
 0x237   :  { %v176_v49 = vpop.f32.mrf.mxu1 }
 0x238   :  { %v3521_v50 = vadd.f32 %v3204_v42, %v176_v49 }
 0x23a   :  { %2969 = vmatmul.msk.f32.gmra.mxu2 %vm240_vm3, %v3521_v50  ;;  %2973 = vmatmul.msk.f32.gmra.mxu3 %vm240_vm3, %v3521_v50 }
 0x29f   :  { %v299_v2 = vpop.f32.mrf.mxu0 }
 0x2a0   :  { %v3571_v4 = vadd.f32 %v299_v2, %v3564_v1 }
 0x2a5   :  { %v270_v53 = vpop.f32.mrf.mxu2 }
 0x2a6   :  { %v3530_v54 = vadd.f32 %v270_v53, %v236_v52 }
 0x2a8   :  { %317 = vrot.lane.b32.xlu2 %v3530_v54, %s3424_s23 }
 0x2ad   :  { %v273_v55 = vpop.f32.mrf.mxu2  ;;  %v302_v63 = vpop.f32.mrf.mxu3 }
 0x2ae   :  { %v3534_v56 = vadd.f32 %v273_v55, %v236_v52  ;;  %v3568_v3 = vadd.f32 %v302_v63, %v3564_v1 }
 0x2b0   :  { %321 = vrot.lane.b32.xlu2 %v3530_v54, %s3425_s24  ;;  %319 = vrot.lane.b32.xlu1 %v3534_v56, %s3424_s23  ;;  %v3153_v5 = vpack.i.bf16 %v3571_v4, %v3568_v3 }
 0x2b5   :  { %v276_v57 = vpop.f32.mrf.mxu2  ;;  %v305_v36 = vpop.f32.mrf.mxu3 }
 0x2b6   :  { %v3550_v60 = vadd.f32 %v276_v57, %v236_v52  ;;  %v3635_v43 = vadd.f32 %v305_v36, %v3564_v1 }
 0x2b8   :  { %313 = vrot.lane.b32.xlu2 %v3530_v54, %s3426_s25  ;;  %323 = vrot.lane.b32.xlu1 %v3534_v56, %s3425_s24 }
 0x2bd   :  { %v279_v58 = vpop.f32.mrf.mxu2  ;;  %v308_v38 = vpop.f32.mrf.mxu3 }
 0x2be   :  { %v3544_v59 = vadd.f32 %v279_v58, %v236_v52  ;;  %v3630_v41 = vadd.f32 %v308_v38, %v3564_v1 }
 0x2c0   :  { %315 = vrot.lane.b32.xlu1 %v3534_v56, %s3426_s25  ;;  %337 = vrot.lane.b32.xlu2 %v3544_v59, %s3425_s24 }
 0x2c8   :  { %331 = vrot.lane.b32.xlu1 %v3550_v60, %s3424_s23  ;;  %335 = vrot.lane.b32.xlu2 %v3550_v60, %s3425_s24 }
 0x2d0   :  { %333 = vrot.lane.b32.xlu1 %v3544_v59, %s3424_s23  ;;  %327 = vrot.lane.b32.xlu2 %v3550_v60, %s3426_s25 }
 0x2d8   :  { %329 = vrot.lane.b32.xlu1 %v3544_v59, %s3426_s25 }
 0x302   :  { %v318_v61 = vpop.permute.xlu2 %317 }
 0x303   :  { %449 = vrot.lane.b32.xlu2 %v318_v61, %s3427_s26 }
 0x30a   :  { %v322_v62 = vpop.permute.xlu2 %321 }
 0x30b   :  { %484 = vrot.lane.b32.xlu1 %v322_v62, %s3427_s26 }
 0x312   :  { %v314_v7 = vpop.permute.xlu2 %313 }
 0x31a   :  { %v338_v9 = vpop.permute.xlu2 %337 }
 0x322   :  { %v320_v0 = vpop.permute.xlu1 %319  ;;  %v336_v11 = vpop.permute.xlu2 %335 }
 0x323   :  { %451 = vrot.lane.b32.xlu0 %v320_v0, %s3427_s26 }
 0x32a   :  { %v324_v6 = vpop.permute.xlu1 %323  ;;  %v328_v13 = vpop.permute.xlu2 %327 }
 0x32b   :  { %3154 = vrot.lane.b32.xlu0 %v3153_v5, %s3426_s25  ;;  %486 = vrot.lane.b32.xlu1 %v324_v6, %s3427_s26 }
 0x332   :  { %v316_v8 = vpop.permute.xlu1 %315 }
 0x333   :  { %416 = vrot.lane.b32.xlu2 %v316_v8, %s3427_s26  ;;  %414 = vrot.lane.b32.xlu1 %v314_v7, %s3427_s26 }
 0x33a   :  { %v332_v10 = vpop.permute.xlu1 %331 }
 0x33b   :  { %626 = vrot.lane.b32.xlu1 %v338_v9, %s3427_s26 }
 0x342   :  { %v334_v12 = vpop.permute.xlu1 %333 }
 0x343   :  { %624 = vrot.lane.b32.xlu1 %v336_v11, %s3427_s26  ;;  %591 = vrot.lane.b32.xlu2 %v334_v12, %s3427_s26 }
 0x34a   :  { %v330_v14 = vpop.permute.xlu1 %329 }
 0x34b   :  { %554 = vrot.lane.b32.xlu1 %v328_v13, %s3427_s26  ;;  %589 = vrot.lane.b32.xlu2 %v332_v10, %s3427_s26 }
 0x353   :  { %379 = vrot.lane.b32.xlu1 %v3530_v54, %s3427_s26  ;;  %556 = vrot.lane.b32.xlu2 %v330_v14, %s3427_s26 }
 0x35b   :  { %519 = vrot.lane.b32.xlu1 %v3550_v60, %s3427_s26  ;;  %381 = vrot.lane.b32.xlu2 %v3534_v56, %s3427_s26 }
 0x35d   :  { %v450_v15 = vpop.permute.xlu2 %449 }
 0x363   :  { %3149 = vrot.lane.b32.xlu1 %v3153_v5, %s3425_s24  ;;  %521 = vrot.lane.b32.xlu2 %v3544_v59, %s3427_s26 }
 0x36b   :  { %3144 = vrot.lane.b32.xlu2 %v3153_v5, %s3424_s23 }
 0x37d   :  { %v485_v17 = vpop.permute.xlu1 %484 }
 0x38d   :  { %v417_v16 = vpop.permute.xlu2 %416 }
 0x38e   :  { %2978 = vmatpush.xpose.msk.msrb.mxu1 %vm47_vm0, %v417_v16 }
 0x395   :  { %v452_v18 = vpop.permute.xlu0 %451 }
 0x396   :  { %2982 = vmatpush.xpose.msk.msrb.mxu2 %vm47_vm0, %v452_v18 }
 0x39a   :  { %2983 = vmatpush.xpose.msk.msrb.mxu2 %vm47_vm0, %v450_v15 }
 0x39d   :  { %v592_v19 = vpop.permute.xlu2 %591  ;;  %v487_v20 = vpop.permute.xlu1 %486  ;;  %2984 = vmatmul.msk.f32.vlgmr.msrb.gmra.mxu2 %vm47_vm0, %v318_v61 }
 0x39e   :  { %2986 = vmatpush.xpose.msk.msrb.mxu3 %vm47_vm0, %v487_v20  ;;  %2998 = vmatpush.xpose.msk.msra.mxu2 %vm47_vm0, %v592_v19  ;;  %v3155_v27 = vpop.permute.xlu0 %3154 }
 0x39f   :  { %v3156_v28 = vunpack.i.l.bf16 %v3155_v27  ;;  %v3157_v31 = vunpack.i.h.bf16 %v3155_v27 }
 0x3a2   :  { %2987 = vmatpush.xpose.msk.msrb.mxu3 %vm47_vm0, %v485_v17 }
 0x3a5   :  { %v590_v21 = vpop.permute.xlu2 %589  ;;  %2988 = vmatmul.msk.f32.vlgmr.msrb.gmra.mxu3 %vm47_vm0, %v322_v62  ;;  %v415_v22 = vpop.permute.xlu1 %414  ;;  %2985 = vmatmul.msk.f32.gmra.mxu2 %vm47_vm0, %v320_v0 }
 0x3a6   :  { %2979 = vmatpush.xpose.msk.msrb.mxu1 %vm47_vm0, %v415_v22  ;;  %2999 = vmatpush.xpose.msk.msra.mxu2 %vm47_vm0, %v590_v21 }
 0x3a9   :  { %2980 = vmatmul.msk.f32.vlgmr.msrb.gmra.mxu1 %vm47_vm0, %v314_v7 }
 0x3ad   :  { %v557_v23 = vpop.permute.xlu2 %556  ;;  %2989 = vmatmul.msk.f32.gmra.mxu3 %vm47_vm0, %v324_v6  ;;  %v627_v24 = vpop.permute.xlu1 %626  ;;  %3000 = vmatmul.msk.f32.vlgmr.msra.gmra.mxu2 %vm47_vm0, %v332_v10 }
 0x3ae   :  { %2994 = vmatpush.xpose.msk.msra.mxu1 %vm47_vm0, %v557_v23  ;;  %3002 = vmatpush.xpose.msk.msra.mxu3 %vm47_vm0, %v627_v24 }
 0x3b1   :  { %2981 = vmatmul.msk.f32.gmra.mxu1 %vm47_vm0, %v316_v8 }
 0x3b5   :  { %v382_v25 = vpop.permute.xlu2 %381  ;;  %v625_v26 = vpop.permute.xlu1 %624  ;;  %3001 = vmatmul.msk.f32.gmra.mxu2 %vm47_vm0, %v334_v12 }
 0x3b6   :  { %2974 = vmatpush.xpose.msk.msra.mxu0 %vm47_vm0, %v382_v25  ;;  %3003 = vmatpush.xpose.msk.msra.mxu3 %vm47_vm0, %v625_v26 }
 0x3b9   :  { %3004 = vmatmul.msk.f32.vlgmr.msra.gmra.mxu3 %vm47_vm0, %v336_v11 }
 0x3bd   :  { %v522_v29 = vpop.permute.xlu2 %521  ;;  %v555_v30 = vpop.permute.xlu1 %554 }
 0x3be   :  { %2995 = vmatpush.xpose.msk.msra.mxu1 %vm47_vm0, %v555_v30 }
 0x3c1   :  { %2996 = vmatmul.msk.f32.vlgmr.msra.gmra.mxu1 %vm47_vm0, %v328_v13  ;;  %3005 = vmatmul.msk.f32.gmra.mxu3 %vm47_vm0, %v338_v9 }
 0x3c2   :  { %932 = vmatpush.msrb.mxu1 %v3156_v28 }
 0x3c4   :  { %933 = vmatpush.msrb.mxu1 %v3157_v31 }
 0x3c5   :  { %v3145_v32 = vpop.permute.xlu2 %3144  ;;  %v380_v33 = vpop.permute.xlu1 %379 }
 0x3c6   :  { %v3146_v34 = vunpack.i.l.bf16 %v3145_v32  ;;  %2975 = vmatpush.xpose.msk.msra.mxu0 %vm47_vm0, %v380_v33  ;;  %v3147_v35 = vunpack.i.h.bf16 %v3145_v32 }
 0x3c8   :  { %961 = vmatpush.msrb.mxu2 %v3146_v34 }
 0x3c9   :  { %2976 = vmatmul.msk.f32.vlgmr.msra.gmra.mxu0 %vm47_vm0, %v3530_v54  ;;  %2997 = vmatmul.msk.f32.gmra.mxu1 %vm47_vm0, %v330_v14 }
 0x3ca   :  { %2990 = vmatpush.xpose.msk.msrb.mxu0 %vm47_vm0, %v522_v29  ;;  %962 = vmatpush.msrb.mxu2 %v3147_v35 }
 0x3cd   :  { %v520_v37 = vpop.permute.xlu1 %519 }
 0x3ce   :  { %2991 = vmatpush.xpose.msk.msrb.mxu0 %vm47_vm0, %v520_v37 }
 0x3d1   :  { %2977 = vmatmul.msk.f32.gmra.mxu0 %vm47_vm0, %v3534_v56 }
 0x3d2   :  { %903 = vmatpush.msra.mxu0 %v3568_v3 }
 0x3d4   :  { %904 = vmatpush.msra.mxu0 %v3571_v4 }
 0x3d5   :  { %v3150_v39 = vpop.permute.xlu1 %3149 }
 0x3d6   :  { %v3151_v40 = vunpack.i.l.bf16 %v3150_v39  ;;  %v3152_v42 = vunpack.i.h.bf16 %v3150_v39 }
 0x3d8   :  { %990 = vmatpush.msrb.mxu3 %v3151_v40 }
 0x3d9   :  { %2992 = vmatmul.msk.f32.vlgmr.msrb.gmra.mxu0 %vm47_vm0, %v3550_v60 }
 0x3da   :  { %1019 = vmatpush.msrb.mxu0 %v3630_v41  ;;  %991 = vmatpush.msrb.mxu3 %v3152_v42 }
 0x3dc   :  { %1020 = vmatpush.msrb.mxu0 %v3635_v43 }
 0x3e1   :  { %2993 = vmatmul.msk.f32.gmra.mxu0 %vm47_vm0, %v3544_v59 }
 0x420   :  { %v478_v45 = vpop.f32.mrf.mxu2 }
 0x421   :  { %v671_v58 = vsel %vm47_vm0, %v478_v45, -inf }
 0x426   :  { %v443_v51 = vpop.f32.mrf.mxu1 }
 0x427   :  { %v665_v53 = vsel %vm47_vm0, %v443_v51, -inf }
 0x428   :  { %v3650_v55 = vpop.f32.mrf.mxu2  ;;  %v513_v59 = vpop.f32.mrf.mxu3 }
 0x429   :  { %v677_v63 = vsel %vm47_vm0, %v513_v59, -inf  ;;  %v674_v6 = vsel %vm47_vm0, %v3650_v55, -inf }
 0x42e   :  { %v446_v61 = vpop.f32.mrf.mxu1 }
 0x42f   :  { %v668_v1 = vsel %vm47_vm0, %v446_v61, -inf }
 0x430   :  { %v3657_v60 = vpop.f32.mrf.mxu2  ;;  %v516_v2 = vpop.f32.mrf.mxu3 }
 0x431   :  { %v680_v4 = vsel %vm47_vm0, %v516_v2, -inf  ;;  %v695_v12 = vsel %vm47_vm0, %v3657_v60, -inf }
 0x438   :  { %v3665_v3 = vpop.f32.mrf.mxu2 }
 0x439   :  { %v698_v5 = vsel %vm47_vm0, %v3665_v3, -inf }
 0x43c   :  { %v653_v7 = vpop.f32.mrf.mxu3 }
 0x43d   :  { %v701_v10 = vsel %vm47_vm0, %v653_v7, -inf }
 0x43e   :  { %v583_v8 = vpop.f32.mrf.mxu1 }
 0x43f   :  { %v689_v9 = vsel %vm47_vm0, %v583_v8, -inf }
 0x444   :  { %v3674_v11 = vpop.f32.mrf.mxu3 }
 0x445   :  { %v704_v13 = vsel %vm47_vm0, %v3674_v11, -inf }
 0x446   :  { %v3641_v47 = vpop.f32.mrf.mxu0  ;;  %v3680_v14 = vpop.f32.mrf.mxu1 }
 0x447   :  { %v659_v49 = vsel %vm47_vm0, %v3641_v47, -inf  ;;  %v692_v15 = vsel %vm47_vm0, %v3680_v14, -inf }
 0x448   :  { %660 = vmax.xlane.f32.xlu2 %v659_v49 }
 0x44e   :  { %v3645_v52 = vpop.f32.mrf.mxu0 }
 0x44f   :  { %v662_v54 = vsel %vm47_vm0, %v3645_v52, -inf }
 0x450   :  { %666 = vmax.xlane.f32.xlu2 %v665_v53  ;;  %663 = vmax.xlane.f32.xlu1 %v662_v54 }
 0x456   :  { %v3652_v56 = vpop.f32.mrf.mxu0 }
 0x457   :  { %v683_v57 = vsel %vm47_vm0, %v3652_v56, -inf }
 0x458   :  { %684 = vmax.xlane.f32.xlu1 %v683_v57  ;;  %672 = vmax.xlane.f32.xlu2 %v671_v58 }
 0x45e   :  { %v3659_v62 = vpop.f32.mrf.mxu0 }
 0x45f   :  { %v686_v0 = vsel %vm47_vm0, %v3659_v62, -inf }
 0x460   :  { %678 = vmax.xlane.f32.xlu1 %v677_v63  ;;  %687 = vmax.xlane.f32.xlu0 %v686_v0 }
 0x461   :  { %669 = vmax.xlane.f32.xlu2 %v668_v1 }
 0x468   :  { %681 = vmax.xlane.f32.xlu1 %v680_v4  ;;  %699 = vmax.xlane.f32.xlu0 %v698_v5 }
 0x469   :  { %675 = vmax.xlane.f32.xlu2 %v674_v6 }
 0x470   :  { %690 = vmax.xlane.f32.xlu1 %v689_v9 }
 0x471   :  { %702 = vmax.xlane.f32.xlu2 %v701_v10 }
 0x478   :  { %696 = vmax.xlane.f32.xlu1 %v695_v12 }
 0x479   :  { %705 = vmax.xlane.f32.xlu2 %v704_v13 }
 0x480   :  { %693 = vmax.xlane.f32.xlu1 %v692_v15 }
 0x4bb   :  { %v3684_v16 = vpop.xlane.xlu2 %660 }
 0x4c3   :  { %v667_v17 = vpop.xlane.xlu2 %666  ;;  %v3686_v18 = vpop.xlane.xlu1 %663 }
 0x4c4   :  { %v709_v19 = vsub.f32 %v443_v51, %v667_v17 }
 0x4c6   :  { %v727_v20 = vmul.f32 1.442695, %v709_v19 }
 0x4c8   :  { %3206 = vpow2.f32 %v727_v20 }
 0x4cb   :  { %v3688_v21 = vpop.xlane.xlu1 %684  ;;  %v673_v22 = vpop.xlane.xlu2 %672 }
 0x4cc   :  { %v711_v23 = vsub.f32 %v478_v45, %v673_v22 }
 0x4ce   :  { %v3690_v24 = vpop.eup %3206  ;;  %v731_v25 = vmul.f32 1.442695, %v711_v23 }
 0x4cf   :  { %v761_v26 = vsel %vm47_vm0, %v3690_v24, 0.0 }
 0x4d0   :  { %762 = vadd.xlane.f32.xlu2 %v761_v26  ;;  %3208 = vpow2.f32 %v731_v25 }
 0x4d3   :  { %v679_v27 = vpop.xlane.xlu1 %678  ;;  %v688_v53 = vpop.xlane.xlu0 %687 }
 0x4d4   :  { %v713_v28 = vsub.f32 %v513_v59, %v679_v27  ;;  %v670_v29 = vpop.xlane.xlu2 %669 }
 0x4d5   :  { %v710_v30 = vsub.f32 %v446_v61, %v670_v29 }
 0x4d6   :  { %v735_v31 = vmul.f32 1.442695, %v713_v28  ;;  %v3694_v32 = vpop.eup %3208 }
 0x4d7   :  { %v729_v33 = vmul.f32 1.442695, %v710_v30  ;;  %v767_v34 = vsel %vm47_vm0, %v3694_v32, 0.0  ;;  %v3158_v30 = vpack.i.bf16 %v3635_v43, %v3630_v41 }
 0x4d8   :  { %3210 = vpow2.f32 %v735_v31  ;;  %768 = vadd.xlane.f32.xlu2 %v767_v34  ;;  %v707_v31 = vsub.f32 %v3641_v47, %v3684_v16  ;;  %v716_v34 = vsub.f32 %v3659_v62, %v688_v53  ;;  %v708_v47 = vsub.f32 %v3645_v52, %v3686_v18 }
 0x4d9   :  { %3212 = vpow2.f32 %v729_v33 }
 0x4da   :  { %v723_v33 = vmul.f32 1.442695, %v707_v31  ;;  %v725_v62 = vmul.f32 1.442695, %v708_v47 }
 0x4db   :  { %v682_v35 = vpop.xlane.xlu1 %681  ;;  %v700_v4 = vpop.xlane.xlu0 %699 }
 0x4dc   :  { %v714_v36 = vsub.f32 %v516_v2, %v682_v35  ;;  %v676_v37 = vpop.xlane.xlu2 %675  ;;  %v715_v35 = vsub.f32 %v3652_v56, %v3688_v21 }
 0x4dd   :  { %v712_v38 = vsub.f32 %v3650_v55, %v676_v37 }
 0x4de   :  { %v3699_v39 = vpop.eup %3210  ;;  %v737_v40 = vmul.f32 1.442695, %v714_v36  ;;  %v741_v36 = vmul.f32 1.442695, %v716_v34  ;;  %v739_v41 = vmul.f32 1.442695, %v715_v35 }
 0x4df   :  { %v3701_v42 = vpop.eup %3212  ;;  %v733_v45 = vmul.f32 1.442695, %v712_v38  ;;  %v773_v49 = vsel %vm47_vm0, %v3699_v39, 0.0 }
 0x4e0   :  { %3214 = vpow2.f32 %v737_v40  ;;  %774 = vadd.xlane.f32.xlu1 %v773_v49  ;;  %v764_v51 = vsel %vm47_vm0, %v3701_v42, 0.0 }
 0x4e1   :  { %3216 = vpow2.f32 %v733_v45  ;;  %765 = vadd.xlane.f32.xlu0 %v764_v51 }
 0x4e3   :  { %v691_v54 = vpop.xlane.xlu1 %690 }
 0x4e4   :  { %v717_v57 = vsub.f32 %v583_v8, %v691_v54  ;;  %v703_v55 = vpop.xlane.xlu2 %702  ;;  %v720_v8 = vsub.f32 %v3665_v3, %v700_v4 }
 0x4e5   :  { %v721_v58 = vsub.f32 %v653_v7, %v703_v55 }
 0x4e6   :  { %v3707_v59 = vpop.eup %3214  ;;  %v743_v61 = vmul.f32 1.442695, %v717_v57  ;;  %v749_v15 = vmul.f32 1.442695, %v720_v8 }
 0x4e7   :  { %v3709_v63 = vpop.eup %3216  ;;  %v751_v0 = vmul.f32 1.442695, %v721_v58  ;;  %v776_v1 = vsel %vm47_vm0, %v3707_v59, 0.0 }
 0x4e8   :  { %3218 = vpow2.f32 %v743_v61  ;;  %v770_v2 = vsel %vm47_vm0, %v3709_v63, 0.0  ;;  %777 = vadd.xlane.f32.xlu1 %v776_v1 }
 0x4e9   :  { %3220 = vpow2.f32 %v751_v0  ;;  %771 = vadd.xlane.f32.xlu2 %v770_v2 }
 0x4eb   :  { %v697_v5 = vpop.xlane.xlu1 %696 }
 0x4ec   :  { %v719_v6 = vsub.f32 %v3657_v60, %v697_v5  ;;  %v706_v17 = vpop.xlane.xlu2 %705 }
 0x4ed   :  { %v722_v3 = vsub.f32 %v3674_v11, %v706_v17 }
 0x4ee   :  { %v3716_v7 = vpop.eup %3218  ;;  %v747_v9 = vmul.f32 1.442695, %v719_v6 }
 0x4ef   :  { %v3719_v10 = vpop.eup %3220  ;;  %v785_v12 = vsel %vm47_vm0, %v3716_v7, 0.0  ;;  %v753_v25 = vmul.f32 1.442695, %v722_v3 }
 0x4f0   :  { %3222 = vpow2.f32 %v747_v9  ;;  %v797_v13 = vsel %vm47_vm0, %v3719_v10, 0.0  ;;  %786 = vadd.xlane.f32.xlu1 %v785_v12 }
 0x4f1   :  { %798 = vadd.xlane.f32.xlu2 %v797_v13  ;;  %3224 = vpow2.f32 %v749_v15 }
 0x4f3   :  { %v694_v19 = vpop.xlane.xlu1 %693 }
 0x4f4   :  { %v718_v60 = vsub.f32 %v3680_v14, %v694_v19 }
 0x4f6   :  { %v3726_v20 = vpop.eup %3222  ;;  %v745_v22 = vmul.f32 1.442695, %v718_v60 }
 0x4f7   :  { %v791_v23 = vsel %vm47_vm0, %v3726_v20, 0.0  ;;  %v3731_v26 = vpop.eup %3224 }
 0x4f8   :  { %3226 = vpow2.f32 %v745_v22  ;;  %792 = vadd.xlane.f32.xlu0 %v791_v23  ;;  %v794_v28 = vsel %vm47_vm0, %v3731_v26, 0.0 }
 0x4f9   :  { %3228 = vpow2.f32 %v753_v25 }
 0x4fa   :  { %3230 = vpow2.f32 %v723_v33 }
 0x4fb   :  { %3232 = vpow2.f32 %v741_v36 }
 0x4fc   :  { %3234 = vpow2.f32 %v739_v41 }
 0x4fd   :  { %3236 = vpow2.f32 %v725_v62 }
 0x4fe   :  { %v3733_v27 = vpop.eup %3226 }
 0x4ff   :  { %v788_v14 = vsel %vm47_vm0, %v3733_v27, 0.0  ;;  %v3739_v11 = vpop.eup %3228 }
 0x500   :  { %789 = vadd.xlane.f32.xlu2 %v788_v14  ;;  %795 = vadd.xlane.f32.xlu0 %v794_v28  ;;  %v800_v29 = vsel %vm47_vm0, %v3739_v11, 0.0  ;;  %v3753_v37 = vpop.eup %3230 }
 0x501   :  { %v755_v43 = vsel %vm47_vm0, %v3753_v37, 0.0  ;;  %v3757_v38 = vpop.eup %3232 }
 0x502   :  { %v3761_v16 = vpop.eup %3234  ;;  %v782_v56 = vsel %vm47_vm0, %v3757_v38, 0.0 }
 0x503   :  { %v779_v21 = vsel %vm47_vm0, %v3761_v16, 0.0  ;;  %v3767_v45 = vpop.eup %3236 }
 0x504   :  { %v758_v49 = vsel %vm47_vm0, %v3767_v45, 0.0 }
 0x508   :  { %801 = vadd.xlane.f32.xlu2 %v800_v29 }
 0x509   :  { %3159 = vrot.lane.b32.xlu1 %v3158_v30, %s3424_s23 }
 0x514   :  { %3169 = vrot.lane.b32.xlu0 %v3158_v30, %s3426_s25 }
 0x520   :  { %3164 = vrot.lane.b32.xlu2 %v3158_v30, %s3425_s24 }
 0x533   :  { %756 = vadd.xlane.f32.xlu1 %v755_v43 }
 0x53b   :  { %783 = vadd.xlane.f32.xlu1 %v782_v56 }
 0x53e   :  { %780 = vadd.xlane.f32.xlu0 %v779_v21 }
 0x543   :  { %v763_v40 = vpop.xlane.xlu2 %762 }
 0x544   :  { %3238 = vrcp.f32 %v763_v40 }
 0x549   :  { %759 = vadd.xlane.f32.xlu2 %v758_v49 }
 0x54a   :  { %v3239_v52 = vpop.eup %3238 }
 0x54b   :  { %v821_v18 = vmul.f32 %v3239_v52, %v763_v40  ;;  %v769_v51 = vpop.xlane.xlu2 %768 }
 0x54c   :  { %3240 = vrcp.f32 %v769_v51 }
 0x54d   :  { %v837_v53 = vsub.f32 2.0, %v821_v18 }
 0x54f   :  { %v853_v54 = vmul.f32 %v3239_v52, %v837_v53 }
 0x551   :  { %v869_v57 = vmul.f32 %v3690_v24, %v853_v54 }
 0x552   :  { %v3241_v55 = vpop.eup %3240 }
 0x553   :  { %v775_v58 = vpop.xlane.xlu1 %774  ;;  %3008 = vmatmul.msk.f32.vlgmr.msrb.gmra.mxu1 %vm47_vm0, %v869_v57  ;;  %v823_v61 = vmul.f32 %v3241_v55, %v769_v51 }
 0x554   :  { %3242 = vrcp.f32 %v775_v58  ;;  %v766_v0 = vpop.xlane.xlu0 %765 }
 0x555   :  { %3244 = vrcp.f32 %v766_v0  ;;  %v839_v1 = vsub.f32 2.0, %v823_v61 }
 0x557   :  { %v855_v2 = vmul.f32 %v3241_v55, %v839_v1 }
 0x559   :  { %v871_v5 = vmul.f32 %v3694_v32, %v855_v2 }
 0x55a   :  { %v3243_v4 = vpop.eup %3242 }
 0x55b   :  { %v3245_v6 = vpop.eup %3244  ;;  %v825_v8 = vmul.f32 %v3243_v4, %v775_v58  ;;  %v778_v9 = vpop.xlane.xlu1 %777  ;;  %3010 = vmatmul.msk.f32.vlgmr.msrb.gmra.mxu2 %vm47_vm0, %v871_v5 }
 0x55c   :  { %v822_v12 = vmul.f32 %v3245_v6, %v766_v0  ;;  %v772_v24 = vpop.xlane.xlu2 %771  ;;  %3246 = vrcp.f32 %v778_v9 }
 0x55d   :  { %v841_v13 = vsub.f32 2.0, %v825_v8  ;;  %3248 = vrcp.f32 %v772_v24 }
 0x55e   :  { %v838_v15 = vsub.f32 2.0, %v822_v12 }
 0x55f   :  { %v857_v17 = vmul.f32 %v3243_v4, %v841_v13 }
 0x560   :  { %v854_v19 = vmul.f32 %v3245_v6, %v838_v15 }
 0x561   :  { %v873_v60 = vmul.f32 %v3699_v39, %v857_v17 }
 0x562   :  { %v3247_v3 = vpop.eup %3246  ;;  %v870_v22 = vmul.f32 %v3701_v42, %v854_v19 }
 0x563   :  { %v3249_v23 = vpop.eup %3248  ;;  %v826_v32 = vmul.f32 %v3247_v3, %v778_v9  ;;  %3012 = vmatmul.msk.f32.vlgmr.msrb.gmra.mxu3 %vm47_vm0, %v873_v60  ;;  %v787_v42 = vpop.xlane.xlu1 %786 }
 0x564   :  { %v824_v25 = vmul.f32 %v3249_v23, %v772_v24  ;;  %3009 = vmatmul.msk.f32.gmra.mxu1 %vm47_vm0, %v870_v22  ;;  %v799_v34 = vpop.xlane.xlu2 %798 }
 0x565   :  { %v842_v14 = vsub.f32 2.0, %v826_v32 }
 0x566   :  { %v840_v28 = vsub.f32 2.0, %v824_v25 }
 0x567   :  { %v858_v29 = vmul.f32 %v3247_v3, %v842_v14 }
 0x568   :  { %v856_v30 = vmul.f32 %v3249_v23, %v840_v28 }
 0x569   :  { %v874_v31 = vmul.f32 %v3707_v59, %v858_v29 }
 0x56a   :  { %v872_v33 = vmul.f32 %v3709_v63, %v856_v30 }
 0x56b   :  { %3013 = vmatmul.msk.f32.gmra.mxu3 %vm47_vm0, %v874_v31  ;;  %v793_v39 = vpop.xlane.xlu0 %792 }
 0x56c   :  { %3011 = vmatmul.msk.f32.gmra.mxu2 %vm47_vm0, %v872_v33  ;;  %3250 = vrcp.f32 %v793_v39 }
 0x56d   :  { %3252 = vrcp.f32 %v799_v34 }
 0x56e   :  { %3254 = vrcp.f32 %v787_v42 }
 0x572   :  { %v3251_v35 = vpop.eup %3250 }
 0x573   :  { %v831_v36 = vmul.f32 %v3251_v35, %v793_v39  ;;  %v790_v41 = vpop.xlane.xlu2 %789  ;;  %v796_v43 = vpop.xlane.xlu0 %795 }
 0x574   :  { %3256 = vrcp.f32 %v796_v43  ;;  %v3253_v56 = vpop.eup %3252 }
 0x575   :  { %v847_v47 = vsub.f32 2.0, %v831_v36  ;;  %v3255_v59 = vpop.eup %3254  ;;  %v833_v49 = vmul.f32 %v3253_v56, %v799_v34 }
 0x576   :  { %v829_v51 = vmul.f32 %v3255_v59, %v787_v42 }
 0x577   :  { %v863_v63 = vmul.f32 %v3251_v35, %v847_v47  ;;  %v849_v55 = vsub.f32 2.0, %v833_v49 }
 0x578   :  { %v845_v61 = vsub.f32 2.0, %v829_v51 }
 0x579   :  { %v879_v54 = vmul.f32 %v3726_v20, %v863_v63  ;;  %v865_v4 = vmul.f32 %v3253_v56, %v849_v55  ;;  %v210_v55 = vld [vmem:[#allocation2 + $0xf8] sm:$0xff] }
 0x57a   :  { %v3257_v62 = vpop.eup %3256  ;;  %v861_v8 = vmul.f32 %v3255_v59, %v845_v61  ;;  %v208_v61 = vld [vmem:[#allocation2 + $0xb8] sm:$0xff] }
 0x57b   :  { %v802_v21 = vpop.xlane.xlu2 %801  ;;  %v3160_v40 = vpop.permute.xlu1 %3159  ;;  %v832_v52 = vmul.f32 %v3257_v62, %v796_v43  ;;  %v881_v15 = vmul.f32 %v3719_v10, %v865_v4  ;;  %v204_v4 = vld [vmem:[#allocation2 + $0x38] sm:$0xff] }
 0x57c   :  { %3258 = vrcp.f32 %v802_v21  ;;  %v3161_v18 = vunpack.i.l.bf16 %v3160_v40  ;;  %v3162_v53 = vunpack.i.h.bf16 %v3160_v40  ;;  %v877_v60 = vmul.f32 %v3716_v7, %v861_v8 }
 0x57d   :  { %3260 = vrcp.f32 %v790_v41  ;;  %v848_v57 = vsub.f32 2.0, %v832_v52 }
 0x57e   :  { %1077 = vmatpush.msra.mxu2 %v3161_v18 }
 0x57f   :  { %v864_v1 = vmul.f32 %v3257_v62, %v848_v57 }
 0x580   :  { %1078 = vmatpush.msra.mxu2 %v3162_v53 }
 0x581   :  { %3018 = vmatmul.msk.f32.vlgmr.msra.gmra.mxu2 %vm47_vm0, %v879_v54  ;;  %v880_v20 = vmul.f32 %v3731_v26, %v864_v1  ;;  %v206_v1 = vld [vmem:[#allocation2 + $0x78] sm:$0xff] }
 0x582   :  { %v3259_v58 = vpop.eup %3258 }
 0x583   :  { %v3261_v0 = vpop.eup %3260  ;;  %v3165_v2 = vpop.permute.xlu2 %3164  ;;  %v834_v5 = vmul.f32 %v3259_v58, %v802_v21 }
 0x584   :  { %v3166_v6 = vunpack.i.l.bf16 %v3165_v2  ;;  %v830_v9 = vmul.f32 %v3261_v0, %v790_v41  ;;  %v3167_v12 = vunpack.i.h.bf16 %v3165_v2  ;;  %v205_v2 = vld [vmem:[#allocation2 + $0x58] sm:$0xff] }
 0x585   :  { %v850_v17 = vsub.f32 2.0, %v834_v5  ;;  %v203_v5 = vld [vmem:[#allocation2 + $0x18] sm:$0xff] }
 0x586   :  { %1106 = vmatpush.msra.mxu3 %v3166_v6  ;;  %v3170_v24 = vpop.permute.xlu0 %3169  ;;  %v846_v3 = vsub.f32 2.0, %v830_v9 }
 0x587   :  { %v3171_v13 = vunpack.i.l.bf16 %v3170_v24  ;;  %v3172_v19 = vunpack.i.h.bf16 %v3170_v24  ;;  %v866_v22 = vmul.f32 %v3259_v58, %v850_v17  ;;  %v209_v58 = vld [vmem:[#allocation2 + $0xd8] sm:$0xff] }
 0x588   :  { %1107 = vmatpush.msra.mxu3 %v3167_v12  ;;  %v862_v23 = vmul.f32 %v3261_v0, %v846_v3  ;;  %v207_v0 = vld [vmem:[#allocation2 + $0x98] sm:$0xff] }
 0x589   :  { %1048 = vmatpush.msra.mxu1 %v3171_v13  ;;  %3019 = vmatmul.msk.f32.gmra.mxu2 %vm47_vm0, %v880_v20  ;;  %v882_v26 = vmul.f32 %v3739_v11, %v866_v22 }
 0x58a   :  { %3020 = vmatmul.msk.f32.vlgmr.msra.gmra.mxu3 %vm47_vm0, %v881_v15  ;;  %v878_v10 = vmul.f32 %v3733_v27, %v862_v23 }
 0x58b   :  { %1049 = vmatpush.msra.mxu1 %v3172_v19 }
 0x58c   :  { %3016 = vmatmul.msk.f32.vlgmr.msra.gmra.mxu1 %vm47_vm0, %v877_v60 }
 0x592   :  { %3021 = vmatmul.msk.f32.gmra.mxu3 %vm47_vm0, %v882_v26 }
 0x594   :  { %3017 = vmatmul.msk.f32.gmra.mxu1 %vm47_vm0, %v878_v10 }
 0x5a6   :  { %v757_v32 = vpop.xlane.xlu1 %756 }
 0x5a7   :  { %3262 = vrcp.f32 %v757_v32 }
 0x5ad   :  { %v3263_v25 = vpop.eup %3262 }
 0x5ae   :  { %v819_v7 = vmul.f32 %v3263_v25, %v757_v32  ;;  %v784_v33 = vpop.xlane.xlu1 %783 }
 0x5b0   :  { %v835_v14 = vsub.f32 2.0, %v819_v7 }
 0x5b1   :  { %v781_v30 = vpop.xlane.xlu0 %780 }
 0x5b2   :  { %v851_v28 = vmul.f32 %v3263_v25, %v835_v14  ;;  %3264 = vrcp.f32 %v781_v30 }
 0x5b4   :  { %v867_v29 = vmul.f32 %v3753_v37, %v851_v28 }
 0x5b6   :  { %3006 = vmatmul.msk.f32.vlgmr.msra.gmra.mxu0 %vm47_vm0, %v867_v29 }
 0x5b7   :  { %1196 = vmatpush.msra.mxu0 %v210_v55 }
 0x5b8   :  { %v3265_v11 = vpop.eup %3264 }
 0x5b9   :  { %v827_v39 = vmul.f32 %v3265_v11, %v781_v30  ;;  %1197 = vmatpush.msra.mxu0 %v209_v58 }
 0x5bb   :  { %v843_v36 = vsub.f32 2.0, %v827_v39  ;;  %1198 = vmatpush.msra.mxu0 %v208_v61  ;;  %v228_v39 = vld [vmem:[%s4597_s4 + $0x1] ss:$0 sm:$0xff] }
 0x5bc   :  { %v760_v31 = vpop.xlane.xlu2 %759 }
 0x5bd   :  { %3266 = vrcp.f32 %v760_v31  ;;  %v859_v47 = vmul.f32 %v3265_v11, %v843_v36  ;;  %1199 = vmatpush.msra.mxu0 %v207_v0 }
 0x5be   :  { %3268 = vrcp.f32 %v784_v33 }
 0x5bf   :  { %v875_v62 = vmul.f32 %v3761_v16, %v859_v47  ;;  %1200 = vmatpush.msra.mxu0 %v206_v1 }
 0x5c1   :  { %1201 = vmatpush.msra.mxu0 %v205_v2 }
 0x5c3   :  { %v3267_v34 = vpop.eup %3266  ;;  %1202 = vmatpush.msra.mxu0 %v204_v4 }
 0x5c4   :  { %v820_v27 = vmul.f32 %v3267_v34, %v760_v31  ;;  %v3269_v43 = vpop.eup %3268 }
 0x5c5   :  { %v828_v37 = vmul.f32 %v3269_v43, %v784_v33  ;;  %1203 = vmatpush.msra.mxu0 %v203_v5 }
 0x5c6   :  { %v836_v42 = vsub.f32 2.0, %v820_v27 }
 0x5c7   :  { %v844_v59 = vsub.f32 2.0, %v828_v37 }
 0x5c8   :  { %v852_v35 = vmul.f32 %v3267_v34, %v836_v42 }
 0x5c9   :  { %v860_v63 = vmul.f32 %v3269_v43, %v844_v59 }
 0x5ca   :  { %v868_v41 = vmul.f32 %v3767_v45, %v852_v35 }
 0x5cb   :  { %v876_v21 = vmul.f32 %v3757_v38, %v860_v63 }
 0x5cc   :  { %3007 = vmatmul.msk.f32.gmra.mxu0 %vm47_vm0, %v868_v41 }
 0x5d0   :  { %v935_v56 = vpop.f32.mrf.mxu1 }
 0x5d1   :  { %1117 = vrot.lane.b32.xlu1 %v935_v56, %s3423_s30 }
 0x5d4   :  { %3014 = vmatmul.msk.f32.vlgmr.msrb.gmra.mxu0 %vm47_vm0, %v875_v62 }
 0x5dc   :  { %3015 = vmatmul.msk.f32.gmra.mxu0 %vm47_vm0, %v876_v21 }
 0x5de   :  { %v964_v40 = vpop.f32.mrf.mxu2 }
 0x5df   :  { %1125 = vrot.lane.b32.xlu2 %v964_v40, %s3422_s27 }
 0x5e1   :  { %v938_v45 = vpop.f32.mrf.mxu1 }
 0x5e2   :  { %1119 = vrot.lane.b32.xlu1 %v938_v45, %s3423_s30 }
 0x5e6   :  { %v993_v49 = vpop.f32.mrf.mxu3 }
 0x5e7   :  { %1133 = vrot.lane.b32.xlu0 %v993_v49, %s3428_s28 }
 0x5ee   :  { %v996_v52 = vpop.f32.mrf.mxu3 }
 0x5ef   :  { %v967_v18 = vpop.f32.mrf.mxu2  ;;  %1135 = vrot.lane.b32.xlu2 %v996_v52, %s3428_s28  ;;  %v3429_v52 = vmov 64.0  }
 0x5f0   :  { %1127 = vrot.lane.b32.xlu0 %v967_v18, %s3422_s27  ;;  %3270 = vrcp.f32 %v3429_v52 }
 0x604   :  { %v1080_v16 = vpop.f32.mrf.mxu2 }
 0x605   :  { %1156 = vrot.lane.b32.xlu0 %v1080_v16, %s3422_s27 }
 0x609   :  { %v1051_v38 = vpop.f32.mrf.mxu1 }
 0x60a   :  { %1148 = vrot.lane.b32.xlu1 %v1051_v38, %s3423_s30 }
 0x60c   :  { %v1083_v51 = vpop.f32.mrf.mxu2 }
 0x60d   :  { %v1109_v53 = vpop.f32.mrf.mxu3  ;;  %1158 = vrot.lane.b32.xlu0 %v1083_v51, %s3422_s27 }
 0x60e   :  { %1164 = vrot.lane.b32.xlu2 %v1109_v53, %s3428_s28 }
 0x611   :  { %v1054_v54 = vpop.f32.mrf.mxu1 }
 0x612   :  { %1150 = vrot.lane.b32.xlu1 %v1054_v54, %s3423_s30 }
 0x615   :  { %v1112_v57 = vpop.f32.mrf.mxu3 }
 0x616   :  { %1166 = vrot.lane.b32.xlu2 %v1112_v57, %s3428_s28 }
 0x633   :  { %v906_v8 = vpop.f32.mrf.mxu0 }
 0x639   :  { %v1126_v12 = vpop.permute.xlu2 %1125 }
 0x643   :  { %v1118_v6 = vpop.permute.xlu1 %1117 }
 0x644   :  { %v1139_v9 = vsel %vm47_vm0, %v906_v8, %v1118_v6 }
 0x645   :  { %v1141_v13 = vsel %vm137_vm2, %v1139_v9, %v1126_v12 }
 0x649   :  { %v909_v17 = vpop.f32.mrf.mxu0  ;;  %v1136_v3 = vpop.permute.xlu2 %1135 }
 0x651   :  { %v1022_v26 = vpop.f32.mrf.mxu0 }
 0x654   :  { %v1120_v15 = vpop.permute.xlu1 %1119 }
 0x655   :  { %v1140_v19 = vsel %vm47_vm0, %v909_v17, %v1120_v15  ;;  %v202_v17 = vld [vmem:[#allocation2 + $0xf0] sm:$0xff] }
 0x656   :  { %1344 = vmatpush.msrb.mxu1 %v202_v17 }
 0x659   :  { %v1134_v24 = vpop.permute.xlu0 %1133  ;;  %v1025_v29 = vpop.f32.mrf.mxu0 }
 0x65a   :  { %v1144_v20 = vsel %vm1143_vm4, %v1141_v13, %v1134_v24 }
 0x65b   :  { %3022 = vmatmul.msk.f32.vlgmr.msra.gmra.mxu0 %vm240_vm3, %v1144_v20 }
 0x662   :  { %v1128_v60 = vpop.permute.xlu0 %1127 }
 0x663   :  { %v1142_v22 = vsel %vm137_vm2, %v1140_v19, %v1128_v60  ;;  %v201_v19 = vld [vmem:[#allocation2 + $0xd0] sm:$0xff] }
 0x664   :  { %v1145_v23 = vsel %vm1143_vm4, %v1142_v22, %v1136_v3  ;;  %1345 = vmatpush.msrb.mxu1 %v201_v19  ;;  %v200_v60 = vld [vmem:[#allocation2 + $0xb0] sm:$0xff] }
 0x665   :  { %3023 = vmatmul.msk.f32.gmra.mxu0 %vm240_vm3, %v1145_v23  ;;  %v199_v3 = vld [vmem:[#allocation2 + $0x90] sm:$0xff] }
 0x666   :  { %1346 = vmatpush.msrb.mxu1 %v200_v60  ;;  %v198_v22 = vld [vmem:[#allocation2 + $0x70] sm:$0xff]  ;;  %v216_v60 = vld [vmem:[%s4596_s3 + $0x28] sm:$0xff] }
 0x667   :  { %v197_v23 = vld [vmem:[#allocation2 + $0x50] sm:$0xff] }
 0x668   :  { %v1165_v32 = vpop.permute.xlu2 %1164  ;;  %1347 = vmatpush.msrb.mxu1 %v199_v3 }
 0x66a   :  { %1348 = vmatpush.msrb.mxu1 %v198_v22 }
 0x66c   :  { %1349 = vmatpush.msrb.mxu1 %v197_v23  ;;  %v215_v23 = vld [vmem:[%s4596_s3 + $0x20] sm:$0xff] }
 0x670   :  { %v1167_v33 = vpop.permute.xlu2 %1166 }
 0x677   :  { %v1157_v10 = vpop.permute.xlu0 %1156 }
 0x67c   :  { %v1149_v25 = vpop.permute.xlu1 %1148 }
 0x67d   :  { %v1170_v7 = vsel %vm47_vm0, %v1022_v26, %v1149_v25  ;;  %v196_v26 = vld [vmem:[#allocation2 + $0x30] sm:$0xff] }
 0x67e   :  { %v1172_v14 = vsel %vm137_vm2, %v1170_v7, %v1157_v10  ;;  %1350 = vmatpush.msrb.mxu1 %v196_v26  ;;  %v195_v10 = vld [vmem:[#allocation2 + $0x10] sm:$0xff] }
 0x67f   :  { %v1174_v28 = vsel %vm1143_vm4, %v1172_v14, %v1165_v32  ;;  %v1159_v31 = vpop.permute.xlu0 %1158 }
 0x680   :  { %3024 = vmatmul.msk.f32.gmra.mxu0 %vm240_vm3, %v1174_v28  ;;  %1351 = vmatpush.msrb.mxu1 %v195_v10 }
 0x684   :  { %v1151_v30 = vpop.permute.xlu1 %1150 }
 0x685   :  { %v1171_v11 = vsel %vm47_vm0, %v1025_v29, %v1151_v30 }
 0x686   :  { %v1173_v34 = vsel %vm137_vm2, %v1171_v11, %v1159_v31 }
 0x687   :  { %v1175_v27 = vsel %vm1143_vm4, %v1173_v34, %v1167_v33 }
 0x688   :  { %3025 = vmatmul.msk.f32.gmra.mxu0 %vm240_vm3, %v1175_v27 }
 0x6d8   :  { %v1205_v42 = vpop.f32.mrf.mxu0 }
 0x6d9   :  { %v1206_v35 = vadd.f32 %v1205_v42, %v228_v39  ;;  %v3869_v42 = vld [vmem:[%s4597_s4 + $0x2] ss:$0 sm:$0xff] }
 0x6db   :  { %v1217_v36 = vadd.f32 %v1206_v35, %v3503_v44 }
 0x6dd   :  { %v1221_v41 = vsel %vm240_vm3, %v1217_v36, 0.0 }
 0x6de   :  { %1222 = vadd.xlane.f32.xlu1 %v1221_v41 }
 0x6e2   :  { %v1208_v43 = vpop.f32.mrf.mxu0 }
 0x6e3   :  { %v1209_v37 = vadd.f32 %v1208_v43, %v228_v39 }
 0x6e5   :  { %v1218_v47 = vadd.f32 %v1209_v37, %v3509_v46  ;;  %v3271_v46 = vpop.eup %3270  ;;  %v3874_v37 = vld [vmem:[%s4597_s4 + $0x3] ss:$0 sm:$0xff] }
 0x6e6   :  { %v1234_v18 = vmul.f32 64.0, %v3271_v46  ;;  %vm1238_vm5 = vweird.f32 %v3271_v46 }
 0x6e7   :  { %v1224_v56 = vsel %vm240_vm3, %v1218_v47, 0.0 }
 0x6e8   :  { %1225 = vadd.xlane.f32.xlu0 %v1224_v56  ;;  %v1235_v16 = vsub.f32 1.0, %v1234_v18  ;;  %v226_v18 = vld [vmem:[%s4596_s3 + $0x78] sm:$0xff] }
 0x6e9   :  { %1369 = vmatpush.msrb.mxu2 %v226_v18 }
 0x6ea   :  { %v1236_v38 = vmul.f32 %v3271_v46, %v1235_v16  ;;  %v225_v16 = vld [vmem:[%s4596_s3 + $0x70] sm:$0xff] }
 0x6eb   :  { %1370 = vmatpush.msrb.mxu2 %v225_v16 }
 0x6ec   :  { %v1237_v51 = vadd.f32 %v3271_v46, %v1236_v38  ;;  %v224_v38 = vld [vmem:[%s4596_s3 + $0x68] sm:$0xff] }
 0x6ed   :  { %1371 = vmatpush.msrb.mxu2 %v224_v38 }
 0x6ee   :  { %v3842_v53 = vsel %vm1238_vm5, %v3271_v46, %v1237_v51 }
 0x6fd   :  { %v1211_v59 = vpop.f32.mrf.mxu0 }
 0x6fe   :  { %v1212_v62 = vadd.f32 %v1211_v59, %v228_v39 }
 0x700   :  { %v1219_v63 = vadd.f32 %v1212_v62, %v3515_v48 }
 0x702   :  { %v1227_v21 = vsel %vm240_vm3, %v1219_v63, 0.0 }
 0x703   :  { %1228 = vadd.xlane.f32.xlu2 %v1227_v21 }
 0x705   :  { %v1214_v40 = vpop.f32.mrf.mxu0 }
 0x706   :  { %v1215_v45 = vadd.f32 %v1214_v40, %v228_v39 }
 0x708   :  { %v1220_v44 = vadd.f32 %v1215_v45, %v3521_v50 }
 0x70a   :  { %v1230_v49 = vsel %vm240_vm3, %v1220_v44, 0.0 }
 0x70b   :  { %1231 = vadd.xlane.f32.xlu1 %v1230_v49 }
 0x751   :  { %v1223_v48 = vpop.xlane.xlu1 %1222 }
 0x752   :  { %v1240_v54 = vmul.f32 %v3842_v53, %v1223_v48 }
 0x754   :  { %v1244_v57 = vsub.f32 %v1217_v36, %v1240_v54  ;;  %v223_v54 = vld [vmem:[%s4596_s3 + $0x60] sm:$0xff] }
 0x755   :  { %1372 = vmatpush.msrb.mxu2 %v223_v54 }
 0x756   :  { %v1248_v55 = vmul.f32 %v1244_v57, %v1244_v57 }
 0x758   :  { %v1252_v50 = vsel %vm240_vm3, %v1248_v55, 0.0 }
 0x759   :  { %1253 = vadd.xlane.f32.xlu0 %v1252_v50  ;;  %v222_v50 = vld [vmem:[%s4596_s3 + $0x58] sm:$0xff] }
 0x75a   :  { %1373 = vmatpush.msrb.mxu2 %v222_v50 }
 0x75b   :  { %v1226_v58 = vpop.xlane.xlu0 %1225 }
 0x75c   :  { %v1241_v61 = vmul.f32 %v3842_v53, %v1226_v58 }
 0x75e   :  { %v3847_v0 = vsub.f32 %v1218_v47, %v1241_v61  ;;  %v221_v61 = vld [vmem:[%s4596_s3 + $0x50] sm:$0xff] }
 0x75f   :  { %1374 = vmatpush.msrb.mxu2 %v221_v61 }
 0x760   :  { %v1249_v1 = vmul.f32 %v3847_v0, %v3847_v0 }
 0x762   :  { %v1255_v2 = vsel %vm240_vm3, %v1249_v1, 0.0  ;;  %v220_v1 = vld [vmem:[%s4596_s3 + $0x48] sm:$0xff] }
 0x763   :  { %1256 = vadd.xlane.f32.xlu2 %v1255_v2  ;;  %1375 = vmatpush.msrb.mxu2 %v220_v1 }
 0x776   :  { %v1229_v4 = vpop.xlane.xlu2 %1228 }
 0x777   :  { %v1242_v5 = vmul.f32 %v3842_v53, %v1229_v4  ;;  %v219_v4 = vld [vmem:[%s4596_s3 + $0x40] sm:$0xff] }
 0x778   :  { %1376 = vmatpush.msrb.mxu2 %v219_v4 }
 0x779   :  { %v3853_v6 = vsub.f32 %v1219_v63, %v1242_v5 }
 0x77b   :  { %v1250_v8 = vmul.f32 %v3853_v6, %v3853_v6 }
 0x77d   :  { %v1258_v9 = vsel %vm240_vm3, %v1250_v8, 0.0 }
 0x77e   :  { %1259 = vadd.xlane.f32.xlu1 %v1258_v9  ;;  %v1232_v12 = vpop.xlane.xlu1 %1231  ;;  %v218_v9 = vld [vmem:[%s4596_s3 + $0x38] sm:$0xff] }
 0x77f   :  { %v1243_v24 = vmul.f32 %v3842_v53, %v1232_v12  ;;  %1377 = vmatpush.msrb.mxu2 %v218_v9 }
 0x781   :  { %v3859_v13 = vsub.f32 %v1220_v44, %v1243_v24 }
 0x783   :  { %v1251_v20 = vmul.f32 %v3859_v13, %v3859_v13 }
 0x785   :  { %v1261_v15 = vsel %vm240_vm3, %v1251_v20, 0.0  ;;  %v217_v20 = vld [vmem:[%s4596_s3 + $0x30] sm:$0xff] }
 0x786   :  { %1262 = vadd.xlane.f32.xlu0 %v1261_v15  ;;  %1378 = vmatpush.msrb.mxu2 %v217_v20 }
 0x788   :  { %1379 = vmatpush.msrb.mxu2 %v216_v60 }
 0x78a   :  { %1380 = vmatpush.msrb.mxu2 %v215_v23  ;;  %v1514_v23 = vld [vmem:[#allocation2 + $0x1e8] sm:$0xff] }
 0x78b   :  { %1611 = vmatpush.msrb.mxu0 %v1514_v23 }
 0x7cc   :  { %v1254_v32 = vpop.xlane.xlu0 %1253 }
 0x7cd   :  { %v1264_v25 = vmul.f32 %v1254_v32, %v3842_v53 }
 0x7cf   :  { %v1268_v7 = vadd.f32 1e-05, %v1264_v25 }
 0x7d1   :  { %3272 = vrsqrt.f32 %v1268_v7  ;;  %vm1278_vm7 = vweird.f32 %v1268_v7 }
 0x7d6   :  { %v1257_v14 = vpop.xlane.xlu2 %1256 }
 0x7d7   :  { %v3273_v28 = vpop.eup %3272  ;;  %v1265_v29 = vmul.f32 %v1257_v14, %v3842_v53 }
 0x7d8   :  { %v1273_v30 = vmul.f32 %v3273_v28, %v1268_v7  ;;  %vm1279_vm6 = vweird.f32 %v3273_v28 }
 0x7d9   :  { %v1269_v31 = vadd.f32 1e-05, %v1265_v29  ;;  %vm1280_vm8 = vmor %vm1278_vm7, %vm1279_vm6  ;;  %v213_v29 = vld [vmem:[%s4596_s3 + $0x10] sm:$0xff] }
 0x7da   :  { %v1274_v11 = vmul.f32 %v3273_v28, %v1273_v30  ;;  %v212_v30 = vld [vmem:[%s4596_s3 + $0x8] sm:$0xff] }
 0x7db   :  { %3274 = vrsqrt.f32 %v1269_v31  ;;  %vm1288_vm10 = vweird.f32 %v1269_v31 }
 0x7dc   :  { %v1275_v33 = vmul.f32 0.5, %v1274_v11 }
 0x7de   :  { %v1276_v34 = vsub.f32 1.5, %v1275_v33 }
 0x7e0   :  { %v1277_v27 = vmul.f32 %v3273_v28, %v1276_v34 }
 0x7e1   :  { %v3275_v39 = vpop.eup %3274 }
 0x7e2   :  { %v1281_v35 = vsel %vm1280_vm8, %v3273_v28, %v1277_v27  ;;  %v1283_v36 = vmul.f32 %v3275_v39, %v1269_v31  ;;  %vm1289_vm9 = vweird.f32 %v3275_v39  ;;  %v211_v31 = vld [vmem:[%s4596_s3] sm:$0xff] }
 0x7e3   :  { %v1312_v41 = vmul.f32 %v1281_v35, %v1244_v57  ;;  %vm1290_vm11 = vmor %vm1288_vm10, %vm1289_vm9 }
 0x7e4   :  { %v1284_v43 = vmul.f32 %v3275_v39, %v1283_v36 }
 0x7e5   :  { %v1316_v47 = vmul.f32 %v1312_v41, %v3869_v42 }
 0x7e6   :  { %v1285_v56 = vmul.f32 0.5, %v1284_v43 }
 0x7e7   :  { %v3878_v59 = vadd.f32 %v1316_v47, %v3874_v37 }
 0x7e8   :  { %v1286_v62 = vsub.f32 1.5, %v1285_v56  ;;  %v232_v56 = vld [vmem:[%s4597_s4 + $0x5] ss:$0 sm:$0xff] }
 0x7e9   :  { %3026 = vmatmul.msk.f32.vlgmr.msrb.gmra.mxu1 %vm240_vm3, %v3878_v59 }
 0x7ea   :  { %v1287_v63 = vmul.f32 %v3275_v39, %v1286_v62 }
 0x7ec   :  { %v1291_v21 = vsel %vm1290_vm11, %v3275_v39, %v1287_v63 }
 0x7ed   :  { %v1313_v40 = vmul.f32 %v1291_v21, %v3847_v0 }
 0x7ef   :  { %v1317_v45 = vmul.f32 %v1313_v40, %v3869_v42 }
 0x7f1   :  { %v1260_v44 = vpop.xlane.xlu1 %1259  ;;  %v3885_v49 = vadd.f32 %v1317_v45, %v3874_v37 }
 0x7f2   :  { %v1266_v52 = vmul.f32 %v1260_v44, %v3842_v53 }
 0x7f3   :  { %3027 = vmatmul.msk.f32.gmra.mxu1 %vm240_vm3, %v3885_v49 }
 0x7f4   :  { %v1270_v46 = vadd.f32 1e-05, %v1266_v52 }
 0x7f6   :  { %3276 = vrsqrt.f32 %v1270_v46  ;;  %vm1298_vm13 = vweird.f32 %v1270_v46 }
 0x7f9   :  { %v1263_v51 = vpop.xlane.xlu0 %1262 }
 0x7fa   :  { %v1267_v48 = vmul.f32 %v1263_v51, %v3842_v53 }
 0x7fc   :  { %v3277_v57 = vpop.eup %3276  ;;  %v1271_v55 = vadd.f32 1e-05, %v1267_v48 }
 0x7fd   :  { %v1293_v58 = vmul.f32 %v3277_v57, %v1270_v46  ;;  %vm1299_vm12 = vweird.f32 %v3277_v57 }
 0x7fe   :  { %3278 = vrsqrt.f32 %v1271_v55  ;;  %vm1300_vm14 = vmor %vm1298_vm13, %vm1299_vm12  ;;  %vm1308_vm1 = vweird.f32 %v1271_v55 }
 0x7ff   :  { %v1294_v0 = vmul.f32 %v3277_v57, %v1293_v58 }
 0x801   :  { %v1295_v2 = vmul.f32 0.5, %v1294_v0 }
 0x803   :  { %v1296_v5 = vsub.f32 1.5, %v1295_v2 }
 0x804   :  { %v3279_v8 = vpop.eup %3278 }
 0x805   :  { %v1297_v12 = vmul.f32 %v3277_v57, %v1296_v5  ;;  %v1303_v24 = vmul.f32 %v3279_v8, %v1271_v55  ;;  %vm1309_vm15 = vweird.f32 %v3279_v8 }
 0x806   :  { %vm1310_vm5 = vmor %vm1308_vm1, %vm1309_vm15 }
 0x807   :  { %v1301_v15 = vsel %vm1300_vm14, %v3277_v57, %v1297_v12  ;;  %v1304_v17 = vmul.f32 %v3279_v8, %v1303_v24 }
 0x808   :  { %v1314_v19 = vmul.f32 %v1301_v15, %v3853_v6  ;;  %v214_v6 = vld [vmem:[%s4596_s3 + $0x18] sm:$0xff] }
 0x809   :  { %v1305_v3 = vmul.f32 0.5, %v1304_v17  ;;  %1381 = vmatpush.msrb.mxu2 %v214_v6  ;;  %v1509_v6 = vld [vmem:[#allocation2 + $0x1a0] sm:$0xff] }
 0x80a   :  { %v1318_v22 = vmul.f32 %v1314_v19, %v3869_v42 }
 0x80b   :  { %v1306_v26 = vsub.f32 1.5, %v1305_v3  ;;  %1382 = vmatpush.msrb.mxu2 %v213_v29  ;;  %v1503_v29 = vld [vmem:[#allocation2 + $0x140] sm:$0xff] }
 0x80c   :  { %v1322_v10 = vadd.f32 %v1318_v22, %v3874_v37  ;;  %v1513_v22 = vld [vmem:[#allocation2 + $0x1e0] sm:$0xff] }
 0x80d   :  { %v1307_v32 = vmul.f32 %v3279_v8, %v1306_v26  ;;  %1383 = vmatpush.msrb.mxu2 %v212_v30  ;;  %1582 = vmatpush.msrb.mxu3 %v1513_v22  ;;  %v1511_v26 = vld [vmem:[#allocation2 + $0x1c0] sm:$0xff]  ;;  %v1504_v30 = vld [vmem:[#allocation2 + $0x148] sm:$0xff] }
 0x80e   :  { %3028 = vmatmul.msk.f32.gmra.mxu1 %vm240_vm3, %v1322_v10 }
 0x80f   :  { %v1311_v25 = vsel %vm1310_vm5, %v3279_v8, %v1307_v32  ;;  %1384 = vmatpush.msrb.mxu2 %v211_v31  ;;  %1583 = vmatpush.msrb.mxu3 %v1511_v26  ;;  %v1510_v32 = vld [vmem:[#allocation2 + $0x1a8] sm:$0xff]  ;;  %v1501_v31 = vld [vmem:[#allocation2 + $0x120] sm:$0xff] }
 0x810   :  { %v1315_v7 = vmul.f32 %v1311_v25, %v3859_v13  ;;  %v231_v13 = vld [vmem:[%s4597_s4 + $0x4] ss:$0 sm:$0xff] }
 0x811   :  { %1584 = vmatpush.msrb.mxu3 %v1509_v6  ;;  %v1507_v25 = vld [vmem:[#allocation2 + $0x180] sm:$0xff] }
 0x812   :  { %v1319_v14 = vmul.f32 %v1315_v7, %v3869_v42  ;;  %v1508_v7 = vld [vmem:[#allocation2 + $0x188] sm:$0xff] }
 0x813   :  { %1585 = vmatpush.msrb.mxu3 %v1507_v25 }
 0x814   :  { %v1323_v28 = vadd.f32 %v1319_v14, %v3874_v37  ;;  %v1505_v14 = vld [vmem:[#allocation2 + $0x160] sm:$0xff] }
 0x815   :  { %1586 = vmatpush.msrb.mxu3 %v1505_v14  ;;  %v3046_v14 = vld [vmem:[%s4597_s4 + $0x10] ss:$8 sm:$0x3] }
 0x816   :  { %3029 = vmatmul.msk.f32.gmra.mxu1 %vm240_vm3, %v1323_v28 }
 0x817   :  { %1587 = vmatpush.msrb.mxu3 %v1503_v29 }
 0x819   :  { %1588 = vmatpush.msrb.mxu3 %v1501_v31 }
 0x866   :  { %v1353_v11 = vpop.f32.mrf.mxu1 }
 0x867   :  { %v1354_v33 = vadd.f32 %v1353_v11, %v231_v13  ;;  %v1499_v11 = vld [vmem:[#allocation2 + $0x100] sm:$0xff] }
 0x868   :  { %1589 = vmatpush.msrb.mxu3 %v1499_v11 }
 0x869   :  { %v1365_v34 = vmax.f32 %v1354_v33, 0.0  ;;  %v1500_v33 = vld [vmem:[#allocation2 + $0x108] sm:$0xff] }
 0x86b   :  { %1385 = vmatmul.f32.vlgmr.msrb.gmra.mxu2 %v1365_v34 }
 0x870   :  { %v1356_v27 = vpop.f32.mrf.mxu1 }
 0x871   :  { %v1357_v39 = vadd.f32 %v1356_v27, %v231_v13 }
 0x873   :  { %v1366_v42 = vmax.f32 %v1357_v39, 0.0 }
 0x875   :  { %1388 = vmatmul.f32.gmra.mxu2 %v1366_v42 }
 0x88b   :  { %v1359_v35 = vpop.f32.mrf.mxu1 }
 0x88c   :  { %v1360_v36 = vadd.f32 %v1359_v35, %v231_v13 }
 0x88e   :  { %v1367_v41 = vmax.f32 %v1360_v36, 0.0 }
 0x890   :  { %1391 = vmatmul.f32.gmra.mxu2 %v1367_v41 }
 0x893   :  { %v1362_v43 = vpop.f32.mrf.mxu1 }
 0x894   :  { %v1363_v37 = vadd.f32 %v1362_v43, %v231_v13  ;;  %v1502_v13 = vld [vmem:[#allocation2 + $0x128] sm:$0xff] }
 0x896   :  { %v1368_v47 = vmax.f32 %v1363_v37, 0.0 }
 0x898   :  { %1394 = vmatmul.f32.gmra.mxu2 %v1368_v47 }
 0x8ee   :  { %v1386_v62 = vpop.f32.mrf.mxu2 }
 0x8ef   :  { %v1387_v63 = vadd.f32 %v1386_v62, %v232_v56 }
 0x8f1   :  { %v1398_v21 = vadd.f32 %v1387_v63, %v3878_v59 }
 0x8f3   :  { %v1402_v40 = vsel %vm240_vm3, %v1398_v21, 0.0 }
 0x8f4   :  { %1403 = vadd.xlane.f32.xlu2 %v1402_v40 }
 0x8f8   :  { %v1389_v45 = vpop.f32.mrf.mxu2 }
 0x8f9   :  { %v1390_v44 = vadd.f32 %v1389_v45, %v232_v56 }
 0x8fb   :  { %v1399_v52 = vadd.f32 %v1390_v44, %v3885_v49 }
 0x8fd   :  { %v1405_v46 = vsel %vm240_vm3, %v1399_v52, 0.0 }
 0x8fe   :  { %1406 = vadd.xlane.f32.xlu1 %v1405_v46  ;;  %v234_v46 = vld [vmem:[%s4597_s4 + $0x7] ss:$0 sm:$0xff] }
 0x913   :  { %v1392_v18 = vpop.f32.mrf.mxu2 }
 0x914   :  { %v1393_v16 = vadd.f32 %v1392_v18, %v232_v56 }
 0x916   :  { %v1400_v38 = vadd.f32 %v1393_v16, %v1322_v10  ;;  %v1512_v10 = vld [vmem:[#allocation2 + $0x1c8] sm:$0xff] }
 0x917   :  { %1612 = vmatpush.msrb.mxu0 %v1512_v10 }
 0x918   :  { %v1408_v51 = vsel %vm240_vm3, %v1400_v38, 0.0 }
 0x919   :  { %1409 = vadd.xlane.f32.xlu0 %v1408_v51  ;;  %1613 = vmatpush.msrb.mxu0 %v1510_v32 }
 0x91b   :  { %v1395_v48 = vpop.f32.mrf.mxu2  ;;  %1614 = vmatpush.msrb.mxu0 %v1508_v7 }
 0x91c   :  { %v1396_v54 = vadd.f32 %v1395_v48, %v232_v56 }
 0x91e   :  { %v1401_v57 = vadd.f32 %v1396_v54, %v1323_v28  ;;  %v1506_v28 = vld [vmem:[#allocation2 + $0x168] sm:$0xff] }
 0x91f   :  { %1615 = vmatpush.msrb.mxu0 %v1506_v28  ;;  %v1558_v28 = vperm.slane %v3046_v14, 0 }
 0x920   :  { %v1411_v59 = vsel %vm240_vm3, %v1401_v57, 0.0 }
 0x921   :  { %1412 = vadd.xlane.f32.xlu2 %v1411_v59  ;;  %1616 = vmatpush.msrb.mxu0 %v1504_v30 }
 0x923   :  { %1617 = vmatpush.msrb.mxu0 %v1502_v13 }
 0x925   :  { %1618 = vmatpush.msrb.mxu0 %v1500_v33 }
 0x967   :  { %v1404_v55 = vpop.xlane.xlu2 %1403 }
 0x968   :  { %v1414_v50 = vmul.f32 %v1404_v55, %v3842_v53 }
 0x96a   :  { %v3960_v58 = vsub.f32 %v1398_v21, %v1414_v50  ;;  %v233_v21 = vld [vmem:[%s4597_s4 + $0x6] ss:$0 sm:$0xff] }
 0x96c   :  { %v1422_v49 = vmul.f32 %v3960_v58, %v3960_v58 }
 0x96e   :  { %v1426_v61 = vsel %vm240_vm3, %v1422_v49, 0.0 }
 0x96f   :  { %1427 = vadd.xlane.f32.xlu1 %v1426_v61 }
 0x971   :  { %v1407_v0 = vpop.xlane.xlu1 %1406 }
 0x972   :  { %v1415_v1 = vmul.f32 %v1407_v0, %v3842_v53 }
 0x974   :  { %v3966_v2 = vsub.f32 %v1399_v52, %v1415_v1 }
 0x976   :  { %v1423_v4 = vmul.f32 %v3966_v2, %v3966_v2 }
 0x978   :  { %v1429_v5 = vsel %vm240_vm3, %v1423_v4, 0.0 }
 0x979   :  { %1430 = vadd.xlane.f32.xlu0 %v1429_v5 }
 0x98c   :  { %v1410_v8 = vpop.xlane.xlu0 %1409 }
 0x98d   :  { %v1416_v9 = vmul.f32 %v1410_v8, %v3842_v53 }
 0x98f   :  { %v3972_v12 = vsub.f32 %v1400_v38, %v1416_v9 }
 0x991   :  { %v1424_v24 = vmul.f32 %v3972_v12, %v3972_v12 }
 0x993   :  { %v1432_v20 = vsel %vm240_vm3, %v1424_v24, 0.0 }
 0x994   :  { %v1413_v15 = vpop.xlane.xlu2 %1412  ;;  %1433 = vadd.xlane.f32.xlu2 %v1432_v20 }
 0x995   :  { %v1417_v17 = vmul.f32 %v1413_v15, %v3842_v53 }
 0x997   :  { %v3978_v19 = vsub.f32 %v1401_v57, %v1417_v17 }
 0x999   :  { %v1425_v60 = vmul.f32 %v3978_v19, %v3978_v19 }
 0x99b   :  { %v1435_v3 = vsel %vm240_vm3, %v1425_v60, 0.0 }
 0x99c   :  { %1436 = vadd.xlane.f32.xlu1 %v1435_v3 }
 0x9e2   :  { %v1428_v34 = vpop.xlane.xlu1 %1427 }
 0x9e3   :  { %v1438_v27 = vmul.f32 %v1428_v34, %v3842_v53 }
 0x9e5   :  { %v1442_v39 = vadd.f32 1e-05, %v1438_v27 }
 0x9e7   :  { %3280 = vrsqrt.f32 %v1442_v39  ;;  %vm1452_vm7 = vweird.f32 %v1442_v39 }
 0x9ec   :  { %v1431_v42 = vpop.xlane.xlu0 %1430 }
 0x9ed   :  { %v3281_v35 = vpop.eup %3280  ;;  %v1439_v36 = vmul.f32 %v1431_v42, %v3842_v53 }
 0x9ee   :  { %v1447_v41 = vmul.f32 %v3281_v35, %v1442_v39  ;;  %vm1453_vm6 = vweird.f32 %v3281_v35 }
 0x9ef   :  { %v1443_v43 = vadd.f32 1e-05, %v1439_v36  ;;  %vm1454_vm8 = vmor %vm1452_vm7, %vm1453_vm6 }
 0x9f0   :  { %v1448_v37 = vmul.f32 %v3281_v35, %v1447_v41 }
 0x9f1   :  { %3282 = vrsqrt.f32 %v1443_v43  ;;  %vm1462_vm10 = vweird.f32 %v1443_v43 }
 0x9f2   :  { %v1449_v47 = vmul.f32 0.5, %v1448_v37 }
 0x9f4   :  { %v1450_v56 = vsub.f32 1.5, %v1449_v47 }
 0x9f6   :  { %v1451_v62 = vmul.f32 %v3281_v35, %v1450_v56 }
 0x9f7   :  { %v3283_v63 = vpop.eup %3282 }
 0x9f8   :  { %v1455_v40 = vsel %vm1454_vm8, %v3281_v35, %v1451_v62  ;;  %v1457_v45 = vmul.f32 %v3283_v63, %v1443_v43  ;;  %vm1463_vm9 = vweird.f32 %v3283_v63  ;;  %v4062_v62 = vperm.slane %v3046_v14, 1 }
 0x9f9   :  { %v1486_v44 = vmul.f32 %v1455_v40, %v3960_v58  ;;  %vm1464_vm11 = vmor %vm1462_vm10, %vm1463_vm9 }
 0x9fa   :  { %v1458_v52 = vmul.f32 %v3283_v63, %v1457_v45 }
 0x9fb   :  { %v1490_v18 = vmul.f32 %v1486_v44, %v233_v21 }
 0x9fc   :  { %v1459_v16 = vmul.f32 0.5, %v1458_v52 }
 0x9fd   :  { %v3992_v38 = vadd.f32 %v1490_v18, %v234_v46 }
 0x9fe   :  { %v1460_v51 = vsub.f32 1.5, %v1459_v16 }
 0x9ff   :  { %3054 = vmatmul.msk.f32.vlgmr.msrb.gmra.mxu3 %vm240_vm3, %v3992_v38  ;;  %3058 = vmatmul.msk.f32.vlgmr.msrb.gmra.mxu0 %vm240_vm3, %v3992_v38 }
 0xa00   :  { %v1461_v48 = vmul.f32 %v3283_v63, %v1460_v51 }
 0xa02   :  { %v1465_v54 = vsel %vm1464_vm11, %v3283_v63, %v1461_v48 }
 0xa03   :  { %v1487_v57 = vmul.f32 %v1465_v54, %v3966_v2 }
 0xa05   :  { %v1491_v59 = vmul.f32 %v1487_v57, %v233_v21 }
 0xa07   :  { %v1434_v55 = vpop.xlane.xlu2 %1433  ;;  %v3999_v50 = vadd.f32 %v1491_v59, %v234_v46 }
 0xa08   :  { %v1440_v58 = vmul.f32 %v1434_v55, %v3842_v53 }
 0xa09   :  { %3055 = vmatmul.msk.f32.gmra.mxu3 %vm240_vm3, %v3999_v50  ;;  %3059 = vmatmul.msk.f32.gmra.mxu0 %vm240_vm3, %v3999_v50 }
 0xa0a   :  { %v1444_v49 = vadd.f32 1e-05, %v1440_v58 }
 0xa0c   :  { %3284 = vrsqrt.f32 %v1444_v49  ;;  %vm1472_vm13 = vweird.f32 %v1444_v49 }
 0xa0f   :  { %v1437_v61 = vpop.xlane.xlu1 %1436 }
 0xa10   :  { %v1441_v0 = vmul.f32 %v1437_v61, %v3842_v53 }
 0xa12   :  { %v3285_v1 = vpop.eup %3284  ;;  %v1445_v4 = vadd.f32 1e-05, %v1441_v0 }
 0xa13   :  { %v1467_v2 = vmul.f32 %v3285_v1, %v1444_v49  ;;  %vm1473_vm12 = vweird.f32 %v3285_v1 }
 0xa14   :  { %3286 = vrsqrt.f32 %v1445_v4  ;;  %vm1474_vm14 = vmor %vm1472_vm13, %vm1473_vm12  ;;  %vm1482_vm1 = vweird.f32 %v1445_v4 }
 0xa15   :  { %v1468_v5 = vmul.f32 %v3285_v1, %v1467_v2 }
 0xa17   :  { %v1469_v8 = vmul.f32 0.5, %v1468_v5 }
 0xa19   :  { %v1470_v9 = vsub.f32 1.5, %v1469_v8 }
 0xa1a   :  { %v3287_v24 = vpop.eup %3286 }
 0xa1b   :  { %v1471_v20 = vmul.f32 %v3285_v1, %v1470_v9  ;;  %v1477_v15 = vmul.f32 %v3287_v24, %v1445_v4  ;;  %vm1483_vm15 = vweird.f32 %v3287_v24 }
 0xa1c   :  { %vm1484_vm5 = vmor %vm1482_vm1, %vm1483_vm15 }
 0xa1d   :  { %v1475_v17 = vsel %vm1474_vm14, %v3285_v1, %v1471_v20  ;;  %v1478_v60 = vmul.f32 %v3287_v24, %v1477_v15 }
 0xa1e   :  { %v1488_v3 = vmul.f32 %v1475_v17, %v3972_v12 }
 0xa1f   :  { %v1479_v22 = vmul.f32 0.5, %v1478_v60 }
 0xa20   :  { %v1492_v23 = vmul.f32 %v1488_v3, %v233_v21 }
 0xa21   :  { %v1480_v26 = vsub.f32 1.5, %v1479_v22 }
 0xa22   :  { %v4008_v10 = vadd.f32 %v1492_v23, %v234_v46 }
 0xa23   :  { %v1481_v6 = vmul.f32 %v3287_v24, %v1480_v26 }
 0xa24   :  { %3056 = vmatmul.msk.f32.gmra.mxu3 %vm240_vm3, %v4008_v10  ;;  %3060 = vmatmul.msk.f32.gmra.mxu0 %vm240_vm3, %v4008_v10 }
 0xa25   :  { %v1485_v32 = vsel %vm1484_vm5, %v3287_v24, %v1481_v6 }
 0xa26   :  { %v1489_v25 = vmul.f32 %v1485_v32, %v3978_v19 }
 0xa28   :  { %v1493_v7 = vmul.f32 %v1489_v25, %v233_v21 }
 0xa2a   :  { %v4015_v12 = vadd.f32 %v1493_v7, %v234_v46 }
 0xa2c   :  { %3057 = vmatmul.msk.f32.gmra.mxu3 %vm240_vm3, %v4015_v12  ;;  %3061 = vmatmul.msk.f32.gmra.mxu0 %vm240_vm3, %v4015_v12 }
 0xa7c   :  { %v1620_v43 = vpop.f32.mrf.mxu0 }
 0xa7d   :  { %v4070_v21 = vadd.f32 %v1620_v43, %v4062_v62 }
 0xa82   :  { %v1591_v29 = vpop.f32.mrf.mxu3 }
 0xa83   :  { %v1592_v30 = vadd.f32 %v1591_v29, %v1558_v28 }
 0xa85   :  { %1642 = vrot.lane.b32.xlu1 %v1592_v30, %s3425_s24 }
 0xa86   :  { %v1623_v56 = vpop.f32.mrf.mxu0 }
 0xa87   :  { %v4067_v63 = vadd.f32 %v1623_v56, %v4062_v62 }
 0xa89   :  { %v3173_v40 = vpack.i.bf16 %v4070_v21, %v4067_v63 }
 0xa8c   :  { %v1594_v31 = vpop.f32.mrf.mxu3 }
 0xa8d   :  { %v1595_v19 = vadd.f32 %v1594_v31, %v1558_v28 }
 0xa8f   :  { %1636 = vrot.lane.b32.xlu2 %v1595_v19, %s3426_s25  ;;  %1644 = vrot.lane.b32.xlu0 %v1595_v19, %s3425_s24 }
 0xa97   :  { %1640 = vrot.lane.b32.xlu2 %v1595_v19, %s3424_s23  ;;  %1634 = vrot.lane.b32.xlu0 %v1592_v30, %s3426_s25 }
 0xa9f   :  { %1638 = vrot.lane.b32.xlu0 %v1592_v30, %s3424_s23 }
 0xaa1   :  { %v1626_v20 = vpop.f32.mrf.mxu0 }
 0xaa2   :  { %v4127_v6 = vadd.f32 %v1626_v20, %v4062_v62 }
 0xaa7   :  { %v1597_v13 = vpop.f32.mrf.mxu3 }
 0xaa8   :  { %v4030_v11 = vadd.f32 %v1597_v13, %v1558_v28 }
 0xaa9   :  { %v1629_v3 = vpop.f32.mrf.mxu0 }
 0xaaa   :  { %1656 = vrot.lane.b32.xlu2 %v4030_v11, %s3425_s24  ;;  %v4119_v22 = vadd.f32 %v1629_v3, %v4062_v62 }
 0xaaf   :  { %v1600_v33 = vpop.f32.mrf.mxu3 }
 0xab0   :  { %v4034_v34 = vadd.f32 %v1600_v33, %v1558_v28 }
 0xab2   :  { %1648 = vrot.lane.b32.xlu2 %v4030_v11, %s3426_s25  ;;  %1650 = vrot.lane.b32.xlu0 %v4034_v34, %s3426_s25 }
 0xab3   :  { %1658 = vrot.lane.b32.xlu1 %v4034_v34, %s3425_s24 }
 0xaba   :  { %1700 = vrot.lane.b32.xlu2 %v1592_v30, %s3427_s26  ;;  %1652 = vrot.lane.b32.xlu0 %v4030_v11, %s3424_s23 }
 0xabb   :  { %1654 = vrot.lane.b32.xlu1 %v4034_v34, %s3424_s23 }
 0xac3   :  { %1702 = vrot.lane.b32.xlu1 %v1595_v19, %s3427_s26 }
 0xae9   :  { %v4048_v27 = vpop.permute.xlu2 %1636 }
 0xaea   :  { %1737 = vrot.lane.b32.xlu1 %v4048_v27, %s3427_s26 }
 0xaf1   :  { %v1641_v39 = vpop.permute.xlu2 %1640 }
 0xaf2   :  { %1772 = vrot.lane.b32.xlu1 %v1641_v39, %s3427_s26 }
 0xaf7   :  { %v1643_v42 = vpop.permute.xlu1 %1642 }
 0xaf8   :  { %1805 = vrot.lane.b32.xlu2 %v1643_v42, %s3427_s26 }
 0xb01   :  { %v1645_v35 = vpop.permute.xlu0 %1644 }
 0xb02   :  { %1807 = vrot.lane.b32.xlu0 %v1645_v35, %s3427_s26 }
 0xb04   :  { %v4055_v36 = vpop.permute.xlu2 %1656 }
 0xb05   :  { %1945 = vrot.lane.b32.xlu1 %v4055_v36, %s3427_s26 }
 0xb09   :  { %v1635_v41 = vpop.permute.xlu0 %1634 }
 0xb0a   :  { %1735 = vrot.lane.b32.xlu0 %v1635_v41, %s3427_s26 }
 0xb0c   :  { %v1649_v37 = vpop.permute.xlu2 %1648 }
 0xb0d   :  { %1875 = vrot.lane.b32.xlu1 %v1649_v37, %s3427_s26 }
 0xb11   :  { %v1639_v47 = vpop.permute.xlu0 %1638 }
 0xb12   :  { %1770 = vrot.lane.b32.xlu2 %v1639_v47, %s3427_s26 }
 0xb14   :  { %v1701_v16 = vpop.permute.xlu2 %1700 }
 0xb15   :  { %1840 = vrot.lane.b32.xlu1 %v4030_v11, %s3427_s26 }
 0xb1d   :  { %3174 = vrot.lane.b32.xlu1 %v3173_v40, %s3425_s24 }
 0xb24   :  { %v1651_v45 = vpop.permute.xlu0 %1650 }
 0xb25   :  { %v1659_v44 = vpop.permute.xlu1 %1658  ;;  %1877 = vrot.lane.b32.xlu2 %v1651_v45, %s3427_s26 }
 0xb26   :  { %1947 = vrot.lane.b32.xlu0 %v1659_v44, %s3427_s26 }
 0xb2c   :  { %v1653_v52 = vpop.permute.xlu0 %1652 }
 0xb2d   :  { %v4077_v46 = vpop.permute.xlu1 %1654  ;;  %1910 = vrot.lane.b32.xlu2 %v1653_v52, %s3427_s26 }
 0xb2e   :  { %1912 = vrot.lane.b32.xlu0 %v4077_v46, %s3427_s26 }
 0xb35   :  { %v1703_v18 = vpop.permute.xlu1 %1702  ;;  %3184 = vrot.lane.b32.xlu2 %v3173_v40, %s3424_s23 }
 0xb36   :  { %1842 = vrot.lane.b32.xlu0 %v4034_v34, %s3427_s26  ;;  %3062 = vmatpush.xpose.msk.msra.mxu1 %vm47_vm0, %v1703_v18 }
 0xb3a   :  { %3063 = vmatpush.xpose.msk.msra.mxu1 %vm47_vm0, %v1701_v16 }
 0xb3d   :  { %3064 = vmatmul.msk.f32.vlgmr.msra.gmra.mxu1 %vm47_vm0, %v1592_v30 }
 0xb3e   :  { %3179 = vrot.lane.b32.xlu0 %v3173_v40, %s3426_s25 }
 0xb45   :  { %3065 = vmatmul.msk.f32.gmra.mxu1 %vm47_vm0, %v1595_v19 }
 0xb52   :  { %v1806_v48 = vpop.permute.xlu2 %1805 }
 0xb5c   :  { %v1738_v51 = vpop.permute.xlu1 %1737 }
 0xb5d   :  { %3066 = vmatpush.xpose.msk.msra.mxu3 %vm47_vm0, %v1738_v51 }
 0xb64   :  { %v1773_v54 = vpop.permute.xlu1 %1772 }
 0xb65   :  { %3070 = vmatpush.xpose.msk.msrb.mxu1 %vm47_vm0, %v1773_v54 }
 0xb6c   :  { %v1771_v57 = vpop.permute.xlu2 %1770 }
 0xb6d   :  { %3071 = vmatpush.xpose.msk.msrb.mxu1 %vm47_vm0, %v1771_v57 }
 0xb70   :  { %3072 = vmatmul.msk.f32.vlgmr.msrb.gmra.mxu1 %vm47_vm0, %v1639_v47 }
 0xb74   :  { %v1808_v59 = vpop.permute.xlu0 %1807 }
 0xb75   :  { %3074 = vmatpush.xpose.msk.msra.mxu2 %vm47_vm0, %v1808_v59 }
 0xb77   :  { %v1946_v55 = vpop.permute.xlu1 %1945 }
 0xb78   :  { %3073 = vmatmul.msk.f32.gmra.mxu1 %vm47_vm0, %v1641_v39 }
 0xb79   :  { %3075 = vmatpush.xpose.msk.msra.mxu2 %vm47_vm0, %v1806_v48 }
 0xb7c   :  { %v1736_v58 = vpop.permute.xlu0 %1735  ;;  %3076 = vmatmul.msk.f32.vlgmr.msra.gmra.mxu2 %vm47_vm0, %v1643_v42 }
 0xb7d   :  { %3067 = vmatpush.xpose.msk.msra.mxu3 %vm47_vm0, %v1736_v58 }
 0xb7f   :  { %v1878_v49 = vpop.permute.xlu2 %1877  ;;  %v1876_v61 = vpop.permute.xlu1 %1875 }
 0xb80   :  { %3068 = vmatmul.msk.f32.vlgmr.msra.gmra.mxu3 %vm47_vm0, %v1635_v41  ;;  %3082 = vmatpush.xpose.msk.msra.mxu0 %vm47_vm0, %v1878_v49 }
 0xb84   :  { %3077 = vmatmul.msk.f32.gmra.mxu2 %vm47_vm0, %v1645_v35  ;;  %3083 = vmatpush.xpose.msk.msra.mxu0 %vm47_vm0, %v1876_v61 }
 0xb87   :  { %3084 = vmatmul.msk.f32.vlgmr.msra.gmra.mxu0 %vm47_vm0, %v1649_v37  ;;  %v1841_v0 = vpop.permute.xlu1 %1840  ;;  %v1911_v1 = vpop.permute.xlu2 %1910 }
 0xb88   :  { %3069 = vmatmul.msk.f32.gmra.mxu3 %vm47_vm0, %v4048_v27 }
 0xb8f   :  { %3085 = vmatmul.msk.f32.gmra.mxu0 %vm47_vm0, %v1651_v45  ;;  %v3175_v2 = vpop.permute.xlu1 %3174  ;;  %v3185_v24 = vpop.permute.xlu2 %3184 }
 0xb90   :  { %v3176_v5 = vunpack.i.l.bf16 %v3175_v2  ;;  %v3177_v8 = vunpack.i.h.bf16 %v3175_v2  ;;  %v3186_v15 = vunpack.i.l.bf16 %v3185_v24  ;;  %v3187_v17 = vunpack.i.h.bf16 %v3185_v24 }
 0xb98   :  { %v1948_v4 = vpop.permute.xlu0 %1947 }
 0xb99   :  { %3090 = vmatpush.xpose.msk.msrb.mxu2 %vm47_vm0, %v1948_v4 }
 0xb9d   :  { %3091 = vmatpush.xpose.msk.msrb.mxu2 %vm47_vm0, %v1946_v55 }
 0xba0   :  { %v1913_v9 = vpop.permute.xlu0 %1912  ;;  %3092 = vmatmul.msk.f32.vlgmr.msrb.gmra.mxu2 %vm47_vm0, %v4055_v36 }
 0xba1   :  { %2311 = vmatpush.msra.mxu2 %v3176_v5  ;;  %3086 = vmatpush.xpose.msk.msra.mxu1 %vm47_vm0, %v1913_v9 }
 0xba3   :  { %2312 = vmatpush.msra.mxu2 %v3177_v8 }
 0xba5   :  { %3087 = vmatpush.xpose.msk.msra.mxu1 %vm47_vm0, %v1911_v1 }
 0xba8   :  { %v1843_v60 = vpop.permute.xlu0 %1842  ;;  %3088 = vmatmul.msk.f32.vlgmr.msra.gmra.mxu1 %vm47_vm0, %v1653_v52  ;;  %3093 = vmatmul.msk.f32.gmra.mxu2 %vm47_vm0, %v1659_v44 }
 0xba9   :  { %2282 = vmatpush.msrb.mxu1 %v3186_v15  ;;  %3078 = vmatpush.xpose.msk.msrb.mxu3 %vm47_vm0, %v1843_v60 }
 0xbab   :  { %2283 = vmatpush.msrb.mxu1 %v3187_v17 }
 0xbad   :  { %3079 = vmatpush.xpose.msk.msrb.mxu3 %vm47_vm0, %v1841_v0 }
 0xbb0   :  { %v3180_v23 = vpop.permute.xlu0 %3179  ;;  %3080 = vmatmul.msk.f32.vlgmr.msrb.gmra.mxu3 %vm47_vm0, %v4030_v11  ;;  %3089 = vmatmul.msk.f32.gmra.mxu1 %vm47_vm0, %v4077_v46 }
 0xbb1   :  { %2224 = vmatpush.msra.mxu3 %v4067_v63  ;;  %v3181_v26 = vunpack.i.l.bf16 %v3180_v23  ;;  %v3182_v32 = vunpack.i.h.bf16 %v3180_v23 }
 0xbb3   :  { %2225 = vmatpush.msra.mxu3 %v4070_v21  ;;  %2253 = vmatpush.msrb.mxu0 %v3181_v26 }
 0xbb5   :  { %2340 = vmatpush.msrb.mxu3 %v4119_v22  ;;  %2254 = vmatpush.msrb.mxu0 %v3182_v32 }
 0xbb7   :  { %2341 = vmatpush.msrb.mxu3 %v4127_v6 }
 0xbb8   :  { %3081 = vmatmul.msk.f32.gmra.mxu3 %vm47_vm0, %v4034_v34 }
 0xbba   :  { %v4133_v25 = vpop.f32.mrf.mxu1 }
 0xbbb   :  { %v1980_v7 = vsel %vm47_vm0, %v4133_v25, -inf }
 0xbbc   :  { %1981 = vmax.xlane.f32.xlu1 %v1980_v7 }
 0xbc2   :  { %v4137_v14 = vpop.f32.mrf.mxu1 }
 0xbc3   :  { %v1983_v28 = vsel %vm47_vm0, %v4137_v14, -inf }
 0xbc4   :  { %1984 = vmax.xlane.f32.xlu0 %v1983_v28 }
 0xbed   :  { %v1799_v29 = vpop.f32.mrf.mxu1 }
 0xbee   :  { %v1992_v30 = vsel %vm47_vm0, %v1799_v29, -inf }
 0xbef   :  { %1993 = vmax.xlane.f32.xlu1 %v1992_v30 }
 0xbf5   :  { %v1802_v33 = vpop.f32.mrf.mxu1 }
 0xbf6   :  { %v1995_v34 = vsel %vm47_vm0, %v1802_v33, -inf }
 0xbff   :  { %v1834_v31 = vpop.f32.mrf.mxu2 }
 0xc00   :  { %v1998_v19 = vsel %vm47_vm0, %v1834_v31, -inf }
 0xc01   :  { %1999 = vmax.xlane.f32.xlu2 %v1998_v19 }
 0xc03   :  { %v1764_v13 = vpop.f32.mrf.mxu3 }
 0xc04   :  { %v1986_v11 = vsel %vm47_vm0, %v1764_v13, -inf  ;;  %v4146_v35 = vpop.f32.mrf.mxu0 }
 0xc05   :  { %1987 = vmax.xlane.f32.xlu0 %v1986_v11  ;;  %v2010_v41 = vsel %vm47_vm0, %v4146_v35, -inf }
 0xc07   :  { %v1837_v42 = vpop.f32.mrf.mxu2 }
 0xc08   :  { %v2001_v36 = vsel %vm47_vm0, %v1837_v42, -inf }
 0xc09   :  { %1996 = vmax.xlane.f32.xlu2 %v1995_v34 }
 0xc0b   :  { %v1767_v27 = vpop.f32.mrf.mxu3 }
 0xc0c   :  { %v1989_v39 = vsel %vm47_vm0, %v1767_v27, -inf  ;;  %v4151_v43 = vpop.f32.mrf.mxu0 }
 0xc0d   :  { %1990 = vmax.xlane.f32.xlu0 %v1989_v39  ;;  %v2013_v37 = vsel %vm47_vm0, %v4151_v43, -inf }
 0xc11   :  { %2002 = vmax.xlane.f32.xlu2 %v2001_v36 }
 0xc15   :  { %2011 = vmax.xlane.f32.xlu0 %v2010_v41 }
 0xc1d   :  { %2014 = vmax.xlane.f32.xlu0 %v2013_v37 }
 0xc23   :  { %v4155_v47 = vpop.f32.mrf.mxu2 }
 0xc24   :  { %v2022_v56 = vsel %vm47_vm0, %v4155_v47, -inf }
 0xc25   :  { %v4159_v62 = vpop.f32.mrf.mxu1  ;;  %2023 = vmax.xlane.f32.xlu1 %v2022_v56 }
 0xc26   :  { %v2016_v63 = vsel %vm47_vm0, %v4159_v62, -inf }
 0xc27   :  { %2017 = vmax.xlane.f32.xlu2 %v2016_v63 }
 0xc2b   :  { %v4171_v52 = vpop.f32.mrf.mxu2 }
 0xc2c   :  { %v2025_v18 = vsel %vm47_vm0, %v4171_v52, -inf }
 0xc2d   :  { %v4163_v21 = vpop.f32.mrf.mxu1 }
 0xc2e   :  { %v2019_v40 = vsel %vm47_vm0, %v4163_v21, -inf }
 0xc2f   :  { %2020 = vmax.xlane.f32.xlu2 %v2019_v40  ;;  %v4179_v51 = vpop.xlane.xlu1 %1981 }
 0xc33   :  { %v4167_v45 = vpop.f32.mrf.mxu3 }
 0xc34   :  { %v2004_v44 = vsel %vm47_vm0, %v4167_v45, -inf }
 0xc35   :  { %2005 = vmax.xlane.f32.xlu1 %v2004_v44 }
 0xc37   :  { %v4185_v58 = vpop.xlane.xlu0 %1984 }
 0xc3b   :  { %v4173_v46 = vpop.f32.mrf.mxu3 }
 0xc3c   :  { %v2007_v16 = vsel %vm47_vm0, %v4173_v46, -inf }
 0xc3d   :  { %2026 = vmax.xlane.f32.xlu1 %v2025_v18  ;;  %2008 = vmax.xlane.f32.xlu0 %v2007_v16 }
 0xc62   :  { %v1994_v48 = vpop.xlane.xlu1 %1993 }
 0xc63   :  { %v2032_v54 = vsub.f32 %v1799_v29, %v1994_v48 }
 0xc65   :  { %v2052_v57 = vmul.f32 1.442695, %v2032_v54 }
 0xc67   :  { %3288 = vpow2.f32 %v2052_v57 }
 0xc6d   :  { %v4181_v59 = vpop.eup %3288 }
 0xc6e   :  { %v2088_v55 = vsel %vm47_vm0, %v4181_v59, 0.0 }
 0xc6f   :  { %2089 = vadd.xlane.f32.xlu2 %v2088_v55 }
 0xc74   :  { %v2000_v49 = vpop.xlane.xlu2 %1999 }
 0xc75   :  { %v2034_v61 = vsub.f32 %v1834_v31, %v2000_v49 }
 0xc77   :  { %v2056_v0 = vmul.f32 1.442695, %v2034_v61 }
 0xc78   :  { %v1988_v1 = vpop.xlane.xlu0 %1987 }
 0xc79   :  { %3290 = vpow2.f32 %v2056_v0  ;;  %v2030_v4 = vsub.f32 %v1764_v13, %v1988_v1 }
 0xc7b   :  { %v2048_v2 = vmul.f32 1.442695, %v2030_v4 }
 0xc7c   :  { %v1997_v5 = vpop.xlane.xlu2 %1996 }
 0xc7d   :  { %3292 = vpow2.f32 %v2048_v2  ;;  %v2033_v8 = vsub.f32 %v1802_v33, %v1997_v5  ;;  %v3188_v2 = vpack.i.bf16 %v4127_v6, %v4119_v22 }
 0xc7f   :  { %v4187_v9 = vpop.eup %3290  ;;  %v2054_v24 = vmul.f32 1.442695, %v2033_v8 }
 0xc80   :  { %v1991_v20 = vpop.xlane.xlu0 %1990  ;;  %v2094_v15 = vsel %vm47_vm0, %v4187_v9, 0.0 }
 0xc81   :  { %v2031_v17 = vsub.f32 %v1767_v27, %v1991_v20  ;;  %2095 = vadd.xlane.f32.xlu2 %v2094_v15  ;;  %3294 = vpow2.f32 %v2054_v24  ;;  %v2028_v24 = vsub.f32 %v4133_v25, %v4179_v51 }
 0xc83   :  { %v4191_v60 = vpop.eup %3292  ;;  %v2050_v3 = vmul.f32 1.442695, %v2031_v17 }
 0xc84   :  { %v2003_v23 = vpop.xlane.xlu2 %2002  ;;  %v2082_v26 = vsel %vm47_vm0, %v4191_v60, 0.0 }
 0xc85   :  { %3296 = vpow2.f32 %v2050_v3  ;;  %v2035_v32 = vsub.f32 %v1837_v42, %v2003_v23  ;;  %2083 = vadd.xlane.f32.xlu0 %v2082_v26 }
 0xc87   :  { %v2058_v7 = vmul.f32 1.442695, %v2035_v32  ;;  %v4195_v29 = vpop.eup %3294 }
 0xc88   :  { %v2012_v28 = vpop.xlane.xlu0 %2011  ;;  %v2091_v13 = vsel %vm47_vm0, %v4195_v29, 0.0 }
 0xc89   :  { %3298 = vpow2.f32 %v2058_v7  ;;  %v2038_v30 = vsub.f32 %v4146_v35, %v2012_v28 }
 0xc8b   :  { %v4198_v31 = vpop.eup %3296  ;;  %v2064_v19 = vmul.f32 1.442695, %v2038_v30 }
 0xc8c   :  { %v2085_v11 = vsel %vm47_vm0, %v4198_v31, 0.0 }
 0xc8d   :  { %2092 = vadd.xlane.f32.xlu0 %v2091_v13  ;;  %2086 = vadd.xlane.f32.xlu2 %v2085_v11  ;;  %3300 = vpow2.f32 %v2064_v19 }
 0xc8f   :  { %v4204_v33 = vpop.eup %3298 }
 0xc90   :  { %v2015_v34 = vpop.xlane.xlu0 %2014  ;;  %v2097_v27 = vsel %vm47_vm0, %v4204_v33, 0.0 }
 0xc91   :  { %v2039_v39 = vsub.f32 %v4151_v43, %v2015_v34  ;;  %2098 = vadd.xlane.f32.xlu1 %v2097_v27 }
 0xc93   :  { %v2066_v42 = vmul.f32 1.442695, %v2039_v39  ;;  %v4209_v35 = vpop.eup %3300 }
 0xc94   :  { %v2106_v41 = vsel %vm47_vm0, %v4209_v35, 0.0 }
 0xc95   :  { %3302 = vpow2.f32 %v2066_v42 }
 0xc98   :  { %v2024_v36 = vpop.xlane.xlu1 %2023 }
 0xc99   :  { %v2042_v37 = vsub.f32 %v4155_v47, %v2024_v36  ;;  %2107 = vadd.xlane.f32.xlu1 %v2106_v41 }
 0xc9a   :  { %v2018_v56 = vpop.xlane.xlu2 %2017 }
 0xc9b   :  { %v2072_v63 = vmul.f32 1.442695, %v2042_v37  ;;  %v2040_v40 = vsub.f32 %v4159_v62, %v2018_v56  ;;  %v4215_v44 = vpop.eup %3302 }
 0xc9c   :  { %v2109_v18 = vsel %vm47_vm0, %v4215_v44, 0.0 }
 0xc9d   :  { %3304 = vpow2.f32 %v2072_v63  ;;  %v2068_v43 = vmul.f32 1.442695, %v2040_v40 }
 0xc9f   :  { %3306 = vpow2.f32 %v2068_v43 }
 0xca1   :  { %2110 = vadd.xlane.f32.xlu1 %v2109_v18 }
 0xca2   :  { %v2021_v16 = vpop.xlane.xlu2 %2020 }
 0xca3   :  { %v4219_v48 = vpop.eup %3304  ;;  %v2041_v54 = vsub.f32 %v4163_v21, %v2021_v16 }
 0xca4   :  { %v2118_v47 = vsel %vm47_vm0, %v4219_v48, 0.0 }
 0xca5   :  { %v4224_v57 = vpop.eup %3306  ;;  %v2070_v62 = vmul.f32 1.442695, %v2041_v54  ;;  %2119 = vadd.xlane.f32.xlu2 %v2118_v47 }
 0xca6   :  { %v2112_v55 = vsel %vm47_vm0, %v4224_v57, 0.0 }
 0xca7   :  { %3308 = vpow2.f32 %v2070_v62  ;;  %2113 = vadd.xlane.f32.xlu0 %v2112_v55 }
 0xca8   :  { %v2006_v49 = vpop.xlane.xlu1 %2005 }
 0xca9   :  { %v2036_v6 = vsub.f32 %v4167_v45, %v2006_v49 }
 0xcab   :  { %v2060_v23 = vmul.f32 1.442695, %v2036_v6 }
 0xcad   :  { %v4228_v61 = vpop.eup %3308 }
 0xcae   :  { %v2115_v0 = vsel %vm47_vm0, %v4228_v61, 0.0 }
 0xcaf   :  { %2116 = vadd.xlane.f32.xlu1 %v2115_v0 }
 0xcb0   :  { %v2027_v21 = vpop.xlane.xlu1 %2026  ;;  %v2009_v20 = vpop.xlane.xlu0 %2008 }
 0xcb1   :  { %v2043_v1 = vsub.f32 %v4171_v52, %v2027_v21  ;;  %v2044_v52 = vmul.f32 1.442695, %v2028_v24  ;;  %v2037_v15 = vsub.f32 %v4173_v46, %v2009_v20  ;;  %v2029_v46 = vsub.f32 %v4137_v14, %v4185_v58 }
 0xcb3   :  { %v2074_v4 = vmul.f32 1.442695, %v2043_v1  ;;  %v2062_v22 = vmul.f32 1.442695, %v2037_v15  ;;  %v2046_v19 = vmul.f32 1.442695, %v2029_v46 }
 0xcb5   :  { %3310 = vpow2.f32 %v2074_v4 }
 0xcb6   :  { %3312 = vpow2.f32 %v2044_v52 }
 0xcb7   :  { %3314 = vpow2.f32 %v2062_v22 }
 0xcbb   :  { %3189 = vrot.lane.b32.xlu0 %v3188_v2, %s3425_s24  ;;  %v4236_v5 = vpop.eup %3310 }
 0xcbc   :  { %v2121_v8 = vsel %vm47_vm0, %v4236_v5, 0.0  ;;  %v4246_v17 = vpop.eup %3312 }
 0xcbd   :  { %2122 = vadd.xlane.f32.xlu2 %v2121_v8  ;;  %v2076_v26 = vsel %vm47_vm0, %v4246_v17, 0.0  ;;  %v4250_v25 = vpop.eup %3314 }
 0xcbe   :  { %v2103_v45 = vsel %vm47_vm0, %v4250_v25, 0.0 }
 0xcc8   :  { %3199 = vrot.lane.b32.xlu1 %v3188_v2, %s3424_s23 }
 0xcd5   :  { %3194 = vrot.lane.b32.xlu2 %v3188_v2, %s3426_s25 }
 0xce2   :  { %v2090_v3 = vpop.xlane.xlu2 %2089 }
 0xce3   :  { %3316 = vrcp.f32 %v2090_v3 }
 0xce4   :  { %3318 = vpow2.f32 %v2060_v23 }
 0xce5   :  { %2077 = vadd.xlane.f32.xlu0 %v2076_v26  ;;  %3320 = vpow2.f32 %v2046_v19 }
 0xce9   :  { %v3317_v51 = vpop.eup %3316 }
 0xcea   :  { %v2144_v32 = vmul.f32 %v3317_v51, %v2090_v3  ;;  %v4256_v28 = vpop.eup %3318 }
 0xceb   :  { %v2100_v11 = vsel %vm47_vm0, %v4256_v28, 0.0  ;;  %v4262_v58 = vpop.eup %3320 }
 0xcec   :  { %v2160_v7 = vsub.f32 2.0, %v2144_v32  ;;  %v2079_v36 = vsel %vm47_vm0, %v4262_v58, 0.0 }
 0xced   :  { %2104 = vadd.xlane.f32.xlu0 %v2103_v45 }
 0xcee   :  { %v2176_v30 = vmul.f32 %v3317_v51, %v2160_v7 }
 0xcf0   :  { %v2192_v13 = vmul.f32 %v4181_v59, %v2176_v30 }
 0xcf2   :  { %3098 = vmatmul.msk.f32.vlgmr.msrb.gmra.mxu1 %vm47_vm0, %v2192_v13  ;;  %2101 = vadd.xlane.f32.xlu1 %v2100_v11 }
 0xcf4   :  { %v2096_v34 = vpop.xlane.xlu2 %2095 }
 0xcf5   :  { %3322 = vrcp.f32 %v2096_v34 }
 0xcf8   :  { %v2084_v14 = vpop.xlane.xlu0 %2083 }
 0xcf9   :  { %3324 = vrcp.f32 %v2084_v14 }
 0xcfb   :  { %v3323_v27 = vpop.eup %3322 }
 0xcfc   :  { %v2146_v39 = vmul.f32 %v3323_v27, %v2096_v34 }
 0xcfe   :  { %v2162_v42 = vsub.f32 2.0, %v2146_v39  ;;  %2080 = vadd.xlane.f32.xlu2 %v2079_v36 }
 0xcff   :  { %v3325_v59 = vpop.eup %3324 }
 0xd00   :  { %v2178_v41 = vmul.f32 %v3323_v27, %v2162_v42  ;;  %v2142_v37 = vmul.f32 %v3325_v59, %v2084_v14  ;;  %v2093_v56 = vpop.xlane.xlu0 %2092  ;;  %v2087_v63 = vpop.xlane.xlu2 %2086 }
 0xd01   :  { %3326 = vrcp.f32 %v2093_v56 }
 0xd02   :  { %v2194_v40 = vmul.f32 %v4187_v9, %v2178_v41  ;;  %v2158_v43 = vsub.f32 2.0, %v2142_v37  ;;  %3328 = vrcp.f32 %v2087_v63 }
 0xd04   :  { %v2174_v18 = vmul.f32 %v3325_v59, %v2158_v43  ;;  %v2099_v16 = vpop.xlane.xlu1 %2098  ;;  %3100 = vmatmul.msk.f32.vlgmr.msra.gmra.mxu2 %vm47_vm0, %v2194_v40 }
 0xd05   :  { %3330 = vrcp.f32 %v2099_v16 }
 0xd06   :  { %v2190_v54 = vmul.f32 %v4191_v60, %v2174_v18 }
 0xd07   :  { %v3327_v47 = vpop.eup %3326 }
 0xd08   :  { %v3329_v62 = vpop.eup %3328  ;;  %v2145_v55 = vmul.f32 %v3327_v47, %v2093_v56  ;;  %3096 = vmatmul.msk.f32.vlgmr.msrb.gmra.mxu0 %vm47_vm0, %v2190_v54 }
 0xd09   :  { %v2143_v49 = vmul.f32 %v3329_v62, %v2087_v63 }
 0xd0a   :  { %v2161_v0 = vsub.f32 2.0, %v2145_v55 }
 0xd0b   :  { %v3331_v21 = vpop.eup %3330  ;;  %v2159_v1 = vsub.f32 2.0, %v2143_v49 }
 0xd0c   :  { %v2177_v4 = vmul.f32 %v3327_v47, %v2161_v0  ;;  %v2147_v9 = vmul.f32 %v3331_v21, %v2099_v16  ;;  %v2108_v22 = vpop.xlane.xlu1 %2107 }
 0xd0d   :  { %v2175_v2 = vmul.f32 %v3329_v62, %v2159_v1 }
 0xd0e   :  { %v2163_v8 = vsub.f32 2.0, %v2147_v9  ;;  %v2193_v24 = vmul.f32 %v4195_v29, %v2177_v4 }
 0xd0f   :  { %v2191_v52 = vmul.f32 %v4198_v31, %v2175_v2 }
 0xd10   :  { %v2179_v20 = vmul.f32 %v3331_v21, %v2163_v8  ;;  %3099 = vmatmul.msk.f32.gmra.mxu1 %vm47_vm0, %v2193_v24 }
 0xd11   :  { %3097 = vmatmul.msk.f32.gmra.mxu0 %vm47_vm0, %v2191_v52 }
 0xd12   :  { %v2195_v60 = vmul.f32 %v4204_v33, %v2179_v20 }
 0xd14   :  { %3101 = vmatmul.msk.f32.gmra.mxu2 %vm47_vm0, %v2195_v60  ;;  %v2111_v26 = vpop.xlane.xlu1 %2110 }
 0xd18   :  { %v2120_v15 = vpop.xlane.xlu2 %2119 }
 0xd19   :  { %3332 = vrcp.f32 %v2120_v15 }
 0xd1a   :  { %v2114_v23 = vpop.xlane.xlu0 %2113  ;;  %3334 = vrcp.f32 %v2108_v22 }
 0xd1b   :  { %3336 = vrcp.f32 %v2114_v23 }
 0xd1c   :  { %3338 = vrcp.f32 %v2111_v26 }
 0xd1f   :  { %v3333_v6 = vpop.eup %3332 }
 0xd20   :  { %v2154_v3 = vmul.f32 %v3333_v6, %v2120_v15  ;;  %v3335_v32 = vpop.eup %3334 }
 0xd21   :  { %v3337_v45 = vpop.eup %3336  ;;  %v2150_v30 = vmul.f32 %v3335_v32, %v2108_v22 }
 0xd22   :  { %v2170_v29 = vsub.f32 2.0, %v2154_v3  ;;  %v2117_v46 = vpop.xlane.xlu1 %2116  ;;  %v2152_v11 = vmul.f32 %v3337_v45, %v2114_v23  ;;  %v3339_v14 = vpop.eup %3338 }
 0xd23   :  { %3340 = vrcp.f32 %v2117_v46  ;;  %v2166_v34 = vsub.f32 2.0, %v2150_v30  ;;  %v2151_v59 = vmul.f32 %v3339_v14, %v2111_v26 }
 0xd24   :  { %v2186_v31 = vmul.f32 %v3333_v6, %v2170_v29  ;;  %v2168_v27 = vsub.f32 2.0, %v2152_v11 }
 0xd25   :  { %v2182_v36 = vmul.f32 %v3335_v32, %v2166_v34  ;;  %v2167_v47 = vsub.f32 2.0, %v2151_v59  ;;  %v1528_v59 = vld [vmem:[#allocation2 + $0x1b8] sm:$0xff] }
 0xd26   :  { %v2202_v19 = vmul.f32 %v4219_v48, %v2186_v31  ;;  %v2184_v56 = vmul.f32 %v3337_v45, %v2168_v27 }
 0xd27   :  { %v2198_v54 = vmul.f32 %v4209_v35, %v2182_v36  ;;  %v2183_v1 = vmul.f32 %v3339_v14, %v2167_v47  ;;  %v1529_v36 = vld [vmem:[#allocation2 + $0x1d8] sm:$0xff] }
 0xd28   :  { %v2200_v49 = vmul.f32 %v4224_v57, %v2184_v56  ;;  %v1525_v56 = vld [vmem:[#allocation2 + $0x158] sm:$0xff] }
 0xd29   :  { %v3341_v39 = vpop.eup %3340  ;;  %v2199_v35 = vmul.f32 %v4215_v44, %v2183_v1 }
 0xd2a   :  { %v2153_v63 = vmul.f32 %v3341_v39, %v2117_v46 }
 0xd2c   :  { %v2169_v0 = vsub.f32 2.0, %v2153_v63  ;;  %v1524_v63 = vld [vmem:[#allocation2 + $0x138] sm:$0xff] }
 0xd2d   :  { %v3190_v51 = vpop.permute.xlu0 %3189 }
 0xd2e   :  { %v3191_v7 = vunpack.i.l.bf16 %v3190_v51  ;;  %v3192_v33 = vunpack.i.h.bf16 %v3190_v51  ;;  %v2185_v4 = vmul.f32 %v3341_v39, %v2169_v0 }
 0xd30   :  { %2427 = vmatpush.msrb.mxu2 %v3191_v7  ;;  %v2123_v13 = vpop.xlane.xlu2 %2122  ;;  %v2201_v9 = vmul.f32 %v4228_v61, %v2185_v4 }
 0xd31   :  { %3342 = vrcp.f32 %v2123_v13 }
 0xd32   :  { %2428 = vmatpush.msrb.mxu2 %v3192_v33 }
 0xd33   :  { %3108 = vmatmul.msk.f32.vlgmr.msrb.gmra.mxu2 %vm47_vm0, %v2202_v19 }
 0xd37   :  { %v3343_v42 = vpop.eup %3342 }
 0xd38   :  { %v2155_v41 = vmul.f32 %v3343_v42, %v2123_v13  ;;  %v3195_v37 = vpop.permute.xlu2 %3194 }
 0xd39   :  { %v3196_v40 = vunpack.i.l.bf16 %v3195_v37  ;;  %v3197_v16 = vunpack.i.h.bf16 %v3195_v37  ;;  %v1526_v37 = vld [vmem:[#allocation2 + $0x178] sm:$0xff] }
 0xd3a   :  { %v3200_v48 = vpop.permute.xlu1 %3199  ;;  %v2171_v43 = vsub.f32 2.0, %v2155_v41  ;;  %v1527_v41 = vld [vmem:[#allocation2 + $0x198] sm:$0xff] }
 0xd3b   :  { %v3201_v18 = vunpack.i.l.bf16 %v3200_v48  ;;  %2369 = vmatpush.msra.mxu0 %v3196_v40  ;;  %v3202_v55 = vunpack.i.h.bf16 %v3200_v48  ;;  %v1523_v40 = vld [vmem:[#allocation2 + $0x118] sm:$0xff] }
 0xd3c   :  { %v2187_v62 = vmul.f32 %v3343_v42, %v2171_v43  ;;  %v1530_v42 = vld [vmem:[#allocation2 + $0x1f8] sm:$0xff] }
 0xd3d   :  { %2398 = vmatpush.msra.mxu1 %v3201_v18  ;;  %2370 = vmatpush.msra.mxu0 %v3197_v16 }
 0xd3e   :  { %3104 = vmatmul.msk.f32.vlgmr.msra.gmra.mxu0 %vm47_vm0, %v2198_v54  ;;  %v2203_v21 = vmul.f32 %v4236_v5, %v2187_v62 }
 0xd3f   :  { %2399 = vmatpush.msra.mxu1 %v3202_v55 }
 0xd40   :  { %3106 = vmatmul.msk.f32.vlgmr.msra.gmra.mxu1 %vm47_vm0, %v2200_v49  ;;  %3109 = vmatmul.msk.f32.gmra.mxu2 %vm47_vm0, %v2203_v21 }
 0xd46   :  { %3105 = vmatmul.msk.f32.gmra.mxu0 %vm47_vm0, %v2199_v35 }
 0xd48   :  { %3107 = vmatmul.msk.f32.gmra.mxu1 %vm47_vm0, %v2201_v9 }
 0xd58   :  { %v2078_v57 = vpop.xlane.xlu0 %2077 }
 0xd59   :  { %3344 = vrcp.f32 %v2078_v57 }
 0xd5f   :  { %v3345_v2 = vpop.eup %3344 }
 0xd60   :  { %v2140_v8 = vmul.f32 %v3345_v2, %v2078_v57  ;;  %v2105_v15 = vpop.xlane.xlu0 %2104 }
 0xd62   :  { %v2156_v24 = vsub.f32 2.0, %v2140_v8 }
 0xd64   :  { %v2172_v5 = vmul.f32 %v3345_v2, %v2156_v24 }
 0xd65   :  { %v2102_v20 = vpop.xlane.xlu1 %2101 }
 0xd66   :  { %v2188_v52 = vmul.f32 %v4246_v17, %v2172_v5  ;;  %3346 = vrcp.f32 %v2102_v20 }
 0xd68   :  { %3094 = vmatmul.msk.f32.vlgmr.msra.gmra.mxu3 %vm47_vm0, %v2188_v52 }
 0xd69   :  { %2516 = vmatpush.msra.mxu3 %v1530_v42 }
 0xd6b   :  { %2517 = vmatpush.msra.mxu3 %v1529_v36 }
 0xd6c   :  { %v3347_v61 = vpop.eup %3346 }
 0xd6d   :  { %v2148_v3 = vmul.f32 %v3347_v61, %v2102_v20  ;;  %2518 = vmatpush.msra.mxu3 %v1528_v59 }
 0xd6f   :  { %v2285_v60 = vpop.f32.mrf.mxu1  ;;  %v2164_v29 = vsub.f32 2.0, %v2148_v3  ;;  %2519 = vmatpush.msra.mxu3 %v1527_v41  ;;  %v3047_v3 = vld [vmem:[%s4597_s4 + $0x11] ss:$0 sm:$0xff] }
 0xd70   :  { %2446 = vrot.lane.b32.xlu2 %v2285_v60, %s3422_s27 }
 0xd71   :  { %v2081_v44 = vpop.xlane.xlu2 %2080  ;;  %v2180_v32 = vmul.f32 %v3347_v61, %v2164_v29  ;;  %2520 = vmatpush.msra.mxu3 %v1526_v37 }
 0xd72   :  { %3348 = vrcp.f32 %v2081_v44 }
 0xd73   :  { %3350 = vrcp.f32 %v2105_v15  ;;  %v2196_v33 = vmul.f32 %v4256_v28, %v2180_v32  ;;  %2521 = vmatpush.msra.mxu3 %v1525_v56 }
 0xd75   :  { %2522 = vmatpush.msra.mxu3 %v1524_v63 }
 0xd77   :  { %2523 = vmatpush.msra.mxu3 %v1523_v40 }
 0xd78   :  { %v3349_v22 = vpop.eup %3348 }
 0xd79   :  { %v2141_v6 = vmul.f32 %v3349_v22, %v2081_v44  ;;  %v3351_v31 = vpop.eup %3350 }
 0xd7a   :  { %v2149_v51 = vmul.f32 %v3351_v31, %v2105_v15 }
 0xd7b   :  { %v2157_v23 = vsub.f32 2.0, %v2141_v6 }
 0xd7c   :  { %v2165_v45 = vsub.f32 2.0, %v2149_v51 }
 0xd7d   :  { %v2173_v26 = vmul.f32 %v3349_v22, %v2157_v23 }
 0xd7e   :  { %v2181_v30 = vmul.f32 %v3351_v31, %v2165_v45 }
 0xd7f   :  { %v2189_v17 = vmul.f32 %v4262_v58, %v2173_v26 }
 0xd80   :  { %v2197_v58 = vmul.f32 %v4250_v25, %v2181_v30 }
 0xd81   :  { %3095 = vmatmul.msk.f32.gmra.mxu3 %vm47_vm0, %v2189_v17 }
 0xd85   :  { %v2256_v46 = vpop.f32.mrf.mxu0 }
 0xd86   :  { %2438 = vrot.lane.b32.xlu0 %v2256_v46, %s3423_s30 }
 0xd87   :  { %v2314_v7 = vpop.f32.mrf.mxu2 }
 0xd88   :  { %2454 = vrot.lane.b32.xlu1 %v2314_v7, %s3428_s28 }
 0xd89   :  { %3102 = vmatmul.msk.f32.vlgmr.msrb.gmra.mxu3 %vm47_vm0, %v2196_v33 }
 0xd8d   :  { %v2288_v19 = vpop.f32.mrf.mxu1 }
 0xd8e   :  { %v2259_v13 = vpop.f32.mrf.mxu0  ;;  %2448 = vrot.lane.b32.xlu2 %v2288_v19, %s3422_s27 }
 0xd8f   :  { %2440 = vrot.lane.b32.xlu0 %v2259_v13, %s3423_s30 }
 0xd91   :  { %3103 = vmatmul.msk.f32.gmra.mxu3 %vm47_vm0, %v2197_v58 }
 0xd97   :  { %v2317_v11 = vpop.f32.mrf.mxu2 }
 0xd98   :  { %2456 = vrot.lane.b32.xlu0 %v2317_v11, %s3428_s28 }
 0xdb6   :  { %v2430_v34 = vpop.f32.mrf.mxu2 }
 0xdb7   :  { %2484 = vrot.lane.b32.xlu0 %v2430_v34, %s3428_s28 }
 0xdbb   :  { %v2372_v28 = vpop.f32.mrf.mxu0 }
 0xdbc   :  { %2468 = vrot.lane.b32.xlu1 %v2372_v28, %s3423_s30 }
 0xdbd   :  { %v2401_v14 = vpop.f32.mrf.mxu1 }
 0xdbe   :  { %2476 = vrot.lane.b32.xlu2 %v2401_v14, %s3422_s27 }
 0xdc3   :  { %v2375_v27 = vpop.f32.mrf.mxu0  ;;  %v2433_v39 = vpop.f32.mrf.mxu2 }
 0xdc4   :  { %2470 = vrot.lane.b32.xlu1 %v2375_v27, %s3423_s30  ;;  %2486 = vrot.lane.b32.xlu0 %v2433_v39, %s3428_s28  ;;  %s2947_s30 = sshll.u32 %s4599_s6, 4  ;;  %s2948_s30 = int_to_ptr.hbm [resolvable:$true] %s2947_s30 }
 0xdc5   :  { %v2404_v25 = vpop.f32.mrf.mxu1 }
 0xdc6   :  { %2478 = vrot.lane.b32.xlu2 %v2404_v25, %s3422_s27 }
 0xdca   :  { %v2447_v18 = vpop.permute.xlu2 %2446 }
 0xde8   :  { %v2449_v21 = vpop.permute.xlu2 %2448 }
 0xdeb   :  { %v2227_v48 = vpop.f32.mrf.mxu3 }
 0xdf8   :  { %v2439_v43 = vpop.permute.xlu0 %2438 }
 0xdf9   :  { %v2460_v16 = vsel %vm47_vm0, %v2227_v48, %v2439_v43 }
 0xdfa   :  { %v2462_v54 = vsel %vm137_vm2, %v2460_v16, %v2447_v18  ;;  %v2455_v47 = vpop.permute.xlu1 %2454  ;;  %v1522_v18 = vld [vmem:[#allocation2 + $0x1f0] sm:$0xff] }
 0xdfb   :  { %v2464_v62 = vsel %vm1143_vm4, %v2462_v54, %v2455_v47  ;;  %2657 = vmatpush.msrb.mxu0 %v1522_v18  ;;  %v1521_v16 = vld [vmem:[#allocation2 + $0x1d0] sm:$0xff] }
 0xdfc   :  { %3110 = vmatmul.msk.f32.vlgmr.msra.gmra.mxu3 %vm240_vm3, %v2464_v62  ;;  %v1520_v54 = vld [vmem:[#allocation2 + $0x1b0] sm:$0xff] }
 0xdfd   :  { %2658 = vmatpush.msrb.mxu0 %v1521_v16  ;;  %v1519_v47 = vld [vmem:[#allocation2 + $0x190] sm:$0xff] }
 0xdfe   :  { %v1518_v62 = vld [vmem:[#allocation2 + $0x170] sm:$0xff] }
 0xdff   :  { %2659 = vmatpush.msrb.mxu0 %v1520_v54  ;;  %v3035_v54 = vld [vmem:[%s4596_s3 + $0xa8] sm:$0xff] }
 0xe01   :  { %v2441_v55 = vpop.permute.xlu0 %2440  ;;  %2660 = vmatpush.msrb.mxu0 %v1519_v47 }
 0xe03   :  { %2661 = vmatpush.msrb.mxu0 %v1518_v62 }
 0xe04   :  { %v2230_v49 = vpop.f32.mrf.mxu3 }
 0xe05   :  { %v2461_v0 = vsel %vm47_vm0, %v2230_v49, %v2441_v55  ;;  %v1517_v55 = vld [vmem:[#allocation2 + $0x150] sm:$0xff] }
 0xe06   :  { %v2463_v1 = vsel %vm137_vm2, %v2461_v0, %v2449_v21  ;;  %2662 = vmatpush.msrb.mxu0 %v1517_v55  ;;  %v1516_v49 = vld [vmem:[#allocation2 + $0x130] sm:$0xff]  ;;  %v3034_v55 = vld [vmem:[%s4596_s3 + $0xa0] sm:$0xff] }
 0xe07   :  { %v1515_v0 = vld [vmem:[#allocation2 + $0x110] sm:$0xff] }
 0xe08   :  { %2663 = vmatpush.msrb.mxu0 %v1516_v49 }
 0xe0a   :  { %v2457_v4 = vpop.permute.xlu0 %2456  ;;  %2664 = vmatpush.msrb.mxu0 %v1515_v0 }
 0xe0b   :  { %v2465_v35 = vsel %vm1143_vm4, %v2463_v1, %v2457_v4 }
 0xe0c   :  { %3111 = vmatmul.msk.f32.gmra.mxu3 %vm240_vm3, %v2465_v35  ;;  %v2343_v9 = vpop.f32.mrf.mxu3 }
 0xe14   :  { %v2346_v20 = vpop.f32.mrf.mxu3 }
 0xe18   :  { %v2477_v57 = vpop.permute.xlu2 %2476 }
 0xe20   :  { %v2479_v44 = vpop.permute.xlu2 %2478 }
 0xe29   :  { %v2485_v24 = vpop.permute.xlu0 %2484 }
 0xe2e   :  { %v2469_v2 = vpop.permute.xlu1 %2468 }
 0xe2f   :  { %v2490_v8 = vsel %vm47_vm0, %v2343_v9, %v2469_v2 }
 0xe30   :  { %v2492_v5 = vsel %vm137_vm2, %v2490_v8, %v2477_v57 }
 0xe31   :  { %v2494_v52 = vsel %vm1143_vm4, %v2492_v5, %v2485_v24 }
 0xe32   :  { %3112 = vmatmul.msk.f32.gmra.mxu3 %vm240_vm3, %v2494_v52 }
 0xe36   :  { %v2471_v60 = vpop.permute.xlu1 %2470  ;;  %v2487_v22 = vpop.permute.xlu0 %2486 }
 0xe37   :  { %v2491_v61 = vsel %vm47_vm0, %v2346_v20, %v2471_v60  ;;  %v4360_v60 = vld [vmem:[%s4597_s4 + $0x12] ss:$0 sm:$0xff] }
 0xe38   :  { %v2493_v15 = vsel %vm137_vm2, %v2491_v61, %v2479_v44 }
 0xe39   :  { %v2495_v6 = vsel %vm1143_vm4, %v2493_v15, %v2487_v22  ;;  %v4365_v15 = vld [vmem:[%s4597_s4 + $0x13] ss:$0 sm:$0xff] }
 0xe3a   :  { %3113 = vmatmul.msk.f32.gmra.mxu3 %vm240_vm3, %v2495_v6 }
 0xe7f   :  { %v2525_v23 = vpop.f32.mrf.mxu3 }
 0xe80   :  { %v2526_v26 = vadd.f32 %v3047_v3, %v2525_v23 }
 0xe82   :  { %v2537_v29 = vadd.f32 %v2526_v26, %v3992_v38 }
 0xe84   :  { %v2541_v17 = vsel %vm240_vm3, %v2537_v29, 0.0 }
 0xe85   :  { %2542 = vadd.xlane.f32.xlu1 %v2541_v17 }
 0xe8f   :  { %v2528_v31 = vpop.f32.mrf.mxu3 }
 0xe90   :  { %v2529_v51 = vadd.f32 %v3047_v3, %v2528_v31 }
 0xe92   :  { %v2538_v32 = vadd.f32 %v2529_v51, %v3999_v50 }
 0xe94   :  { %v2544_v46 = vsel %vm240_vm3, %v2538_v32, 0.0 }
 0xe95   :  { %2545 = vadd.xlane.f32.xlu2 %v2544_v46 }
 0xeb5   :  { %v2531_v7 = vpop.f32.mrf.mxu3 }
 0xeb6   :  { %v2532_v45 = vadd.f32 %v3047_v3, %v2531_v7 }
 0xeb8   :  { %v2539_v33 = vadd.f32 %v2532_v45, %v4008_v10 }
 0xeba   :  { %v2547_v30 = vsel %vm240_vm3, %v2539_v33, 0.0 }
 0xebb   :  { %2548 = vadd.xlane.f32.xlu0 %v2547_v30 }
 0xebd   :  { %v2534_v19 = vpop.f32.mrf.mxu3 }
 0xebe   :  { %v2535_v13 = vadd.f32 %v3047_v3, %v2534_v19  ;;  %v3045_v19 = vld [vmem:[%s4596_s3 + $0xf8] sm:$0xff] }
 0xebf   :  { %2682 = vmatpush.msrb.mxu1 %v3045_v19 }
 0xec0   :  { %v2540_v38 = vadd.f32 %v2535_v13, %v4015_v12  ;;  %v3044_v13 = vld [vmem:[%s4596_s3 + $0xf0] sm:$0xff] }
 0xec1   :  { %2683 = vmatpush.msrb.mxu1 %v3044_v13 }
 0xec2   :  { %v2550_v58 = vsel %vm240_vm3, %v2540_v38, 0.0 }
 0xec3   :  { %2551 = vadd.xlane.f32.xlu1 %v2550_v58 }
 0xef8   :  { %v2543_v11 = vpop.xlane.xlu1 %2542 }
 0xef9   :  { %v2553_v50 = vmul.f32 %v2543_v11, %v3842_v53 }
 0xefb   :  { %v2557_v34 = vsub.f32 %v2537_v29, %v2553_v50  ;;  %v3042_v50 = vld [vmem:[%s4596_s3 + $0xe0] sm:$0xff] }
 0xefd   :  { %v2561_v28 = vmul.f32 %v2557_v34, %v2557_v34 }
 0xeff   :  { %v2565_v14 = vsel %vm240_vm3, %v2561_v28, 0.0 }
 0xf00   :  { %2566 = vadd.xlane.f32.xlu2 %v2565_v14  ;;  %v3041_v14 = vld [vmem:[%s4596_s3 + $0xd8] sm:$0xff] }
 0xf08   :  { %v2546_v27 = vpop.xlane.xlu2 %2545 }
 0xf09   :  { %v2554_v10 = vmul.f32 %v2546_v27, %v3842_v53 }
 0xf0b   :  { %v4338_v39 = vsub.f32 %v2538_v32, %v2554_v10  ;;  %v3040_v10 = vld [vmem:[%s4596_s3 + $0xd0] sm:$0xff] }
 0xf0d   :  { %v2562_v25 = vmul.f32 %v4338_v39, %v4338_v39 }
 0xf0f   :  { %v2568_v12 = vsel %vm240_vm3, %v2562_v25, 0.0  ;;  %v3039_v25 = vld [vmem:[%s4596_s3 + $0xc8] sm:$0xff] }
 0xf10   :  { %2569 = vadd.xlane.f32.xlu0 %v2568_v12 }
 0xf2e   :  { %v2549_v42 = vpop.xlane.xlu0 %2548 }
 0xf2f   :  { %v2555_v36 = vmul.f32 %v2549_v42, %v3842_v53  ;;  %v3038_v42 = vld [vmem:[%s4596_s3 + $0xc0] sm:$0xff] }
 0xf31   :  { %v4344_v59 = vsub.f32 %v2539_v33, %v2555_v36 }
 0xf33   :  { %v2563_v41 = vmul.f32 %v4344_v59, %v4344_v59 }
 0xf35   :  { %v2571_v37 = vsel %vm240_vm3, %v2563_v41, 0.0 }
 0xf36   :  { %v2552_v56 = vpop.xlane.xlu1 %2551  ;;  %2572 = vadd.xlane.f32.xlu1 %v2571_v37  ;;  %v3037_v37 = vld [vmem:[%s4596_s3 + $0xb8] sm:$0xff] }
 0xf37   :  { %v2556_v63 = vmul.f32 %v2552_v56, %v3842_v53 }
 0xf39   :  { %v4350_v40 = vsub.f32 %v2540_v38, %v2556_v63  ;;  %v3043_v38 = vld [vmem:[%s4596_s3 + $0xe8] sm:$0xff] }
 0xf3a   :  { %2684 = vmatpush.msrb.mxu1 %v3043_v38 }
 0xf3b   :  { %v2564_v48 = vmul.f32 %v4350_v40, %v4350_v40 }
 0xf3c   :  { %2685 = vmatpush.msrb.mxu1 %v3042_v50 }
 0xf3d   :  { %v2574_v43 = vsel %vm240_vm3, %v2564_v48, 0.0  ;;  %v3036_v48 = vld [vmem:[%s4596_s3 + $0xb0] sm:$0xff] }
 0xf3e   :  { %2575 = vadd.xlane.f32.xlu2 %v2574_v43  ;;  %2686 = vmatpush.msrb.mxu1 %v3041_v14 }
 0xf40   :  { %2687 = vmatpush.msrb.mxu1 %v3040_v10 }
 0xf42   :  { %2688 = vmatpush.msrb.mxu1 %v3039_v25 }
 0xf44   :  { %2689 = vmatpush.msrb.mxu1 %v3038_v42 }
 0xf46   :  { %2690 = vmatpush.msrb.mxu1 %v3037_v37 }
 0xf48   :  { %2691 = vmatpush.msrb.mxu1 %v3036_v48 }
 0xf4a   :  { %2692 = vmatpush.msrb.mxu1 %v3035_v54 }
 0xf4c   :  { %2693 = vmatpush.msrb.mxu1 %v3034_v55  ;;  %v2817_v55 = vld [vmem:[%s4598_s5 + $0x30] sm:$0xff] }
 0xf73   :  { %v2567_v21 = vpop.xlane.xlu2 %2566 }
 0xf74   :  { %v2577_v1 = vmul.f32 %v2567_v21, %v3842_v53 }
 0xf76   :  { %v2581_v4 = vadd.f32 1e-05, %v2577_v1 }
 0xf78   :  { %3352 = vrsqrt.f32 %v2581_v4  ;;  %vm2591_vm4 = vweird.f32 %v2581_v4 }
 0xf7e   :  { %v3353_v35 = vpop.eup %3352 }
 0xf7f   :  { %v2586_v9 = vmul.f32 %v3353_v35, %v2581_v4  ;;  %vm2592_vm0 = vweird.f32 %v3353_v35 }
 0xf80   :  { %vm2593_vm6 = vmor %vm2591_vm4, %vm2592_vm0 }
 0xf81   :  { %v2587_v57 = vmul.f32 %v3353_v35, %v2586_v9 }
 0xf83   :  { %v2588_v2 = vmul.f32 0.5, %v2587_v57  ;;  %v2570_v8 = vpop.xlane.xlu0 %2569  ;;  %v3032_v57 = vld [vmem:[%s4596_s3 + $0x90] sm:$0xff] }
 0xf84   :  { %v2578_v24 = vmul.f32 %v2570_v8, %v3842_v53  ;;  %v3050_v8 = vld [vmem:[%s4597_s4 + $0x14] ss:$0 sm:$0xff] }
 0xf85   :  { %v2589_v5 = vsub.f32 1.5, %v2588_v2  ;;  %v3031_v2 = vld [vmem:[%s4596_s3 + $0x88] sm:$0xff] }
 0xf86   :  { %v2582_v52 = vadd.f32 1e-05, %v2578_v24 }
 0xf87   :  { %v2590_v20 = vmul.f32 %v3353_v35, %v2589_v5 }
 0xf88   :  { %3354 = vrsqrt.f32 %v2582_v52  ;;  %vm2601_vm8 = vweird.f32 %v2582_v52 }
 0xf89   :  { %v2594_v44 = vsel %vm2593_vm6, %v3353_v35, %v2590_v20 }
 0xf8a   :  { %v2625_v61 = vmul.f32 %v2594_v44, %v2557_v34 }
 0xf8c   :  { %v2629_v22 = vmul.f32 %v4360_v60, %v2625_v61 }
 0xf8e   :  { %v3355_v6 = vpop.eup %3354  ;;  %v4369_v3 = vadd.f32 %v4365_v15, %v2629_v22 }
 0xf8f   :  { %v2596_v23 = vmul.f32 %v3355_v6, %v2582_v52  ;;  %vm2602_vm7 = vweird.f32 %v3355_v6 }
 0xf90   :  { %3114 = vmatmul.msk.f32.vlgmr.msrb.gmra.mxu0 %vm240_vm3, %v4369_v3  ;;  %vm2603_vm9 = vmor %vm2601_vm8, %vm2602_vm7 }
 0xf91   :  { %v2597_v26 = vmul.f32 %v3355_v6, %v2596_v23 }
 0xf93   :  { %v2598_v29 = vmul.f32 0.5, %v2597_v26 }
 0xf95   :  { %v2599_v17 = vsub.f32 1.5, %v2598_v29  ;;  %v3051_v29 = vld [vmem:[%s4597_s4 + $0x15] ss:$0 sm:$0xff] }
 0xf97   :  { %v2600_v31 = vmul.f32 %v3355_v6, %v2599_v17 }
 0xf99   :  { %v2604_v51 = vsel %vm2603_vm9, %v3355_v6, %v2600_v31 }
 0xf9a   :  { %v2626_v32 = vmul.f32 %v2604_v51, %v4338_v39 }
 0xf9c   :  { %v2630_v46 = vmul.f32 %v4360_v60, %v2626_v32 }
 0xf9e   :  { %v4376_v7 = vadd.f32 %v4365_v15, %v2630_v46 }
 0xfa0   :  { %3115 = vmatmul.msk.f32.gmra.mxu0 %vm240_vm3, %v4376_v7 }
 0xfa9   :  { %v2573_v45 = vpop.xlane.xlu1 %2572 }
 0xfaa   :  { %v2579_v33 = vmul.f32 %v2573_v45, %v3842_v53 }
 0xfac   :  { %v2583_v30 = vadd.f32 1e-05, %v2579_v33 }
 0xfae   :  { %3356 = vrsqrt.f32 %v2583_v30  ;;  %vm2611_vm11 = vweird.f32 %v2583_v30 }
 0xfb1   :  { %v2576_v58 = vpop.xlane.xlu2 %2575 }
 0xfb2   :  { %v2580_v11 = vmul.f32 %v2576_v58, %v3842_v53 }
 0xfb4   :  { %v3357_v34 = vpop.eup %3356  ;;  %v2584_v28 = vadd.f32 1e-05, %v2580_v11 }
 0xfb5   :  { %v2606_v27 = vmul.f32 %v3357_v34, %v2583_v30  ;;  %vm2612_vm10 = vweird.f32 %v3357_v34 }
 0xfb6   :  { %3358 = vrsqrt.f32 %v2584_v28  ;;  %vm2613_vm12 = vmor %vm2611_vm11, %vm2612_vm10  ;;  %vm2621_vm14 = vweird.f32 %v2584_v28 }
 0xfb7   :  { %v2607_v39 = vmul.f32 %v3357_v34, %v2606_v27 }
 0xfb9   :  { %v2608_v12 = vmul.f32 0.5, %v2607_v39 }
 0xfbb   :  { %v2609_v36 = vsub.f32 1.5, %v2608_v12 }
 0xfbc   :  { %v3359_v41 = vpop.eup %3358 }
 0xfbd   :  { %v2610_v56 = vmul.f32 %v3357_v34, %v2609_v36  ;;  %v2616_v63 = vmul.f32 %v3359_v41, %v2584_v28  ;;  %vm2622_vm13 = vweird.f32 %v3359_v41 }
 0xfbe   :  { %vm2623_vm15 = vmor %vm2621_vm14, %vm2622_vm13 }
 0xfbf   :  { %v2614_v43 = vsel %vm2613_vm12, %v3357_v34, %v2610_v56  ;;  %v2617_v18 = vmul.f32 %v3359_v41, %v2616_v63 }
 0xfc0   :  { %v2627_v16 = vmul.f32 %v2614_v43, %v4344_v59  ;;  %v3033_v59 = vld [vmem:[%s4596_s3 + $0x98] sm:$0xff] }
 0xfc1   :  { %v2618_v47 = vmul.f32 0.5, %v2617_v18  ;;  %2694 = vmatpush.msrb.mxu1 %v3033_v59  ;;  %v2814_v59 = vld [vmem:[%s4598_s5 + $0x18] sm:$0xff] }
 0xfc2   :  { %v2631_v62 = vmul.f32 %v4360_v60, %v2627_v16 }
 0xfc3   :  { %v2619_v49 = vsub.f32 1.5, %v2618_v47  ;;  %2695 = vmatpush.msrb.mxu1 %v3032_v57 }
 0xfc4   :  { %v2635_v0 = vadd.f32 %v4365_v15, %v2631_v62  ;;  %v2818_v62 = vld [vmem:[%s4598_s5 + $0x38] sm:$0xff] }
 0xfc5   :  { %v2620_v21 = vmul.f32 %v3359_v41, %v2619_v49  ;;  %2696 = vmatpush.msrb.mxu1 %v3031_v2  ;;  %2860 = vmatpush.msra.mxu2 %v2818_v62  ;;  %v2816_v49 = vld [vmem:[%s4598_s5 + $0x28] sm:$0xff] }
 0xfc6   :  { %3116 = vmatmul.msk.f32.gmra.mxu0 %vm240_vm3, %v2635_v0 }
 0xfc7   :  { %v2624_v1 = vsel %vm2623_vm15, %v3359_v41, %v2620_v21  ;;  %2861 = vmatpush.msra.mxu2 %v2817_v55  ;;  %v2813_v21 = vld [vmem:[%s4598_s5 + $0x10] sm:$0xff]  ;;  %v2828_v55 = vld [vmem:[%s4598_s5 + $0x88] sm:$0xff] }
 0xfc8   :  { %v2628_v4 = vmul.f32 %v2624_v1, %v4350_v40  ;;  %v3030_v40 = vld [vmem:[%s4596_s3 + $0x80] sm:$0xff]  ;;  %v2812_v1 = vld [vmem:[%s4598_s5 + $0x8] sm:$0xff] }
 0xfc9   :  { %2697 = vmatpush.msrb.mxu1 %v3030_v40  ;;  %2862 = vmatpush.msra.mxu2 %v2816_v49 }
 0xfca   :  { %v2632_v35 = vmul.f32 %v4360_v60, %v2628_v4  ;;  %v2811_v4 = vld [vmem:[%s4598_s5] sm:$0xff] }
 0xfcc   :  { %v2636_v9 = vadd.f32 %v4365_v15, %v2632_v35 }
 0xfce   :  { %3117 = vmatmul.msk.f32.gmra.mxu0 %vm240_vm3, %v2636_v9 }
0x100d   :  { %v2666_v24 = vpop.f32.mrf.mxu0 }
0x100e   :  { %v2667_v5 = vadd.f32 %v3050_v8, %v2666_v24 }
0x1010   :  { %v2678_v52 = vmax.f32 %v2667_v5, 0.0 }
0x1012   :  { %2698 = vmatmul.f32.vlgmr.msrb.gmra.mxu1 %v2678_v52 }
0x101d   :  { %v2669_v20 = vpop.f32.mrf.mxu0 }
0x101e   :  { %v2670_v60 = vadd.f32 %v3050_v8, %v2669_v20 }
0x1020   :  { %v2679_v44 = vmax.f32 %v2670_v60, 0.0 }
0x1022   :  { %2701 = vmatmul.f32.gmra.mxu1 %v2679_v44 }
0x1043   :  { %v2672_v61 = vpop.f32.mrf.mxu0 }
0x1044   :  { %v2673_v15 = vadd.f32 %v3050_v8, %v2672_v61  ;;  %v4499_v61 = vld [vmem:[%s4597_s4 + $0x16] ss:$0 sm:$0xff] }
0x1046   :  { %v2680_v22 = vmax.f32 %v2673_v15, 0.0 }
0x1048   :  { %2704 = vmatmul.f32.gmra.mxu1 %v2680_v22 }
0x104b   :  { %v2675_v6 = vpop.f32.mrf.mxu0 }
0x104c   :  { %v2676_v23 = vadd.f32 %v3050_v8, %v2675_v6  ;;  %v4504_v6 = vld [vmem:[%s4597_s4 + $0x17] ss:$0 sm:$0xff] }
0x104e   :  { %v2681_v26 = vmax.f32 %v2676_v23, 0.0 }
0x1050   :  { %2707 = vmatmul.f32.gmra.mxu1 %v2681_v26 }
0x108f   :  { %v2699_v17 = vpop.f32.mrf.mxu1 }
0x1090   :  { %v2700_v31 = vadd.f32 %v3051_v29, %v2699_v17 }
0x1092   :  { %v2711_v51 = vadd.f32 %v2700_v31, %v4369_v3 }
0x1094   :  { %v2715_v32 = vsel %vm240_vm3, %v2711_v51, 0.0 }
0x1095   :  { %2716 = vadd.xlane.f32.xlu0 %v2715_v32 }
0x109f   :  { %v2702_v46 = vpop.f32.mrf.mxu1 }
0x10a0   :  { %v2703_v45 = vadd.f32 %v3051_v29, %v2702_v46 }
0x10a2   :  { %v2712_v33 = vadd.f32 %v2703_v45, %v4376_v7 }
0x10a4   :  { %v2718_v30 = vsel %vm240_vm3, %v2712_v33, 0.0 }
0x10a5   :  { %2719 = vadd.xlane.f32.xlu1 %v2718_v30 }
0x10c5   :  { %v2705_v19 = vpop.f32.mrf.mxu1 }
0x10c6   :  { %v2706_v13 = vadd.f32 %v3051_v29, %v2705_v19 }
0x10c8   :  { %v2713_v38 = vadd.f32 %v2706_v13, %v2635_v0  ;;  %v2815_v0 = vld [vmem:[%s4598_s5 + $0x20] sm:$0xff] }
0x10c9   :  { %2863 = vmatpush.msra.mxu2 %v2815_v0 }
0x10ca   :  { %v2721_v58 = vsel %vm240_vm3, %v2713_v38, 0.0 }
0x10cb   :  { %2722 = vadd.xlane.f32.xlu2 %v2721_v58  ;;  %2864 = vmatpush.msra.mxu2 %v2814_v59  ;;  %v2827_v59 = vld [vmem:[%s4598_s5 + $0x80] sm:$0xff] }
0x10cd   :  { %v2708_v11 = vpop.f32.mrf.mxu1  ;;  %2865 = vmatpush.msra.mxu2 %v2813_v21 }
0x10ce   :  { %v2709_v50 = vadd.f32 %v3051_v29, %v2708_v11  ;;  %v2838_v11 = vld [vmem:[%s4598_s5 + $0xd8] sm:$0xff] }
0x10cf   :  { %2866 = vmatpush.msra.mxu2 %v2812_v1  ;;  %2885 = vmatpush.msrb.mxu3 %v2838_v11 }
0x10d0   :  { %v2714_v34 = vadd.f32 %v2709_v50, %v2636_v9  ;;  %v2837_v50 = vld [vmem:[%s4598_s5 + $0xd0] sm:$0xff] }
0x10d1   :  { %2867 = vmatpush.msra.mxu2 %v2811_v4  ;;  %2886 = vmatpush.msrb.mxu3 %v2837_v50 }
0x10d2   :  { %v2724_v3 = vsel %vm240_vm3, %v2714_v34, 0.0 }
0x10d3   :  { %2725 = vadd.xlane.f32.xlu0 %v2724_v3 }
0x1108   :  { %v2717_v28 = vpop.xlane.xlu0 %2716 }
0x1109   :  { %v2727_v14 = vmul.f32 %v2717_v28, %v3842_v53 }
0x110b   :  { %v2731_v27 = vsub.f32 %v2711_v51, %v2727_v14  ;;  %v2835_v14 = vld [vmem:[%s4598_s5 + $0xc0] sm:$0xff] }
0x110d   :  { %v2735_v7 = vmul.f32 %v2731_v27, %v2731_v27 }
0x110f   :  { %v2739_v10 = vsel %vm240_vm3, %v2735_v7, 0.0 }
0x1110   :  { %2740 = vadd.xlane.f32.xlu1 %v2739_v10  ;;  %v2834_v10 = vld [vmem:[%s4598_s5 + $0xb8] sm:$0xff] }
0x1118   :  { %v2720_v39 = vpop.xlane.xlu1 %2719 }
0x1119   :  { %v2728_v25 = vmul.f32 %v2720_v39, %v3842_v53 }
0x111b   :  { %v4453_v12 = vsub.f32 %v2712_v33, %v2728_v25  ;;  %v2833_v25 = vld [vmem:[%s4598_s5 + $0xb0] sm:$0xff] }
0x111d   :  { %v2736_v42 = vmul.f32 %v4453_v12, %v4453_v12 }
0x111f   :  { %v2742_v36 = vsel %vm240_vm3, %v2736_v42, 0.0 }
0x1120   :  { %2743 = vadd.xlane.f32.xlu2 %v2742_v36  ;;  %v2831_v36 = vld [vmem:[%s4598_s5 + $0xa0] sm:$0xff] }
0x113e   :  { %v2723_v41 = vpop.xlane.xlu2 %2722 }
0x113f   :  { %v2729_v37 = vmul.f32 %v2723_v41, %v3842_v53 }
0x1141   :  { %v4459_v56 = vsub.f32 %v2713_v38, %v2729_v37 }
0x1143   :  { %v2737_v63 = vmul.f32 %v4459_v56, %v4459_v56 }
0x1145   :  { %v2745_v48 = vsel %vm240_vm3, %v2737_v63, 0.0  ;;  %v2830_v63 = vld [vmem:[%s4598_s5 + $0x98] sm:$0xff] }
0x1146   :  { %2746 = vadd.xlane.f32.xlu0 %v2745_v48  ;;  %v2726_v43 = vpop.xlane.xlu0 %2725 }
0x1147   :  { %v2730_v18 = vmul.f32 %v2726_v43, %v3842_v53 }
0x1149   :  { %v4465_v16 = vsub.f32 %v2714_v34, %v2730_v18  ;;  %v2836_v34 = vld [vmem:[%s4598_s5 + $0xc8] sm:$0xff]  ;;  %v2829_v18 = vld [vmem:[%s4598_s5 + $0x90] sm:$0xff] }
0x114a   :  { %2887 = vmatpush.msrb.mxu3 %v2836_v34 }
0x114b   :  { %v2738_v54 = vmul.f32 %v4465_v16, %v4465_v16 }
0x114c   :  { %2888 = vmatpush.msrb.mxu3 %v2835_v14 }
0x114d   :  { %v2748_v47 = vsel %vm240_vm3, %v2738_v54, 0.0 }
0x114e   :  { %2749 = vadd.xlane.f32.xlu1 %v2748_v47  ;;  %2889 = vmatpush.msrb.mxu3 %v2834_v10 }
0x1150   :  { %2890 = vmatpush.msrb.mxu3 %v2833_v25 }
0x1183   :  { %v2741_v35 = vpop.xlane.xlu1 %2740 }
0x1184   :  { %v2751_v9 = vmul.f32 %v2741_v35, %v3842_v53  ;;  %v2825_v35 = vld [vmem:[%s4598_s5 + $0x70] sm:$0xff] }
0x1186   :  { %v2755_v57 = vadd.f32 1e-05, %v2751_v9 }
0x1188   :  { %3360 = vrsqrt.f32 %v2755_v57  ;;  %vm2765_vm5 = vweird.f32 %v2755_v57 }
0x118e   :  { %v3361_v2 = vpop.eup %3360 }
0x118f   :  { %v2760_v40 = vmul.f32 %v3361_v2, %v2755_v57  ;;  %vm2766_vm1 = vweird.f32 %v3361_v2 }
0x1190   :  { %vm2767_vm0 = vmor %vm2765_vm5, %vm2766_vm1 }
0x1191   :  { %v2761_v8 = vmul.f32 %v3361_v2, %v2760_v40 }
0x1193   :  { %v2762_v24 = vmul.f32 0.5, %v2761_v8  ;;  %v2744_v5 = vpop.xlane.xlu2 %2743  ;;  %v2824_v8 = vld [vmem:[%s4598_s5 + $0x68] sm:$0xff] }
0x1194   :  { %v2752_v52 = vmul.f32 %v2744_v5, %v3842_v53 }
0x1195   :  { %v2763_v20 = vsub.f32 1.5, %v2762_v24  ;;  %v2823_v24 = vld [vmem:[%s4598_s5 + $0x60] sm:$0xff] }
0x1196   :  { %v2756_v60 = vadd.f32 1e-05, %v2752_v52 }
0x1197   :  { %v2764_v44 = vmul.f32 %v3361_v2, %v2763_v20  ;;  %v2820_v20 = vld [vmem:[%s4598_s5 + $0x48] sm:$0xff] }
0x1198   :  { %3362 = vrsqrt.f32 %v2756_v60  ;;  %vm2775_vm6 = vweird.f32 %v2756_v60 }
0x1199   :  { %v2768_v15 = vsel %vm2767_vm0, %v3361_v2, %v2764_v44 }
0x119a   :  { %v2799_v22 = vmul.f32 %v2768_v15, %v2731_v27 }
0x119c   :  { %v2803_v23 = vmul.f32 %v4499_v61, %v2799_v22 }
0x119e   :  { %v3363_v26 = vpop.eup %3362  ;;  %v2807_v29 = vadd.f32 %v4504_v6, %v2803_v23 }
0x119f   :  { %v2770_v17 = vmul.f32 %v3363_v26, %v2756_v60  ;;  %vm2776_vm4 = vweird.f32 %v3363_v26 }
0x11a0   :  { %3118 = vmatmul.msk.f32.vlgmr.msra.gmra.mxu2 %vm240_vm3, %v2807_v29  ;;  %vm2777_vm7 = vmor %vm2775_vm6, %vm2776_vm4 }
0x11a1   :  { %v2771_v31 = vmul.f32 %v3363_v26, %v2770_v17 }
0x11a3   :  { %v2772_v51 = vmul.f32 0.5, %v2771_v31 }
0x11a5   :  { %v2773_v32 = vsub.f32 1.5, %v2772_v51 }
0x11a7   :  { %v2774_v46 = vmul.f32 %v3363_v26, %v2773_v32  ;;  %v2839_v32 = vld [vmem:[%s4598_s5 + $0xe0] sm:$0x3] }
0x11a9   :  { %v2778_v45 = vsel %vm2777_vm7, %v3363_v26, %v2774_v46  ;;  %v3205_v46 = vld [vmem:[%s4594_s1 + $0x2a] ss:$0 sm:$0xff] }
0x11aa   :  { %v2800_v33 = vmul.f32 %v2778_v45, %v4453_v12 }
0x11ac   :  { %v2804_v30 = vmul.f32 %v4499_v61, %v2800_v33 }
0x11ae   :  { %v2808_v19 = vadd.f32 %v4504_v6, %v2804_v30 }
0x11b0   :  { %3119 = vmatmul.msk.f32.gmra.mxu2 %vm240_vm3, %v2808_v19 }
0x11b9   :  { %v2747_v13 = vpop.xlane.xlu0 %2746 }
0x11ba   :  { %v2753_v38 = vmul.f32 %v2747_v13, %v3842_v53 }
0x11bc   :  { %v2757_v58 = vadd.f32 1e-05, %v2753_v38 }
0x11be   :  { %3364 = vrsqrt.f32 %v2757_v58  ;;  %vm2785_vm9 = vweird.f32 %v2757_v58 }
0x11c1   :  { %v2750_v3 = vpop.xlane.xlu1 %2749 }
0x11c2   :  { %v2754_v28 = vmul.f32 %v2750_v3, %v3842_v53  ;;  %v2832_v53 = vld [vmem:[%s4598_s5 + $0xa8] sm:$0xff] }
0x11c3   :  { %2891 = vmatpush.msrb.mxu3 %v2832_v53 }
0x11c4   :  { %v3365_v27 = vpop.eup %3364  ;;  %v2758_v7 = vadd.f32 1e-05, %v2754_v28 }
0x11c5   :  { %v2780_v39 = vmul.f32 %v3365_v27, %v2757_v58  ;;  %vm2786_vm8 = vweird.f32 %v3365_v27  ;;  %2892 = vmatpush.msrb.mxu3 %v2831_v36 }
0x11c6   :  { %3366 = vrsqrt.f32 %v2758_v7  ;;  %vm2787_vm10 = vmor %vm2785_vm9, %vm2786_vm8  ;;  %vm2795_vm12 = vweird.f32 %v2758_v7 }
0x11c7   :  { %v2781_v12 = vmul.f32 %v3365_v27, %v2780_v39  ;;  %2893 = vmatpush.msrb.mxu3 %v2830_v63 }
0x11c9   :  { %v2782_v42 = vmul.f32 0.5, %v2781_v12  ;;  %2894 = vmatpush.msrb.mxu3 %v2829_v18 }
0x11cb   :  { %v2783_v41 = vsub.f32 1.5, %v2782_v42  ;;  %2895 = vmatpush.msrb.mxu3 %v2828_v55 }
0x11cc   :  { %v3367_v37 = vpop.eup %3366 }
0x11cd   :  { %v2784_v48 = vmul.f32 %v3365_v27, %v2783_v41  ;;  %v2790_v43 = vmul.f32 %v3367_v37, %v2758_v7  ;;  %vm2796_vm11 = vweird.f32 %v3367_v37  ;;  %2896 = vmatpush.msrb.mxu3 %v2827_v59 }
0x11ce   :  { %vm2797_vm13 = vmor %vm2795_vm12, %vm2796_vm11 }
0x11cf   :  { %v2788_v54 = vsel %vm2787_vm10, %v3365_v27, %v2784_v48  ;;  %v2791_v47 = vmul.f32 %v3367_v37, %v2790_v43 }
0x11d0   :  { %v2801_v62 = vmul.f32 %v2788_v54, %v4459_v56  ;;  %v2826_v56 = vld [vmem:[%s4598_s5 + $0x78] sm:$0xff] }
0x11d1   :  { %v2792_v49 = vmul.f32 0.5, %v2791_v47  ;;  %2897 = vmatpush.msrb.mxu3 %v2826_v56 }
0x11d2   :  { %v2805_v0 = vmul.f32 %v4499_v61, %v2801_v62 }
0x11d3   :  { %v2793_v21 = vsub.f32 1.5, %v2792_v49  ;;  %2898 = vmatpush.msrb.mxu3 %v2825_v35 }
0x11d4   :  { %v2809_v1 = vadd.f32 %v4504_v6, %v2805_v0 }
0x11d5   :  { %v2794_v4 = vmul.f32 %v3367_v37, %v2793_v21  ;;  %2899 = vmatpush.msrb.mxu3 %v2824_v8 }
0x11d6   :  { %3120 = vmatmul.msk.f32.gmra.mxu2 %vm240_vm3, %v2809_v1 }
0x11d7   :  { %v2798_v9 = vsel %vm2797_vm13, %v3367_v37, %v2794_v4  ;;  %2900 = vmatpush.msrb.mxu3 %v2823_v24 }
0x11d8   :  { %v2802_v57 = vmul.f32 %v2798_v9, %v4465_v16  ;;  %v2819_v16 = vld [vmem:[%s4598_s5 + $0x40] sm:$0xff] }
0x11da   :  { %v2806_v2 = vmul.f32 %v4499_v61, %v2802_v57  ;;  %v2821_v61 = vld [vmem:[%s4598_s5 + $0x50] sm:$0xff] }
0x11dc   :  { %v2810_v40 = vadd.f32 %v4504_v6, %v2806_v2  ;;  %v2822_v6 = vld [vmem:[%s4598_s5 + $0x58] sm:$0xff] }
0x11de   :  { %3121 = vmatmul.msk.f32.gmra.mxu2 %vm240_vm3, %v2810_v40  ;;  %vm2938_vm3 = vcmask 58368  }
0x1223   :  { %v2869_v5 = vpop.f32.mrf.mxu2 }
0x1224   :  { %v2881_v52 = vmul.f32 %v2869_v5, %v2819_v16 }
0x1226   :  { %2901 = vmatmul.f32.vlgmr.msrb.gmra.mxu3 %v2881_v52 }
0x1233   :  { %v2872_v60 = vpop.f32.mrf.mxu2 }
0x1234   :  { %v2882_v44 = vmul.f32 %v2872_v60, %v2820_v20 }
0x1236   :  { %2904 = vmatmul.f32.gmra.mxu3 %v2882_v44 }
0x1259   :  { %v2875_v15 = vpop.f32.mrf.mxu2 }
0x125a   :  { %v2883_v22 = vmul.f32 %v2875_v15, %v2821_v61 }
0x125c   :  { %2907 = vmatmul.f32.gmra.mxu3 %v2883_v22 }
0x1261   :  { %v2878_v23 = vpop.f32.mrf.mxu2 }
0x1262   :  { %v2884_v26 = vmul.f32 %v2878_v23, %v2822_v6 }
0x1264   :  { %2910 = vmatmul.f32.gmra.mxu3 %v2884_v26 }
0x12a9   :  { %v2902_v29 = vpop.f32.mrf.mxu3 }
0x12b9   :  { %v2905_v17 = vpop.f32.mrf.mxu3 }
0x12df   :  { %v2908_v31 = vpop.f32.mrf.mxu3 }
0x12e7   :  { %v2911_v51 = vpop.f32.mrf.mxu3 }
0x12e8   :  { %2930 = vmatpush.msra.mxu0 %v2911_v51 }
0x12ea   :  { %2931 = vmatpush.msra.mxu0 %v2908_v31 }
0x12ec   :  { %2932 = vmatpush.msra.mxu0 %v2905_v17 }
0x12ee   :  { %2933 = vmatpush.msra.mxu0 %v2902_v29 }
0x12ef   :  { %3122 = vmatmul.msk.f32.vlgmr.msra.gmra.mxu0 %vm137_vm2, %v2839_v32 }
0x136c   :  { %v2935_v45 = vpop.f32.mrf.mxu0 }
0x136d   :  { %v2936_v33 = vadd.f32 %v3205_v46, %v2935_v45 }
0x136f   :  { %2939 = vst.msk [vmem:[#allocation5] sm:$0x3] %vm2938_vm3, %v2936_v33 }
0x1370   :  { %2950 = dma.vmem_to_hbm [thread:$0]  %s2946_s12, 32, %s2948_s30, [#allocation4]  }
0x1371   :  { %3418 = dma.done.wait [#allocation4], 32  }
0x1372   :  { %3419 = vsyncadd [#allocation4], 4294967264 }
0x1373   :  { %2955 = vsyncpa [#allocation3], 1 }
0x1374   :  { %2956 = vsyncpa [#allocation4], 1 }

</bundles_post_ra>
